<compile_context>
chip_gen: v7x
topology: tpu7x:2x2x1
jax: 0.10.0
libtpu: 0.0.40
codegen_flags: <defaults>
</compile_context>

<pallas_src>
import functools

import numpy as np
import jax
import jax.numpy as jnp
from jax import lax
from jax.experimental import pallas as pl
from jax.experimental.pallas import tpu as pltpu

ALPHA = 0.2      # LeakyReLU negative slope
CIN_PAD = 8      # pad the 2 input channels to 8 so the first conv's K is aligned


# ---------------------------------------------------------------------------
# lane-axis circular shift: out[..., p] = v[..., (p + o) % n]
# pltpu.roll follows the jnp.roll convention (out[i] = in[(i - shift) % n]),
# so a "read from p+o" shift is roll by (n - o).  Border wrap is neutralized
# by the precomputed border masks.
# ---------------------------------------------------------------------------
def _shift_lanes(v, o):
    n = v.shape[-1]
    o = o % n
    if o == 0:
        return v
    return pltpu.roll(v, n - o, 1)


# ---------------------------------------------------------------------------
# fused RegPair forward kernel (whole batch in one invocation, no grid)
# ---------------------------------------------------------------------------
def _regpair_kernel(x_ref, srcT_ref, grid_ref, maskf_ref, maskh_ref,
                    pool_ref, up_ref,
                    w0_ref, b0_ref, w1_ref, b1_ref, w2_ref, b2_ref,
                    w3_ref, b3_ref, wd_ref, bd_ref,
                    out_ref, im2col_ref, *, B, H, W):
    HW = H * W
    BHW = B * HW
    H2, W2 = H // 2, W // 2
    BHW4 = B * H2 * W2

    def conv3x3(inputs, w_ref, b_ref, mask_ref, Wr, hwr, act):
        # inputs: list of (Cin_i, hwr) f32; one matmul with K = 9 * sum(Cin_i).
        ctot = sum(x.shape[0] for x in inputs)
        k = 0
        for dy in (-1, 0, 1):
            for dx in (-1, 0, 1):
                m = mask_ref[k]                                  # (1, hwr)
                off = k * ctot
                for x in inputs:
                    cin = x.shape[0]
                    im2col_ref[off:off + cin, 0:hwr] = (
                        _shift_lanes(x, dy * Wr + dx) * m)
                    off += cin
                k += 1
        stack = im2col_ref[0:9 * ctot, 0:hwr].astype(jnp.bfloat16)
        acc = jnp.dot(w_ref[...], stack, preferred_element_type=jnp.float32)
        acc = acc + b_ref[...]                                   # (Cout, 1) bcast
        if act:
            acc = jnp.maximum(acc, ALPHA * acc)                  # LeakyReLU(0.2)
        return acc

    # ---- UNet (all activations VMEM / vreg resident) ----------------------
    xin = x_ref[...].astype(jnp.float32)                                   # (8, BHW)
    e0 = conv3x3([xin], w0_ref, b0_ref, maskf_ref, W, BHW, True)           # (8, BHW)

    # 2x2 max pool: two rolled maxes, gather even positions via one matmul
    a = jnp.maximum(e0, _shift_lanes(e0, 1))
    a = jnp.maximum(a, _shift_lanes(a, W))
    p0 = jnp.dot(a.astype(jnp.bfloat16), pool_ref[...],
                 preferred_element_type=jnp.float32)                       # (8, BHW4)

    e1 = conv3x3([p0], w1_ref, b1_ref, maskh_ref, W2, BHW4, True)          # (16, BHW4)
    d1 = conv3x3([e1], w2_ref, b2_ref, maskh_ref, W2, BHW4, True)          # (16, BHW4)

    # nearest-neighbor x2 upsample via constant replication matmul
    u1 = jnp.dot(d1.astype(jnp.bfloat16), up_ref[...],
                 preferred_element_type=jnp.float32)                       # (16, BHW)

    # conv over concat([u1, e0]) as ONE matmul (K = 9*24); channel order [u1,e0]
    feat = conv3x3([u1, e0], w3_ref, b3_ref, maskf_ref, W, BHW, True)      # (8, BHW)

    # disp_gen (no activation): ch0 = dy (rows), ch1 = dx (cols)
    disp = conv3x3([feat], wd_ref, bd_ref, maskf_ref, W, BHW, False)       # (2, BHW)

    # ---- SpatialTransformer: folded bilinear one-hot gather, zeros padding -
    r_loc = grid_ref[0:1, :]                       # local row
    c_loc = grid_ref[1:2, :]                       # local col
    boff = grid_ref[2:3, :]                        # batch row offset b*H
    cy = r_loc + disp[0:1, :]
    cx = c_loc + disp[1:2, :]
    y0f = jnp.floor(cy)
    x0f = jnp.floor(cx)
    fy = cy - y0f
    fx = cx - x0f
    y0 = y0f.astype(jnp.int32)
    x0 = x0f.astype(jnp.int32)
    boff_i = boff.astype(jnp.int32)

    vy0 = ((y0 >= 0) & (y0 <= H - 1)).astype(jnp.float32)
    vy1 = ((y0 >= -1) & (y0 <= H - 2)).astype(jnp.float32)
    vx0 = ((x0 >= 0) & (x0 <= W - 1)).astype(jnp.float32)
    vx1 = ((x0 >= -1) & (x0 <= W - 2)).astype(jnp.float32)

    gy0 = y0 + boff_i                              # global (batch-offset) row index
    riota = lax.broadcasted_iota(jnp.int32, (B * H, BHW), 0)
    ciota = lax.broadcasted_iota(jnp.int32, (W, BHW), 0)

    # bilinear weights folded into the one-hots: one matmul + one reduction
    Yw = ((riota == gy0).astype(jnp.float32) * ((1.0 - fy) * vy0)
          + (riota == (gy0 + 1)).astype(jnp.float32) * (fy * vy1))         # (B*H, BHW)
    Xw = ((ciota == x0).astype(jnp.float32) * ((1.0 - fx) * vx0)
          + (ciota == (x0 + 1)).astype(jnp.float32) * (fx * vx1))          # (W, BHW)

    # srcT[c, b*H + y] = src[b, y, c]  (pre-transposed host-side, f32 for interp)
    rows = jnp.dot(srcT_ref[...], Yw, preferred_element_type=jnp.float32)  # (W, BHW)
    warped = jnp.sum(rows * Xw, axis=0, keepdims=True)                     # (1, BHW)

    # single lane-dense output slab: row 0 = warped, rows 1-2 = dvf
    out_ref[...] = jnp.concatenate([warped, disp], axis=0).astype(out_ref.dtype)


# ---------------------------------------------------------------------------
# host-side constants / parameter prep (trace-time, folded as constants)
# ---------------------------------------------------------------------------
def _make_constants(B, H, W):
    HW, H2, W2 = H * W, H // 2, W // 2
    HW4 = H2 * W2
    BHW, BHW4 = B * HW, B * HW4

    r = np.arange(HW) // W
    c = np.arange(HW) % W
    boff = np.repeat(np.arange(B) * H, HW)
    grid3 = np.stack([np.tile(r, B), np.tile(c, B), boff]).astype(np.float32)

    def border_masks(h, w):
        hw = h * w
        rr = np.arange(hw) // w
        cc = np.arange(hw) % w
        m = np.zeros((9, 1, hw), np.float32)
        k = 0
        for dy in (-1, 0, 1):
            for dx in (-1, 0, 1):
                m[k, 0] = ((rr + dy >= 0) & (rr + dy < h) &
                           (cc + dx >= 0) & (cc + dx < w)).astype(np.float32)
                k += 1
        return np.tile(m, (1, 1, B))               # identical mask per batch block

    maskf = border_masks(H, W)                     # (9, 1, BHW)
    maskh = border_masks(H2, W2)                   # (9, 1, BHW4)

    # NOTE: these select matrices scale ~quadratically with image area; fine at
    # 16x16, replace with strided gathers before scaling to large H, W.
    pool_sel = np.zeros((BHW, BHW4), np.float32)   # gather 2x2-max result (even pos)
    up_sel = np.zeros((BHW4, BHW), np.float32)     # nearest x2 replication
    for b in range(B):
        for r2 in range(H2):
            for c2 in range(W2):
                pool_sel[b * HW + (2 * r2) * W + 2 * c2,
                         b * HW4 + r2 * W2 + c2] = 1.0
        for p in range(HW):
            up_sel[b * HW4 + (r[p] // 2) * W2 + (c[p] // 2), b * HW + p] = 1.0

    return grid3, maskf, maskh, pool_sel, up_sel


def _prep_w2d(w):
    """(3,3,Cin,Cout) HWIO -> (Cout, 9*Cin) bf16, tap-major (k = 3*ky + kx)."""
    _, _, cin, cout = w.shape
    return (jnp.transpose(w.reshape(9, cin, cout), (2, 0, 1))
            .reshape(cout, 9 * cin).astype(jnp.bfloat16))


def _prep_b(b):
    return b.reshape(-1, 1).astype(jnp.float32)


def init_params(key):
    def conv_init(k, cin, cout):
        scale = (2.0 / (9 * cin)) ** 0.5
        w = scale * jax.random.normal(k, (3, 3, cin, cout), jnp.float32)
        return w, jnp.zeros((cout,), jnp.float32)

    keys = jax.random.split(key, 5)
    return {
        "enc0": conv_init(keys[0], 2, 8),
        "enc1": conv_init(keys[1], 8, 16),
        "dec1": conv_init(keys[2], 16, 16),
        "dec0": conv_init(keys[3], 16 + 8, 8),     # final_nf = 8, in = [u1, e0]
        # disp_gen: Normal(0, 1e-5) weights, zero bias (exactly as __init__)
        "disp_gen": (1e-5 * jax.random.normal(keys[4], (3, 3, 8, 2), jnp.float32),
                     jnp.zeros((2,), jnp.float32)),
    }


# ---------------------------------------------------------------------------
# public forward (RegPair.forward with cf.dvf_scale == 1)
# ---------------------------------------------------------------------------
def reg_pair_forward(params, src_nchw, tar_nchw, dvf=True):
    B, _, H, W = src_nchw.shape
    HW = H * W
    BHW = B * HW
    dt = src_nchw.dtype

    # channels-major, batch packed along lanes: x[ci, b*HW + r*W + c]
    x = jnp.concatenate(
        [src_nchw, tar_nchw, jnp.zeros((B, CIN_PAD - 2, H, W), dt)], axis=1)
    x = jnp.transpose(x.reshape(B, CIN_PAD, HW), (1, 0, 2)).reshape(CIN_PAD, BHW)
    # src transposed + batch folded on the row axis for the STN row gather
    srcT = (jnp.transpose(src_nchw[:, 0], (2, 0, 1))
            .reshape(W, B * H).astype(jnp.float32))

    grid3, maskf, maskh, pool_sel, up_sel = _make_constants(B, H, W)

    w0_raw, b0_raw = params["enc0"]
    w0 = _prep_w2d(jnp.pad(w0_raw, ((0, 0), (0, 0), (0, CIN_PAD - 2), (0, 0))))
    b0 = _prep_b(b0_raw)
    w1, b1 = _prep_w2d(params["enc1"][0]), _prep_b(params["enc1"][1])
    w2, b2 = _prep_w2d(params["dec1"][0]), _prep_b(params["dec1"][1])
    w3, b3 = _prep_w2d(params["dec0"][0]), _prep_b(params["dec0"][1])
    wd, bd = _prep_w2d(params["disp_gen"][0]), _prep_b(params["disp_gen"][1])

    kernel = functools.partial(_regpair_kernel, B=B, H=H, W=W)

    out = pl.pallas_call(
        kernel,
        out_shape=jax.ShapeDtypeStruct((3, BHW), dt),
        # im2col scratch sized for the widest conv (skip-concat: 24 channels)
        scratch_shapes=[pltpu.VMEM((9 * (16 + CIN_PAD), BHW), jnp.float32)],
        compiler_params=pltpu.CompilerParams(vmem_limit_bytes=32 * 1024 * 1024),
    )(x, srcT,
      jnp.asarray(grid3), jnp.asarray(maskf), jnp.asarray(maskh),
      jnp.asarray(pool_sel, jnp.bfloat16), jnp.asarray(up_sel, jnp.bfloat16),
      w0, b0, w1, b1, w2, b2, w3, b3, wd, bd)

    out = jnp.transpose(out.reshape(3, B, H, W), (1, 0, 2, 3))   # (B, 3, H, W)
    res = {"warped_input": out[:, 0:1]}
    if dvf:
        res["dvf"] = out[:, 1:3]
    return res


if __name__ == "__main__":
    key = jax.random.PRNGKey(0)
    kp, ks, kt = jax.random.split(key, 3)
    params = init_params(kp)

    B, H, W = 2, 16, 16
    src = jax.random.uniform(ks, (B, 1, H, W), jnp.float32)
    tar = jax.random.uniform(kt, (B, 1, H, W), jnp.float32)

    fwd = jax.jit(functools.partial(reg_pair_forward, dvf=True))
    out = fwd(params, src, tar)
    jax.block_until_ready(out)

    assert out["warped_input"].shape == (B, 1, H, W)
    assert out["dvf"].shape == (B, 2, H, W)
    assert bool(jnp.all(jnp.isfinite(out["warped_input"])))
    assert bool(jnp.all(jnp.isfinite(out["dvf"])))
    print("KERNEL_OK")
</pallas_src>

<mosaic_0001>
module attributes {stable_mosaic.version = 11 : i64} {
  func.func @_regpair_kernel(%arg0: memref<8x512xf32, #tpu.memory_space<vmem>>, %arg1: memref<16x32xf32, #tpu.memory_space<vmem>>, %arg2: memref<3x512xf32, #tpu.memory_space<vmem>>, %arg3: memref<9x1x512xf32, #tpu.memory_space<vmem>>, %arg4: memref<9x1x128xf32, #tpu.memory_space<vmem>>, %arg5: memref<512x128xbf16, #tpu.memory_space<vmem>>, %arg6: memref<128x512xbf16, #tpu.memory_space<vmem>>, %arg7: memref<8x72xbf16, #tpu.memory_space<vmem>>, %arg8: memref<8x1xf32, #tpu.memory_space<vmem>>, %arg9: memref<16x72xbf16, #tpu.memory_space<vmem>>, %arg10: memref<16x1xf32, #tpu.memory_space<vmem>>, %arg11: memref<16x144xbf16, #tpu.memory_space<vmem>>, %arg12: memref<16x1xf32, #tpu.memory_space<vmem>>, %arg13: memref<8x216xbf16, #tpu.memory_space<vmem>>, %arg14: memref<8x1xf32, #tpu.memory_space<vmem>>, %arg15: memref<2x72xbf16, #tpu.memory_space<vmem>>, %arg16: memref<2x1xf32, #tpu.memory_space<vmem>>, %arg17: memref<3x512xf32, #tpu.memory_space<vmem>>, %arg18: memref<216x512xf32, #tpu.memory_space<vmem>>) attributes {dimension_semantics = [], scalar_prefetch = 0 : i64, scratch_operands = 1 : i64, tpu.core_type = #tpu.core_type<tc>} {
    %c0 = arith.constant 0 : index
    %c0_0 = arith.constant 0 : index
    %0 = vector.load %arg0[%c0, %c0_0] : memref<8x512xf32, #tpu.memory_space<vmem>>, vector<8x512xf32>
    %c0_1 = arith.constant 0 : index
    %c0_2 = arith.constant 0 : index
    %c0_3 = arith.constant 0 : index
    %1 = vector.load %arg3[%c0_1, %c0_2, %c0_3] : memref<9x1x512xf32, #tpu.memory_space<vmem>>, vector<1x1x512xf32>
    %2 = vector.shape_cast %1 : vector<1x1x512xf32> to vector<1x512xf32>
    %c17_i32 = arith.constant 17 : i32
    %3 = tpu.dynamic_rotate %0 by %c17_i32 dim 1 : vector<8x512xf32>, i32 -> vector<8x512xf32>
    %4 = vector.broadcast %2 : vector<1x512xf32> to vector<8x512xf32>
    %5 = arith.mulf %3, %4 : vector<8x512xf32>
    %c0_4 = arith.constant 0 : index
    %c0_5 = arith.constant 0 : index
    %6 = vector.load %arg18[%c0_4, %c0_5] : memref<216x512xf32, #tpu.memory_space<vmem>>, vector<8x512xf32>
    tpu.vector_store %arg18[%c0_4, %c0_5], %5 {strides = array<i32>} : memref<216x512xf32, #tpu.memory_space<vmem>>, vector<8x512xf32>,
    %c1 = arith.constant 1 : index
    %c0_6 = arith.constant 0 : index
    %c0_7 = arith.constant 0 : index
    %7 = vector.load %arg3[%c1, %c0_6, %c0_7] : memref<9x1x512xf32, #tpu.memory_space<vmem>>, vector<1x1x512xf32>
    %8 = vector.shape_cast %7 : vector<1x1x512xf32> to vector<1x512xf32>
    %c16_i32 = arith.constant 16 : i32
    %9 = tpu.dynamic_rotate %0 by %c16_i32 dim 1 : vector<8x512xf32>, i32 -> vector<8x512xf32>
    %10 = vector.broadcast %8 : vector<1x512xf32> to vector<8x512xf32>
    %11 = arith.mulf %9, %10 : vector<8x512xf32>
    %c8 = arith.constant 8 : index
    %c0_8 = arith.constant 0 : index
    %12 = vector.load %arg18[%c8, %c0_8] : memref<216x512xf32, #tpu.memory_space<vmem>>, vector<8x512xf32>
    tpu.vector_store %arg18[%c8, %c0_8], %11 {strides = array<i32>} : memref<216x512xf32, #tpu.memory_space<vmem>>, vector<8x512xf32>,
    %c2 = arith.constant 2 : index
    %c0_9 = arith.constant 0 : index
    %c0_10 = arith.constant 0 : index
    %13 = vector.load %arg3[%c2, %c0_9, %c0_10] : memref<9x1x512xf32, #tpu.memory_space<vmem>>, vector<1x1x512xf32>
    %14 = vector.shape_cast %13 : vector<1x1x512xf32> to vector<1x512xf32>
    %c15_i32 = arith.constant 15 : i32
    %15 = tpu.dynamic_rotate %0 by %c15_i32 dim 1 : vector<8x512xf32>, i32 -> vector<8x512xf32>
    %16 = vector.broadcast %14 : vector<1x512xf32> to vector<8x512xf32>
    %17 = arith.mulf %15, %16 : vector<8x512xf32>
    %c16 = arith.constant 16 : index
    %c0_11 = arith.constant 0 : index
    %18 = vector.load %arg18[%c16, %c0_11] : memref<216x512xf32, #tpu.memory_space<vmem>>, vector<8x512xf32>
    tpu.vector_store %arg18[%c16, %c0_11], %17 {strides = array<i32>} : memref<216x512xf32, #tpu.memory_space<vmem>>, vector<8x512xf32>,
    %c3 = arith.constant 3 : index
    %c0_12 = arith.constant 0 : index
    %c0_13 = arith.constant 0 : index
    %19 = vector.load %arg3[%c3, %c0_12, %c0_13] : memref<9x1x512xf32, #tpu.memory_space<vmem>>, vector<1x1x512xf32>
    %20 = vector.shape_cast %19 : vector<1x1x512xf32> to vector<1x512xf32>
    %c1_i32 = arith.constant 1 : i32
    %21 = tpu.dynamic_rotate %0 by %c1_i32 dim 1 : vector<8x512xf32>, i32 -> vector<8x512xf32>
    %22 = vector.broadcast %20 : vector<1x512xf32> to vector<8x512xf32>
    %23 = arith.mulf %21, %22 : vector<8x512xf32>
    %c24 = arith.constant 24 : index
    %c0_14 = arith.constant 0 : index
    %24 = vector.load %arg18[%c24, %c0_14] : memref<216x512xf32, #tpu.memory_space<vmem>>, vector<8x512xf32>
    tpu.vector_store %arg18[%c24, %c0_14], %23 {strides = array<i32>} : memref<216x512xf32, #tpu.memory_space<vmem>>, vector<8x512xf32>,
    %c4 = arith.constant 4 : index
    %c0_15 = arith.constant 0 : index
    %c0_16 = arith.constant 0 : index
    %25 = vector.load %arg3[%c4, %c0_15, %c0_16] : memref<9x1x512xf32, #tpu.memory_space<vmem>>, vector<1x1x512xf32>
    %26 = vector.shape_cast %25 : vector<1x1x512xf32> to vector<1x512xf32>
    %27 = vector.broadcast %26 : vector<1x512xf32> to vector<8x512xf32>
    %28 = arith.mulf %0, %27 : vector<8x512xf32>
    %c32 = arith.constant 32 : index
    %c0_17 = arith.constant 0 : index
    %29 = vector.load %arg18[%c32, %c0_17] : memref<216x512xf32, #tpu.memory_space<vmem>>, vector<8x512xf32>
    tpu.vector_store %arg18[%c32, %c0_17], %28 {strides = array<i32>} : memref<216x512xf32, #tpu.memory_space<vmem>>, vector<8x512xf32>,
    %c5 = arith.constant 5 : index
    %c0_18 = arith.constant 0 : index
    %c0_19 = arith.constant 0 : index
    %30 = vector.load %arg3[%c5, %c0_18, %c0_19] : memref<9x1x512xf32, #tpu.memory_space<vmem>>, vector<1x1x512xf32>
    %31 = vector.shape_cast %30 : vector<1x1x512xf32> to vector<1x512xf32>
    %c511_i32 = arith.constant 511 : i32
    %32 = tpu.dynamic_rotate %0 by %c511_i32 dim 1 : vector<8x512xf32>, i32 -> vector<8x512xf32>
    %33 = vector.broadcast %31 : vector<1x512xf32> to vector<8x512xf32>
    %34 = arith.mulf %32, %33 : vector<8x512xf32>
    %c40 = arith.constant 40 : index
    %c0_20 = arith.constant 0 : index
    %35 = vector.load %arg18[%c40, %c0_20] : memref<216x512xf32, #tpu.memory_space<vmem>>, vector<8x512xf32>
    tpu.vector_store %arg18[%c40, %c0_20], %34 {strides = array<i32>} : memref<216x512xf32, #tpu.memory_space<vmem>>, vector<8x512xf32>,
    %c6 = arith.constant 6 : index
    %c0_21 = arith.constant 0 : index
    %c0_22 = arith.constant 0 : index
    %36 = vector.load %arg3[%c6, %c0_21, %c0_22] : memref<9x1x512xf32, #tpu.memory_space<vmem>>, vector<1x1x512xf32>
    %37 = vector.shape_cast %36 : vector<1x1x512xf32> to vector<1x512xf32>
    %c497_i32 = arith.constant 497 : i32
    %38 = tpu.dynamic_rotate %0 by %c497_i32 dim 1 : vector<8x512xf32>, i32 -> vector<8x512xf32>
    %39 = vector.broadcast %37 : vector<1x512xf32> to vector<8x512xf32>
    %40 = arith.mulf %38, %39 : vector<8x512xf32>
    %c48 = arith.constant 48 : index
    %c0_23 = arith.constant 0 : index
    %41 = vector.load %arg18[%c48, %c0_23] : memref<216x512xf32, #tpu.memory_space<vmem>>, vector<8x512xf32>
    tpu.vector_store %arg18[%c48, %c0_23], %40 {strides = array<i32>} : memref<216x512xf32, #tpu.memory_space<vmem>>, vector<8x512xf32>,
    %c7 = arith.constant 7 : index
    %c0_24 = arith.constant 0 : index
    %c0_25 = arith.constant 0 : index
    %42 = vector.load %arg3[%c7, %c0_24, %c0_25] : memref<9x1x512xf32, #tpu.memory_space<vmem>>, vector<1x1x512xf32>
    %43 = vector.shape_cast %42 : vector<1x1x512xf32> to vector<1x512xf32>
    %c496_i32 = arith.constant 496 : i32
    %44 = tpu.dynamic_rotate %0 by %c496_i32 dim 1 : vector<8x512xf32>, i32 -> vector<8x512xf32>
    %45 = vector.broadcast %43 : vector<1x512xf32> to vector<8x512xf32>
    %46 = arith.mulf %44, %45 : vector<8x512xf32>
    %c56 = arith.constant 56 : index
    %c0_26 = arith.constant 0 : index
    %47 = vector.load %arg18[%c56, %c0_26] : memref<216x512xf32, #tpu.memory_space<vmem>>, vector<8x512xf32>
    tpu.vector_store %arg18[%c56, %c0_26], %46 {strides = array<i32>} : memref<216x512xf32, #tpu.memory_space<vmem>>, vector<8x512xf32>,
    %c8_27 = arith.constant 8 : index
    %c0_28 = arith.constant 0 : index
    %c0_29 = arith.constant 0 : index
    %48 = vector.load %arg3[%c8_27, %c0_28, %c0_29] : memref<9x1x512xf32, #tpu.memory_space<vmem>>, vector<1x1x512xf32>
    %49 = vector.shape_cast %48 : vector<1x1x512xf32> to vector<1x512xf32>
    %c495_i32 = arith.constant 495 : i32
    %50 = tpu.dynamic_rotate %0 by %c495_i32 dim 1 : vector<8x512xf32>, i32 -> vector<8x512xf32>
    %51 = vector.broadcast %49 : vector<1x512xf32> to vector<8x512xf32>
    %52 = arith.mulf %50, %51 : vector<8x512xf32>
    %c64 = arith.constant 64 : index
    %c0_30 = arith.constant 0 : index
    %53 = vector.load %arg18[%c64, %c0_30] : memref<216x512xf32, #tpu.memory_space<vmem>>, vector<8x512xf32>
    tpu.vector_store %arg18[%c64, %c0_30], %52 {strides = array<i32>} : memref<216x512xf32, #tpu.memory_space<vmem>>, vector<8x512xf32>,
    %c0_31 = arith.constant 0 : index
    %c0_32 = arith.constant 0 : index
    %54 = vector.load %arg18[%c0_31, %c0_32] : memref<216x512xf32, #tpu.memory_space<vmem>>, vector<72x512xf32>
    %55 = arith.truncf %54 : vector<72x512xf32> to vector<72x512xbf16>
    %c0_33 = arith.constant 0 : index
    %c0_34 = arith.constant 0 : index
    %56 = vector.load %arg7[%c0_33, %c0_34] : memref<8x72xbf16, #tpu.memory_space<vmem>>, vector<8x72xbf16>
    %cst = arith.constant dense<0.000000e+00> : vector<8x512xf32>
    %57 = tpu.matmul %56, %55, %cst {dimension_numbers = #tpu.dot_dimension_numbers<[1], [0], [0], [1], [0, 0, 1, 1], [], []>} : vector<8x72xbf16>, vector<72x512xbf16>, vector<8x512xf32> -> vector<8x512xf32>
    %c0_35 = arith.constant 0 : index
    %c0_36 = arith.constant 0 : index
    %58 = vector.load %arg8[%c0_35, %c0_36] : memref<8x1xf32, #tpu.memory_space<vmem>>, vector<8x1xf32>
    %59 = vector.broadcast %58 : vector<8x1xf32> to vector<8x512xf32>
    %60 = arith.addf %57, %59 : vector<8x512xf32>
    %cst_37 = arith.constant 2.000000e-01 : f32
    %61 = vector.broadcast %cst_37 : f32 to vector<8x512xf32>
    %62 = arith.mulf %61, %60 : vector<8x512xf32>
    %63 = arith.maximumf %60, %62 : vector<8x512xf32>
    %c511_i32_38 = arith.constant 511 : i32
    %64 = tpu.dynamic_rotate %63 by %c511_i32_38 dim 1 : vector<8x512xf32>, i32 -> vector<8x512xf32>
    %65 = arith.maximumf %63, %64 : vector<8x512xf32>
    %c496_i32_39 = arith.constant 496 : i32
    %66 = tpu.dynamic_rotate %65 by %c496_i32_39 dim 1 : vector<8x512xf32>, i32 -> vector<8x512xf32>
    %67 = arith.maximumf %65, %66 : vector<8x512xf32>
    %68 = arith.truncf %67 : vector<8x512xf32> to vector<8x512xbf16>
    %c0_40 = arith.constant 0 : index
    %c0_41 = arith.constant 0 : index
    %69 = vector.load %arg5[%c0_40, %c0_41] : memref<512x128xbf16, #tpu.memory_space<vmem>>, vector<512x128xbf16>
    %cst_42 = arith.constant dense<0.000000e+00> : vector<8x128xf32>
    %70 = tpu.matmul %68, %69, %cst_42 {dimension_numbers = #tpu.dot_dimension_numbers<[1], [0], [0], [1], [0, 0, 1, 1], [], []>} : vector<8x512xbf16>, vector<512x128xbf16>, vector<8x128xf32> -> vector<8x128xf32>
    %c0_43 = arith.constant 0 : index
    %c0_44 = arith.constant 0 : index
    %c0_45 = arith.constant 0 : index
    %71 = vector.load %arg4[%c0_43, %c0_44, %c0_45] : memref<9x1x128xf32, #tpu.memory_space<vmem>>, vector<1x1x128xf32>
    %72 = vector.shape_cast %71 : vector<1x1x128xf32> to vector<1x128xf32>
    %c9_i32 = arith.constant 9 : i32
    %73 = tpu.dynamic_rotate %70 by %c9_i32 dim 1 : vector<8x128xf32>, i32 -> vector<8x128xf32>
    %74 = vector.broadcast %72 : vector<1x128xf32> to vector<8x128xf32>
    %75 = arith.mulf %73, %74 : vector<8x128xf32>
    %c0_46 = arith.constant 0 : index
    %c0_47 = arith.constant 0 : index
    %76 = vector.load %arg18[%c0_46, %c0_47] : memref<216x512xf32, #tpu.memory_space<vmem>>, vector<8x128xf32>
    tpu.vector_store %arg18[%c0_46, %c0_47], %75 {strides = array<i32>} : memref<216x512xf32, #tpu.memory_space<vmem>>, vector<8x128xf32>,
    %c1_48 = arith.constant 1 : index
    %c0_49 = arith.constant 0 : index
    %c0_50 = arith.constant 0 : index
    %77 = vector.load %arg4[%c1_48, %c0_49, %c0_50] : memref<9x1x128xf32, #tpu.memory_space<vmem>>, vector<1x1x128xf32>
    %78 = vector.shape_cast %77 : vector<1x1x128xf32> to vector<1x128xf32>
    %c8_i32 = arith.constant 8 : i32
    %79 = tpu.dynamic_rotate %70 by %c8_i32 dim 1 : vector<8x128xf32>, i32 -> vector<8x128xf32>
    %80 = vector.broadcast %78 : vector<1x128xf32> to vector<8x128xf32>
    %81 = arith.mulf %79, %80 : vector<8x128xf32>
    %c8_51 = arith.constant 8 : index
    %c0_52 = arith.constant 0 : index
    %82 = vector.load %arg18[%c8_51, %c0_52] : memref<216x512xf32, #tpu.memory_space<vmem>>, vector<8x128xf32>
    tpu.vector_store %arg18[%c8_51, %c0_52], %81 {strides = array<i32>} : memref<216x512xf32, #tpu.memory_space<vmem>>, vector<8x128xf32>,
    %c2_53 = arith.constant 2 : index
    %c0_54 = arith.constant 0 : index
    %c0_55 = arith.constant 0 : index
    %83 = vector.load %arg4[%c2_53, %c0_54, %c0_55] : memref<9x1x128xf32, #tpu.memory_space<vmem>>, vector<1x1x128xf32>
    %84 = vector.shape_cast %83 : vector<1x1x128xf32> to vector<1x128xf32>
    %c7_i32 = arith.constant 7 : i32
    %85 = tpu.dynamic_rotate %70 by %c7_i32 dim 1 : vector<8x128xf32>, i32 -> vector<8x128xf32>
    %86 = vector.broadcast %84 : vector<1x128xf32> to vector<8x128xf32>
    %87 = arith.mulf %85, %86 : vector<8x128xf32>
    %c16_56 = arith.constant 16 : index
    %c0_57 = arith.constant 0 : index
    %88 = vector.load %arg18[%c16_56, %c0_57] : memref<216x512xf32, #tpu.memory_space<vmem>>, vector<8x128xf32>
    tpu.vector_store %arg18[%c16_56, %c0_57], %87 {strides = array<i32>} : memref<216x512xf32, #tpu.memory_space<vmem>>, vector<8x128xf32>,
    %c3_58 = arith.constant 3 : index
    %c0_59 = arith.constant 0 : index
    %c0_60 = arith.constant 0 : index
    %89 = vector.load %arg4[%c3_58, %c0_59, %c0_60] : memref<9x1x128xf32, #tpu.memory_space<vmem>>, vector<1x1x128xf32>
    %90 = vector.shape_cast %89 : vector<1x1x128xf32> to vector<1x128xf32>
    %c1_i32_61 = arith.constant 1 : i32
    %91 = tpu.dynamic_rotate %70 by %c1_i32_61 dim 1 : vector<8x128xf32>, i32 -> vector<8x128xf32>
    %92 = vector.broadcast %90 : vector<1x128xf32> to vector<8x128xf32>
    %93 = arith.mulf %91, %92 : vector<8x128xf32>
    %c24_62 = arith.constant 24 : index
    %c0_63 = arith.constant 0 : index
    %94 = vector.load %arg18[%c24_62, %c0_63] : memref<216x512xf32, #tpu.memory_space<vmem>>, vector<8x128xf32>
    tpu.vector_store %arg18[%c24_62, %c0_63], %93 {strides = array<i32>} : memref<216x512xf32, #tpu.memory_space<vmem>>, vector<8x128xf32>,
    %c4_64 = arith.constant 4 : index
    %c0_65 = arith.constant 0 : index
    %c0_66 = arith.constant 0 : index
    %95 = vector.load %arg4[%c4_64, %c0_65, %c0_66] : memref<9x1x128xf32, #tpu.memory_space<vmem>>, vector<1x1x128xf32>
    %96 = vector.shape_cast %95 : vector<1x1x128xf32> to vector<1x128xf32>
    %97 = vector.broadcast %96 : vector<1x128xf32> to vector<8x128xf32>
    %98 = arith.mulf %70, %97 : vector<8x128xf32>
    %c32_67 = arith.constant 32 : index
    %c0_68 = arith.constant 0 : index
    %99 = vector.load %arg18[%c32_67, %c0_68] : memref<216x512xf32, #tpu.memory_space<vmem>>, vector<8x128xf32>
    tpu.vector_store %arg18[%c32_67, %c0_68], %98 {strides = array<i32>} : memref<216x512xf32, #tpu.memory_space<vmem>>, vector<8x128xf32>,
    %c5_69 = arith.constant 5 : index
    %c0_70 = arith.constant 0 : index
    %c0_71 = arith.constant 0 : index
    %100 = vector.load %arg4[%c5_69, %c0_70, %c0_71] : memref<9x1x128xf32, #tpu.memory_space<vmem>>, vector<1x1x128xf32>
    %101 = vector.shape_cast %100 : vector<1x1x128xf32> to vector<1x128xf32>
    %c127_i32 = arith.constant 127 : i32
    %102 = tpu.dynamic_rotate %70 by %c127_i32 dim 1 : vector<8x128xf32>, i32 -> vector<8x128xf32>
    %103 = vector.broadcast %101 : vector<1x128xf32> to vector<8x128xf32>
    %104 = arith.mulf %102, %103 : vector<8x128xf32>
    %c40_72 = arith.constant 40 : index
    %c0_73 = arith.constant 0 : index
    %105 = vector.load %arg18[%c40_72, %c0_73] : memref<216x512xf32, #tpu.memory_space<vmem>>, vector<8x128xf32>
    tpu.vector_store %arg18[%c40_72, %c0_73], %104 {strides = array<i32>} : memref<216x512xf32, #tpu.memory_space<vmem>>, vector<8x128xf32>,
    %c6_74 = arith.constant 6 : index
    %c0_75 = arith.constant 0 : index
    %c0_76 = arith.constant 0 : index
    %106 = vector.load %arg4[%c6_74, %c0_75, %c0_76] : memref<9x1x128xf32, #tpu.memory_space<vmem>>, vector<1x1x128xf32>
    %107 = vector.shape_cast %106 : vector<1x1x128xf32> to vector<1x128xf32>
    %c121_i32 = arith.constant 121 : i32
    %108 = tpu.dynamic_rotate %70 by %c121_i32 dim 1 : vector<8x128xf32>, i32 -> vector<8x128xf32>
    %109 = vector.broadcast %107 : vector<1x128xf32> to vector<8x128xf32>
    %110 = arith.mulf %108, %109 : vector<8x128xf32>
    %c48_77 = arith.constant 48 : index
    %c0_78 = arith.constant 0 : index
    %111 = vector.load %arg18[%c48_77, %c0_78] : memref<216x512xf32, #tpu.memory_space<vmem>>, vector<8x128xf32>
    tpu.vector_store %arg18[%c48_77, %c0_78], %110 {strides = array<i32>} : memref<216x512xf32, #tpu.memory_space<vmem>>, vector<8x128xf32>,
    %c7_79 = arith.constant 7 : index
    %c0_80 = arith.constant 0 : index
    %c0_81 = arith.constant 0 : index
    %112 = vector.load %arg4[%c7_79, %c0_80, %c0_81] : memref<9x1x128xf32, #tpu.memory_space<vmem>>, vector<1x1x128xf32>
    %113 = vector.shape_cast %112 : vector<1x1x128xf32> to vector<1x128xf32>
    %c120_i32 = arith.constant 120 : i32
    %114 = tpu.dynamic_rotate %70 by %c120_i32 dim 1 : vector<8x128xf32>, i32 -> vector<8x128xf32>
    %115 = vector.broadcast %113 : vector<1x128xf32> to vector<8x128xf32>
    %116 = arith.mulf %114, %115 : vector<8x128xf32>
    %c56_82 = arith.constant 56 : index
    %c0_83 = arith.constant 0 : index
    %117 = vector.load %arg18[%c56_82, %c0_83] : memref<216x512xf32, #tpu.memory_space<vmem>>, vector<8x128xf32>
    tpu.vector_store %arg18[%c56_82, %c0_83], %116 {strides = array<i32>} : memref<216x512xf32, #tpu.memory_space<vmem>>, vector<8x128xf32>,
    %c8_84 = arith.constant 8 : index
    %c0_85 = arith.constant 0 : index
    %c0_86 = arith.constant 0 : index
    %118 = vector.load %arg4[%c8_84, %c0_85, %c0_86] : memref<9x1x128xf32, #tpu.memory_space<vmem>>, vector<1x1x128xf32>
    %119 = vector.shape_cast %118 : vector<1x1x128xf32> to vector<1x128xf32>
    %c119_i32 = arith.constant 119 : i32
    %120 = tpu.dynamic_rotate %70 by %c119_i32 dim 1 : vector<8x128xf32>, i32 -> vector<8x128xf32>
    %121 = vector.broadcast %119 : vector<1x128xf32> to vector<8x128xf32>
    %122 = arith.mulf %120, %121 : vector<8x128xf32>
    %c64_87 = arith.constant 64 : index
    %c0_88 = arith.constant 0 : index
    %123 = vector.load %arg18[%c64_87, %c0_88] : memref<216x512xf32, #tpu.memory_space<vmem>>, vector<8x128xf32>
    tpu.vector_store %arg18[%c64_87, %c0_88], %122 {strides = array<i32>} : memref<216x512xf32, #tpu.memory_space<vmem>>, vector<8x128xf32>,
    %c0_89 = arith.constant 0 : index
    %c0_90 = arith.constant 0 : index
    %124 = vector.load %arg18[%c0_89, %c0_90] : memref<216x512xf32, #tpu.memory_space<vmem>>, vector<72x128xf32>
    %125 = arith.truncf %124 : vector<72x128xf32> to vector<72x128xbf16>
    %c0_91 = arith.constant 0 : index
    %c0_92 = arith.constant 0 : index
    %126 = vector.load %arg9[%c0_91, %c0_92] : memref<16x72xbf16, #tpu.memory_space<vmem>>, vector<16x72xbf16>
    %cst_93 = arith.constant dense<0.000000e+00> : vector<16x128xf32>
    %127 = tpu.matmul %126, %125, %cst_93 {dimension_numbers = #tpu.dot_dimension_numbers<[1], [0], [0], [1], [0, 0, 1, 1], [], []>} : vector<16x72xbf16>, vector<72x128xbf16>, vector<16x128xf32> -> vector<16x128xf32>
    %c0_94 = arith.constant 0 : index
    %c0_95 = arith.constant 0 : index
    %128 = vector.load %arg10[%c0_94, %c0_95] : memref<16x1xf32, #tpu.memory_space<vmem>>, vector<16x1xf32>
    %129 = vector.broadcast %128 : vector<16x1xf32> to vector<16x128xf32>
    %130 = arith.addf %127, %129 : vector<16x128xf32>
    %cst_96 = arith.constant 2.000000e-01 : f32
    %131 = vector.broadcast %cst_96 : f32 to vector<16x128xf32>
    %132 = arith.mulf %131, %130 : vector<16x128xf32>
    %133 = arith.maximumf %130, %132 : vector<16x128xf32>
    %c0_97 = arith.constant 0 : index
    %c0_98 = arith.constant 0 : index
    %c0_99 = arith.constant 0 : index
    %134 = vector.load %arg4[%c0_97, %c0_98, %c0_99] : memref<9x1x128xf32, #tpu.memory_space<vmem>>, vector<1x1x128xf32>
    %135 = vector.shape_cast %134 : vector<1x1x128xf32> to vector<1x128xf32>
    %c9_i32_100 = arith.constant 9 : i32
    %136 = tpu.dynamic_rotate %133 by %c9_i32_100 dim 1 : vector<16x128xf32>, i32 -> vector<16x128xf32>
    %137 = vector.broadcast %135 : vector<1x128xf32> to vector<16x128xf32>
    %138 = arith.mulf %136, %137 : vector<16x128xf32>
    %c0_101 = arith.constant 0 : index
    %c0_102 = arith.constant 0 : index
    %139 = vector.load %arg18[%c0_101, %c0_102] : memref<216x512xf32, #tpu.memory_space<vmem>>, vector<16x128xf32>
    tpu.vector_store %arg18[%c0_101, %c0_102], %138 {strides = array<i32>} : memref<216x512xf32, #tpu.memory_space<vmem>>, vector<16x128xf32>,
    %c1_103 = arith.constant 1 : index
    %c0_104 = arith.constant 0 : index
    %c0_105 = arith.constant 0 : index
    %140 = vector.load %arg4[%c1_103, %c0_104, %c0_105] : memref<9x1x128xf32, #tpu.memory_space<vmem>>, vector<1x1x128xf32>
    %141 = vector.shape_cast %140 : vector<1x1x128xf32> to vector<1x128xf32>
    %c8_i32_106 = arith.constant 8 : i32
    %142 = tpu.dynamic_rotate %133 by %c8_i32_106 dim 1 : vector<16x128xf32>, i32 -> vector<16x128xf32>
    %143 = vector.broadcast %141 : vector<1x128xf32> to vector<16x128xf32>
    %144 = arith.mulf %142, %143 : vector<16x128xf32>
    %c16_107 = arith.constant 16 : index
    %c0_108 = arith.constant 0 : index
    %145 = vector.load %arg18[%c16_107, %c0_108] : memref<216x512xf32, #tpu.memory_space<vmem>>, vector<16x128xf32>
    tpu.vector_store %arg18[%c16_107, %c0_108], %144 {strides = array<i32>} : memref<216x512xf32, #tpu.memory_space<vmem>>, vector<16x128xf32>,
    %c2_109 = arith.constant 2 : index
    %c0_110 = arith.constant 0 : index
    %c0_111 = arith.constant 0 : index
    %146 = vector.load %arg4[%c2_109, %c0_110, %c0_111] : memref<9x1x128xf32, #tpu.memory_space<vmem>>, vector<1x1x128xf32>
    %147 = vector.shape_cast %146 : vector<1x1x128xf32> to vector<1x128xf32>
    %c7_i32_112 = arith.constant 7 : i32
    %148 = tpu.dynamic_rotate %133 by %c7_i32_112 dim 1 : vector<16x128xf32>, i32 -> vector<16x128xf32>
    %149 = vector.broadcast %147 : vector<1x128xf32> to vector<16x128xf32>
    %150 = arith.mulf %148, %149 : vector<16x128xf32>
    %c32_113 = arith.constant 32 : index
    %c0_114 = arith.constant 0 : index
    %151 = vector.load %arg18[%c32_113, %c0_114] : memref<216x512xf32, #tpu.memory_space<vmem>>, vector<16x128xf32>
    tpu.vector_store %arg18[%c32_113, %c0_114], %150 {strides = array<i32>} : memref<216x512xf32, #tpu.memory_space<vmem>>, vector<16x128xf32>,
    %c3_115 = arith.constant 3 : index
    %c0_116 = arith.constant 0 : index
    %c0_117 = arith.constant 0 : index
    %152 = vector.load %arg4[%c3_115, %c0_116, %c0_117] : memref<9x1x128xf32, #tpu.memory_space<vmem>>, vector<1x1x128xf32>
    %153 = vector.shape_cast %152 : vector<1x1x128xf32> to vector<1x128xf32>
    %c1_i32_118 = arith.constant 1 : i32
    %154 = tpu.dynamic_rotate %133 by %c1_i32_118 dim 1 : vector<16x128xf32>, i32 -> vector<16x128xf32>
    %155 = vector.broadcast %153 : vector<1x128xf32> to vector<16x128xf32>
    %156 = arith.mulf %154, %155 : vector<16x128xf32>
    %c48_119 = arith.constant 48 : index
    %c0_120 = arith.constant 0 : index
    %157 = vector.load %arg18[%c48_119, %c0_120] : memref<216x512xf32, #tpu.memory_space<vmem>>, vector<16x128xf32>
    tpu.vector_store %arg18[%c48_119, %c0_120], %156 {strides = array<i32>} : memref<216x512xf32, #tpu.memory_space<vmem>>, vector<16x128xf32>,
    %c4_121 = arith.constant 4 : index
    %c0_122 = arith.constant 0 : index
    %c0_123 = arith.constant 0 : index
    %158 = vector.load %arg4[%c4_121, %c0_122, %c0_123] : memref<9x1x128xf32, #tpu.memory_space<vmem>>, vector<1x1x128xf32>
    %159 = vector.shape_cast %158 : vector<1x1x128xf32> to vector<1x128xf32>
    %160 = vector.broadcast %159 : vector<1x128xf32> to vector<16x128xf32>
    %161 = arith.mulf %133, %160 : vector<16x128xf32>
    %c64_124 = arith.constant 64 : index
    %c0_125 = arith.constant 0 : index
    %162 = vector.load %arg18[%c64_124, %c0_125] : memref<216x512xf32, #tpu.memory_space<vmem>>, vector<16x128xf32>
    tpu.vector_store %arg18[%c64_124, %c0_125], %161 {strides = array<i32>} : memref<216x512xf32, #tpu.memory_space<vmem>>, vector<16x128xf32>,
    %c5_126 = arith.constant 5 : index
    %c0_127 = arith.constant 0 : index
    %c0_128 = arith.constant 0 : index
    %163 = vector.load %arg4[%c5_126, %c0_127, %c0_128] : memref<9x1x128xf32, #tpu.memory_space<vmem>>, vector<1x1x128xf32>
    %164 = vector.shape_cast %163 : vector<1x1x128xf32> to vector<1x128xf32>
    %c127_i32_129 = arith.constant 127 : i32
    %165 = tpu.dynamic_rotate %133 by %c127_i32_129 dim 1 : vector<16x128xf32>, i32 -> vector<16x128xf32>
    %166 = vector.broadcast %164 : vector<1x128xf32> to vector<16x128xf32>
    %167 = arith.mulf %165, %166 : vector<16x128xf32>
    %c80 = arith.constant 80 : index
    %c0_130 = arith.constant 0 : index
    %168 = vector.load %arg18[%c80, %c0_130] : memref<216x512xf32, #tpu.memory_space<vmem>>, vector<16x128xf32>
    tpu.vector_store %arg18[%c80, %c0_130], %167 {strides = array<i32>} : memref<216x512xf32, #tpu.memory_space<vmem>>, vector<16x128xf32>,
    %c6_131 = arith.constant 6 : index
    %c0_132 = arith.constant 0 : index
    %c0_133 = arith.constant 0 : index
    %169 = vector.load %arg4[%c6_131, %c0_132, %c0_133] : memref<9x1x128xf32, #tpu.memory_space<vmem>>, vector<1x1x128xf32>
    %170 = vector.shape_cast %169 : vector<1x1x128xf32> to vector<1x128xf32>
    %c121_i32_134 = arith.constant 121 : i32
    %171 = tpu.dynamic_rotate %133 by %c121_i32_134 dim 1 : vector<16x128xf32>, i32 -> vector<16x128xf32>
    %172 = vector.broadcast %170 : vector<1x128xf32> to vector<16x128xf32>
    %173 = arith.mulf %171, %172 : vector<16x128xf32>
    %c96 = arith.constant 96 : index
    %c0_135 = arith.constant 0 : index
    %174 = vector.load %arg18[%c96, %c0_135] : memref<216x512xf32, #tpu.memory_space<vmem>>, vector<16x128xf32>
    tpu.vector_store %arg18[%c96, %c0_135], %173 {strides = array<i32>} : memref<216x512xf32, #tpu.memory_space<vmem>>, vector<16x128xf32>,
    %c7_136 = arith.constant 7 : index
    %c0_137 = arith.constant 0 : index
    %c0_138 = arith.constant 0 : index
    %175 = vector.load %arg4[%c7_136, %c0_137, %c0_138] : memref<9x1x128xf32, #tpu.memory_space<vmem>>, vector<1x1x128xf32>
    %176 = vector.shape_cast %175 : vector<1x1x128xf32> to vector<1x128xf32>
    %c120_i32_139 = arith.constant 120 : i32
    %177 = tpu.dynamic_rotate %133 by %c120_i32_139 dim 1 : vector<16x128xf32>, i32 -> vector<16x128xf32>
    %178 = vector.broadcast %176 : vector<1x128xf32> to vector<16x128xf32>
    %179 = arith.mulf %177, %178 : vector<16x128xf32>
    %c112 = arith.constant 112 : index
    %c0_140 = arith.constant 0 : index
    %180 = vector.load %arg18[%c112, %c0_140] : memref<216x512xf32, #tpu.memory_space<vmem>>, vector<16x128xf32>
    tpu.vector_store %arg18[%c112, %c0_140], %179 {strides = array<i32>} : memref<216x512xf32, #tpu.memory_space<vmem>>, vector<16x128xf32>,
    %c8_141 = arith.constant 8 : index
    %c0_142 = arith.constant 0 : index
    %c0_143 = arith.constant 0 : index
    %181 = vector.load %arg4[%c8_141, %c0_142, %c0_143] : memref<9x1x128xf32, #tpu.memory_space<vmem>>, vector<1x1x128xf32>
    %182 = vector.shape_cast %181 : vector<1x1x128xf32> to vector<1x128xf32>
    %c119_i32_144 = arith.constant 119 : i32
    %183 = tpu.dynamic_rotate %133 by %c119_i32_144 dim 1 : vector<16x128xf32>, i32 -> vector<16x128xf32>
    %184 = vector.broadcast %182 : vector<1x128xf32> to vector<16x128xf32>
    %185 = arith.mulf %183, %184 : vector<16x128xf32>
    %c128 = arith.constant 128 : index
    %c0_145 = arith.constant 0 : index
    %186 = vector.load %arg18[%c128, %c0_145] : memref<216x512xf32, #tpu.memory_space<vmem>>, vector<16x128xf32>
    tpu.vector_store %arg18[%c128, %c0_145], %185 {strides = array<i32>} : memref<216x512xf32, #tpu.memory_space<vmem>>, vector<16x128xf32>,
    %c0_146 = arith.constant 0 : index
    %c0_147 = arith.constant 0 : index
    %187 = vector.load %arg18[%c0_146, %c0_147] : memref<216x512xf32, #tpu.memory_space<vmem>>, vector<144x128xf32>
    %188 = arith.truncf %187 : vector<144x128xf32> to vector<144x128xbf16>
    %c0_148 = arith.constant 0 : index
    %c0_149 = arith.constant 0 : index
    %189 = vector.load %arg11[%c0_148, %c0_149] : memref<16x144xbf16, #tpu.memory_space<vmem>>, vector<16x144xbf16>
    %cst_150 = arith.constant dense<0.000000e+00> : vector<16x128xf32>
    %190 = tpu.matmul %189, %188, %cst_150 {dimension_numbers = #tpu.dot_dimension_numbers<[1], [0], [0], [1], [0, 0, 1, 1], [], []>} : vector<16x144xbf16>, vector<144x128xbf16>, vector<16x128xf32> -> vector<16x128xf32>
    %c0_151 = arith.constant 0 : index
    %c0_152 = arith.constant 0 : index
    %191 = vector.load %arg12[%c0_151, %c0_152] : memref<16x1xf32, #tpu.memory_space<vmem>>, vector<16x1xf32>
    %192 = vector.broadcast %191 : vector<16x1xf32> to vector<16x128xf32>
    %193 = arith.addf %190, %192 : vector<16x128xf32>
    %cst_153 = arith.constant 2.000000e-01 : f32
    %194 = vector.broadcast %cst_153 : f32 to vector<16x128xf32>
    %195 = arith.mulf %194, %193 : vector<16x128xf32>
    %196 = arith.maximumf %193, %195 : vector<16x128xf32>
    %197 = arith.truncf %196 : vector<16x128xf32> to vector<16x128xbf16>
    %c0_154 = arith.constant 0 : index
    %c0_155 = arith.constant 0 : index
    %198 = vector.load %arg6[%c0_154, %c0_155] : memref<128x512xbf16, #tpu.memory_space<vmem>>, vector<128x512xbf16>
    %cst_156 = arith.constant dense<0.000000e+00> : vector<16x512xf32>
    %199 = tpu.matmul %197, %198, %cst_156 {dimension_numbers = #tpu.dot_dimension_numbers<[1], [0], [0], [1], [0, 0, 1, 1], [], []>} : vector<16x128xbf16>, vector<128x512xbf16>, vector<16x512xf32> -> vector<16x512xf32>
    %c0_157 = arith.constant 0 : index
    %c0_158 = arith.constant 0 : index
    %c0_159 = arith.constant 0 : index
    %200 = vector.load %arg3[%c0_157, %c0_158, %c0_159] : memref<9x1x512xf32, #tpu.memory_space<vmem>>, vector<1x1x512xf32>
    %201 = vector.shape_cast %200 : vector<1x1x512xf32> to vector<1x512xf32>
    %c17_i32_160 = arith.constant 17 : i32
    %202 = tpu.dynamic_rotate %199 by %c17_i32_160 dim 1 : vector<16x512xf32>, i32 -> vector<16x512xf32>
    %203 = vector.broadcast %201 : vector<1x512xf32> to vector<16x512xf32>
    %204 = arith.mulf %202, %203 : vector<16x512xf32>
    %c0_161 = arith.constant 0 : index
    %c0_162 = arith.constant 0 : index
    %205 = vector.load %arg18[%c0_161, %c0_162] : memref<216x512xf32, #tpu.memory_space<vmem>>, vector<16x512xf32>
    tpu.vector_store %arg18[%c0_161, %c0_162], %204 {strides = array<i32>} : memref<216x512xf32, #tpu.memory_space<vmem>>, vector<16x512xf32>,
    %c17_i32_163 = arith.constant 17 : i32
    %206 = tpu.dynamic_rotate %63 by %c17_i32_163 dim 1 : vector<8x512xf32>, i32 -> vector<8x512xf32>
    %207 = vector.broadcast %201 : vector<1x512xf32> to vector<8x512xf32>
    %208 = arith.mulf %206, %207 : vector<8x512xf32>
    %c16_164 = arith.constant 16 : index
    %c0_165 = arith.constant 0 : index
    %209 = vector.load %arg18[%c16_164, %c0_165] : memref<216x512xf32, #tpu.memory_space<vmem>>, vector<8x512xf32>
    tpu.vector_store %arg18[%c16_164, %c0_165], %208 {strides = array<i32>} : memref<216x512xf32, #tpu.memory_space<vmem>>, vector<8x512xf32>,
    %c1_166 = arith.constant 1 : index
    %c0_167 = arith.constant 0 : index
    %c0_168 = arith.constant 0 : index
    %210 = vector.load %arg3[%c1_166, %c0_167, %c0_168] : memref<9x1x512xf32, #tpu.memory_space<vmem>>, vector<1x1x512xf32>
    %211 = vector.shape_cast %210 : vector<1x1x512xf32> to vector<1x512xf32>
    %c16_i32_169 = arith.constant 16 : i32
    %212 = tpu.dynamic_rotate %199 by %c16_i32_169 dim 1 : vector<16x512xf32>, i32 -> vector<16x512xf32>
    %213 = vector.broadcast %211 : vector<1x512xf32> to vector<16x512xf32>
    %214 = arith.mulf %212, %213 : vector<16x512xf32>
    %c24_170 = arith.constant 24 : index
    %c0_171 = arith.constant 0 : index
    %215 = vector.load %arg18[%c24_170, %c0_171] : memref<216x512xf32, #tpu.memory_space<vmem>>, vector<16x512xf32>
    tpu.vector_store %arg18[%c24_170, %c0_171], %214 {strides = array<i32>} : memref<216x512xf32, #tpu.memory_space<vmem>>, vector<16x512xf32>,
    %c16_i32_172 = arith.constant 16 : i32
    %216 = tpu.dynamic_rotate %63 by %c16_i32_172 dim 1 : vector<8x512xf32>, i32 -> vector<8x512xf32>
    %217 = vector.broadcast %211 : vector<1x512xf32> to vector<8x512xf32>
    %218 = arith.mulf %216, %217 : vector<8x512xf32>
    %c40_173 = arith.constant 40 : index
    %c0_174 = arith.constant 0 : index
    %219 = vector.load %arg18[%c40_173, %c0_174] : memref<216x512xf32, #tpu.memory_space<vmem>>, vector<8x512xf32>
    tpu.vector_store %arg18[%c40_173, %c0_174], %218 {strides = array<i32>} : memref<216x512xf32, #tpu.memory_space<vmem>>, vector<8x512xf32>,
    %c2_175 = arith.constant 2 : index
    %c0_176 = arith.constant 0 : index
    %c0_177 = arith.constant 0 : index
    %220 = vector.load %arg3[%c2_175, %c0_176, %c0_177] : memref<9x1x512xf32, #tpu.memory_space<vmem>>, vector<1x1x512xf32>
    %221 = vector.shape_cast %220 : vector<1x1x512xf32> to vector<1x512xf32>
    %c15_i32_178 = arith.constant 15 : i32
    %222 = tpu.dynamic_rotate %199 by %c15_i32_178 dim 1 : vector<16x512xf32>, i32 -> vector<16x512xf32>
    %223 = vector.broadcast %221 : vector<1x512xf32> to vector<16x512xf32>
    %224 = arith.mulf %222, %223 : vector<16x512xf32>
    %c48_179 = arith.constant 48 : index
    %c0_180 = arith.constant 0 : index
    %225 = vector.load %arg18[%c48_179, %c0_180] : memref<216x512xf32, #tpu.memory_space<vmem>>, vector<16x512xf32>
    tpu.vector_store %arg18[%c48_179, %c0_180], %224 {strides = array<i32>} : memref<216x512xf32, #tpu.memory_space<vmem>>, vector<16x512xf32>,
    %c15_i32_181 = arith.constant 15 : i32
    %226 = tpu.dynamic_rotate %63 by %c15_i32_181 dim 1 : vector<8x512xf32>, i32 -> vector<8x512xf32>
    %227 = vector.broadcast %221 : vector<1x512xf32> to vector<8x512xf32>
    %228 = arith.mulf %226, %227 : vector<8x512xf32>
    %c64_182 = arith.constant 64 : index
    %c0_183 = arith.constant 0 : index
    %229 = vector.load %arg18[%c64_182, %c0_183] : memref<216x512xf32, #tpu.memory_space<vmem>>, vector<8x512xf32>
    tpu.vector_store %arg18[%c64_182, %c0_183], %228 {strides = array<i32>} : memref<216x512xf32, #tpu.memory_space<vmem>>, vector<8x512xf32>,
    %c3_184 = arith.constant 3 : index
    %c0_185 = arith.constant 0 : index
    %c0_186 = arith.constant 0 : index
    %230 = vector.load %arg3[%c3_184, %c0_185, %c0_186] : memref<9x1x512xf32, #tpu.memory_space<vmem>>, vector<1x1x512xf32>
    %231 = vector.shape_cast %230 : vector<1x1x512xf32> to vector<1x512xf32>
    %c1_i32_187 = arith.constant 1 : i32
    %232 = tpu.dynamic_rotate %199 by %c1_i32_187 dim 1 : vector<16x512xf32>, i32 -> vector<16x512xf32>
    %233 = vector.broadcast %231 : vector<1x512xf32> to vector<16x512xf32>
    %234 = arith.mulf %232, %233 : vector<16x512xf32>
    %c72 = arith.constant 72 : index
    %c0_188 = arith.constant 0 : index
    %235 = vector.load %arg18[%c72, %c0_188] : memref<216x512xf32, #tpu.memory_space<vmem>>, vector<16x512xf32>
    tpu.vector_store %arg18[%c72, %c0_188], %234 {strides = array<i32>} : memref<216x512xf32, #tpu.memory_space<vmem>>, vector<16x512xf32>,
    %c1_i32_189 = arith.constant 1 : i32
    %236 = tpu.dynamic_rotate %63 by %c1_i32_189 dim 1 : vector<8x512xf32>, i32 -> vector<8x512xf32>
    %237 = vector.broadcast %231 : vector<1x512xf32> to vector<8x512xf32>
    %238 = arith.mulf %236, %237 : vector<8x512xf32>
    %c88 = arith.constant 88 : index
    %c0_190 = arith.constant 0 : index
    %239 = vector.load %arg18[%c88, %c0_190] : memref<216x512xf32, #tpu.memory_space<vmem>>, vector<8x512xf32>
    tpu.vector_store %arg18[%c88, %c0_190], %238 {strides = array<i32>} : memref<216x512xf32, #tpu.memory_space<vmem>>, vector<8x512xf32>,
    %c4_191 = arith.constant 4 : index
    %c0_192 = arith.constant 0 : index
    %c0_193 = arith.constant 0 : index
    %240 = vector.load %arg3[%c4_191, %c0_192, %c0_193] : memref<9x1x512xf32, #tpu.memory_space<vmem>>, vector<1x1x512xf32>
    %241 = vector.shape_cast %240 : vector<1x1x512xf32> to vector<1x512xf32>
    %242 = vector.broadcast %241 : vector<1x512xf32> to vector<16x512xf32>
    %243 = arith.mulf %199, %242 : vector<16x512xf32>
    %c96_194 = arith.constant 96 : index
    %c0_195 = arith.constant 0 : index
    %244 = vector.load %arg18[%c96_194, %c0_195] : memref<216x512xf32, #tpu.memory_space<vmem>>, vector<16x512xf32>
    tpu.vector_store %arg18[%c96_194, %c0_195], %243 {strides = array<i32>} : memref<216x512xf32, #tpu.memory_space<vmem>>, vector<16x512xf32>,
    %245 = vector.broadcast %241 : vector<1x512xf32> to vector<8x512xf32>
    %246 = arith.mulf %63, %245 : vector<8x512xf32>
    %c112_196 = arith.constant 112 : index
    %c0_197 = arith.constant 0 : index
    %247 = vector.load %arg18[%c112_196, %c0_197] : memref<216x512xf32, #tpu.memory_space<vmem>>, vector<8x512xf32>
    tpu.vector_store %arg18[%c112_196, %c0_197], %246 {strides = array<i32>} : memref<216x512xf32, #tpu.memory_space<vmem>>, vector<8x512xf32>,
    %c5_198 = arith.constant 5 : index
    %c0_199 = arith.constant 0 : index
    %c0_200 = arith.constant 0 : index
    %248 = vector.load %arg3[%c5_198, %c0_199, %c0_200] : memref<9x1x512xf32, #tpu.memory_space<vmem>>, vector<1x1x512xf32>
    %249 = vector.shape_cast %248 : vector<1x1x512xf32> to vector<1x512xf32>
    %c511_i32_201 = arith.constant 511 : i32
    %250 = tpu.dynamic_rotate %199 by %c511_i32_201 dim 1 : vector<16x512xf32>, i32 -> vector<16x512xf32>
    %251 = vector.broadcast %249 : vector<1x512xf32> to vector<16x512xf32>
    %252 = arith.mulf %250, %251 : vector<16x512xf32>
    %c120 = arith.constant 120 : index
    %c0_202 = arith.constant 0 : index
    %253 = vector.load %arg18[%c120, %c0_202] : memref<216x512xf32, #tpu.memory_space<vmem>>, vector<16x512xf32>
    tpu.vector_store %arg18[%c120, %c0_202], %252 {strides = array<i32>} : memref<216x512xf32, #tpu.memory_space<vmem>>, vector<16x512xf32>,
    %c511_i32_203 = arith.constant 511 : i32
    %254 = tpu.dynamic_rotate %63 by %c511_i32_203 dim 1 : vector<8x512xf32>, i32 -> vector<8x512xf32>
    %255 = vector.broadcast %249 : vector<1x512xf32> to vector<8x512xf32>
    %256 = arith.mulf %254, %255 : vector<8x512xf32>
    %c136 = arith.constant 136 : index
    %c0_204 = arith.constant 0 : index
    %257 = vector.load %arg18[%c136, %c0_204] : memref<216x512xf32, #tpu.memory_space<vmem>>, vector<8x512xf32>
    tpu.vector_store %arg18[%c136, %c0_204], %256 {strides = array<i32>} : memref<216x512xf32, #tpu.memory_space<vmem>>, vector<8x512xf32>,
    %c6_205 = arith.constant 6 : index
    %c0_206 = arith.constant 0 : index
    %c0_207 = arith.constant 0 : index
    %258 = vector.load %arg3[%c6_205, %c0_206, %c0_207] : memref<9x1x512xf32, #tpu.memory_space<vmem>>, vector<1x1x512xf32>
    %259 = vector.shape_cast %258 : vector<1x1x512xf32> to vector<1x512xf32>
    %c497_i32_208 = arith.constant 497 : i32
    %260 = tpu.dynamic_rotate %199 by %c497_i32_208 dim 1 : vector<16x512xf32>, i32 -> vector<16x512xf32>
    %261 = vector.broadcast %259 : vector<1x512xf32> to vector<16x512xf32>
    %262 = arith.mulf %260, %261 : vector<16x512xf32>
    %c144 = arith.constant 144 : index
    %c0_209 = arith.constant 0 : index
    %263 = vector.load %arg18[%c144, %c0_209] : memref<216x512xf32, #tpu.memory_space<vmem>>, vector<16x512xf32>
    tpu.vector_store %arg18[%c144, %c0_209], %262 {strides = array<i32>} : memref<216x512xf32, #tpu.memory_space<vmem>>, vector<16x512xf32>,
    %c497_i32_210 = arith.constant 497 : i32
    %264 = tpu.dynamic_rotate %63 by %c497_i32_210 dim 1 : vector<8x512xf32>, i32 -> vector<8x512xf32>
    %265 = vector.broadcast %259 : vector<1x512xf32> to vector<8x512xf32>
    %266 = arith.mulf %264, %265 : vector<8x512xf32>
    %c160 = arith.constant 160 : index
    %c0_211 = arith.constant 0 : index
    %267 = vector.load %arg18[%c160, %c0_211] : memref<216x512xf32, #tpu.memory_space<vmem>>, vector<8x512xf32>
    tpu.vector_store %arg18[%c160, %c0_211], %266 {strides = array<i32>} : memref<216x512xf32, #tpu.memory_space<vmem>>, vector<8x512xf32>,
    %c7_212 = arith.constant 7 : index
    %c0_213 = arith.constant 0 : index
    %c0_214 = arith.constant 0 : index
    %268 = vector.load %arg3[%c7_212, %c0_213, %c0_214] : memref<9x1x512xf32, #tpu.memory_space<vmem>>, vector<1x1x512xf32>
    %269 = vector.shape_cast %268 : vector<1x1x512xf32> to vector<1x512xf32>
    %c496_i32_215 = arith.constant 496 : i32
    %270 = tpu.dynamic_rotate %199 by %c496_i32_215 dim 1 : vector<16x512xf32>, i32 -> vector<16x512xf32>
    %271 = vector.broadcast %269 : vector<1x512xf32> to vector<16x512xf32>
    %272 = arith.mulf %270, %271 : vector<16x512xf32>
    %c168 = arith.constant 168 : index
    %c0_216 = arith.constant 0 : index
    %273 = vector.load %arg18[%c168, %c0_216] : memref<216x512xf32, #tpu.memory_space<vmem>>, vector<16x512xf32>
    tpu.vector_store %arg18[%c168, %c0_216], %272 {strides = array<i32>} : memref<216x512xf32, #tpu.memory_space<vmem>>, vector<16x512xf32>,
    %c496_i32_217 = arith.constant 496 : i32
    %274 = tpu.dynamic_rotate %63 by %c496_i32_217 dim 1 : vector<8x512xf32>, i32 -> vector<8x512xf32>
    %275 = vector.broadcast %269 : vector<1x512xf32> to vector<8x512xf32>
    %276 = arith.mulf %274, %275 : vector<8x512xf32>
    %c184 = arith.constant 184 : index
    %c0_218 = arith.constant 0 : index
    %277 = vector.load %arg18[%c184, %c0_218] : memref<216x512xf32, #tpu.memory_space<vmem>>, vector<8x512xf32>
    tpu.vector_store %arg18[%c184, %c0_218], %276 {strides = array<i32>} : memref<216x512xf32, #tpu.memory_space<vmem>>, vector<8x512xf32>,
    %c8_219 = arith.constant 8 : index
    %c0_220 = arith.constant 0 : index
    %c0_221 = arith.constant 0 : index
    %278 = vector.load %arg3[%c8_219, %c0_220, %c0_221] : memref<9x1x512xf32, #tpu.memory_space<vmem>>, vector<1x1x512xf32>
    %279 = vector.shape_cast %278 : vector<1x1x512xf32> to vector<1x512xf32>
    %c495_i32_222 = arith.constant 495 : i32
    %280 = tpu.dynamic_rotate %199 by %c495_i32_222 dim 1 : vector<16x512xf32>, i32 -> vector<16x512xf32>
    %281 = vector.broadcast %279 : vector<1x512xf32> to vector<16x512xf32>
    %282 = arith.mulf %280, %281 : vector<16x512xf32>
    %c192 = arith.constant 192 : index
    %c0_223 = arith.constant 0 : index
    %283 = vector.load %arg18[%c192, %c0_223] : memref<216x512xf32, #tpu.memory_space<vmem>>, vector<16x512xf32>
    tpu.vector_store %arg18[%c192, %c0_223], %282 {strides = array<i32>} : memref<216x512xf32, #tpu.memory_space<vmem>>, vector<16x512xf32>,
    %c495_i32_224 = arith.constant 495 : i32
    %284 = tpu.dynamic_rotate %63 by %c495_i32_224 dim 1 : vector<8x512xf32>, i32 -> vector<8x512xf32>
    %285 = vector.broadcast %279 : vector<1x512xf32> to vector<8x512xf32>
    %286 = arith.mulf %284, %285 : vector<8x512xf32>
    %c208 = arith.constant 208 : index
    %c0_225 = arith.constant 0 : index
    %287 = vector.load %arg18[%c208, %c0_225] : memref<216x512xf32, #tpu.memory_space<vmem>>, vector<8x512xf32>
    tpu.vector_store %arg18[%c208, %c0_225], %286 {strides = array<i32>} : memref<216x512xf32, #tpu.memory_space<vmem>>, vector<8x512xf32>,
    %c0_226 = arith.constant 0 : index
    %c0_227 = arith.constant 0 : index
    %288 = vector.load %arg18[%c0_226, %c0_227] : memref<216x512xf32, #tpu.memory_space<vmem>>, vector<216x512xf32>
    %289 = arith.truncf %288 : vector<216x512xf32> to vector<216x512xbf16>
    %c0_228 = arith.constant 0 : index
    %c0_229 = arith.constant 0 : index
    %290 = vector.load %arg13[%c0_228, %c0_229] : memref<8x216xbf16, #tpu.memory_space<vmem>>, vector<8x216xbf16>
    %cst_230 = arith.constant dense<0.000000e+00> : vector<8x512xf32>
    %291 = tpu.matmul %290, %289, %cst_230 {dimension_numbers = #tpu.dot_dimension_numbers<[1], [0], [0], [1], [0, 0, 1, 1], [], []>} : vector<8x216xbf16>, vector<216x512xbf16>, vector<8x512xf32> -> vector<8x512xf32>
    %c0_231 = arith.constant 0 : index
    %c0_232 = arith.constant 0 : index
    %292 = vector.load %arg14[%c0_231, %c0_232] : memref<8x1xf32, #tpu.memory_space<vmem>>, vector<8x1xf32>
    %293 = vector.broadcast %292 : vector<8x1xf32> to vector<8x512xf32>
    %294 = arith.addf %291, %293 : vector<8x512xf32>
    %cst_233 = arith.constant 2.000000e-01 : f32
    %295 = vector.broadcast %cst_233 : f32 to vector<8x512xf32>
    %296 = arith.mulf %295, %294 : vector<8x512xf32>
    %297 = arith.maximumf %294, %296 : vector<8x512xf32>
    %c0_234 = arith.constant 0 : index
    %c0_235 = arith.constant 0 : index
    %c0_236 = arith.constant 0 : index
    %298 = vector.load %arg3[%c0_234, %c0_235, %c0_236] : memref<9x1x512xf32, #tpu.memory_space<vmem>>, vector<1x1x512xf32>
    %299 = vector.shape_cast %298 : vector<1x1x512xf32> to vector<1x512xf32>
    %c17_i32_237 = arith.constant 17 : i32
    %300 = tpu.dynamic_rotate %297 by %c17_i32_237 dim 1 : vector<8x512xf32>, i32 -> vector<8x512xf32>
    %301 = vector.broadcast %299 : vector<1x512xf32> to vector<8x512xf32>
    %302 = arith.mulf %300, %301 : vector<8x512xf32>
    %c0_238 = arith.constant 0 : index
    %c0_239 = arith.constant 0 : index
    %303 = vector.load %arg18[%c0_238, %c0_239] : memref<216x512xf32, #tpu.memory_space<vmem>>, vector<8x512xf32>
    tpu.vector_store %arg18[%c0_238, %c0_239], %302 {strides = array<i32>} : memref<216x512xf32, #tpu.memory_space<vmem>>, vector<8x512xf32>,
    %c1_240 = arith.constant 1 : index
    %c0_241 = arith.constant 0 : index
    %c0_242 = arith.constant 0 : index
    %304 = vector.load %arg3[%c1_240, %c0_241, %c0_242] : memref<9x1x512xf32, #tpu.memory_space<vmem>>, vector<1x1x512xf32>
    %305 = vector.shape_cast %304 : vector<1x1x512xf32> to vector<1x512xf32>
    %c16_i32_243 = arith.constant 16 : i32
    %306 = tpu.dynamic_rotate %297 by %c16_i32_243 dim 1 : vector<8x512xf32>, i32 -> vector<8x512xf32>
    %307 = vector.broadcast %305 : vector<1x512xf32> to vector<8x512xf32>
    %308 = arith.mulf %306, %307 : vector<8x512xf32>
    %c8_244 = arith.constant 8 : index
    %c0_245 = arith.constant 0 : index
    %309 = vector.load %arg18[%c8_244, %c0_245] : memref<216x512xf32, #tpu.memory_space<vmem>>, vector<8x512xf32>
    tpu.vector_store %arg18[%c8_244, %c0_245], %308 {strides = array<i32>} : memref<216x512xf32, #tpu.memory_space<vmem>>, vector<8x512xf32>,
    %c2_246 = arith.constant 2 : index
    %c0_247 = arith.constant 0 : index
    %c0_248 = arith.constant 0 : index
    %310 = vector.load %arg3[%c2_246, %c0_247, %c0_248] : memref<9x1x512xf32, #tpu.memory_space<vmem>>, vector<1x1x512xf32>
    %311 = vector.shape_cast %310 : vector<1x1x512xf32> to vector<1x512xf32>
    %c15_i32_249 = arith.constant 15 : i32
    %312 = tpu.dynamic_rotate %297 by %c15_i32_249 dim 1 : vector<8x512xf32>, i32 -> vector<8x512xf32>
    %313 = vector.broadcast %311 : vector<1x512xf32> to vector<8x512xf32>
    %314 = arith.mulf %312, %313 : vector<8x512xf32>
    %c16_250 = arith.constant 16 : index
    %c0_251 = arith.constant 0 : index
    %315 = vector.load %arg18[%c16_250, %c0_251] : memref<216x512xf32, #tpu.memory_space<vmem>>, vector<8x512xf32>
    tpu.vector_store %arg18[%c16_250, %c0_251], %314 {strides = array<i32>} : memref<216x512xf32, #tpu.memory_space<vmem>>, vector<8x512xf32>,
    %c3_252 = arith.constant 3 : index
    %c0_253 = arith.constant 0 : index
    %c0_254 = arith.constant 0 : index
    %316 = vector.load %arg3[%c3_252, %c0_253, %c0_254] : memref<9x1x512xf32, #tpu.memory_space<vmem>>, vector<1x1x512xf32>
    %317 = vector.shape_cast %316 : vector<1x1x512xf32> to vector<1x512xf32>
    %c1_i32_255 = arith.constant 1 : i32
    %318 = tpu.dynamic_rotate %297 by %c1_i32_255 dim 1 : vector<8x512xf32>, i32 -> vector<8x512xf32>
    %319 = vector.broadcast %317 : vector<1x512xf32> to vector<8x512xf32>
    %320 = arith.mulf %318, %319 : vector<8x512xf32>
    %c24_256 = arith.constant 24 : index
    %c0_257 = arith.constant 0 : index
    %321 = vector.load %arg18[%c24_256, %c0_257] : memref<216x512xf32, #tpu.memory_space<vmem>>, vector<8x512xf32>
    tpu.vector_store %arg18[%c24_256, %c0_257], %320 {strides = array<i32>} : memref<216x512xf32, #tpu.memory_space<vmem>>, vector<8x512xf32>,
    %c4_258 = arith.constant 4 : index
    %c0_259 = arith.constant 0 : index
    %c0_260 = arith.constant 0 : index
    %322 = vector.load %arg3[%c4_258, %c0_259, %c0_260] : memref<9x1x512xf32, #tpu.memory_space<vmem>>, vector<1x1x512xf32>
    %323 = vector.shape_cast %322 : vector<1x1x512xf32> to vector<1x512xf32>
    %324 = vector.broadcast %323 : vector<1x512xf32> to vector<8x512xf32>
    %325 = arith.mulf %297, %324 : vector<8x512xf32>
    %c32_261 = arith.constant 32 : index
    %c0_262 = arith.constant 0 : index
    %326 = vector.load %arg18[%c32_261, %c0_262] : memref<216x512xf32, #tpu.memory_space<vmem>>, vector<8x512xf32>
    tpu.vector_store %arg18[%c32_261, %c0_262], %325 {strides = array<i32>} : memref<216x512xf32, #tpu.memory_space<vmem>>, vector<8x512xf32>,
    %c5_263 = arith.constant 5 : index
    %c0_264 = arith.constant 0 : index
    %c0_265 = arith.constant 0 : index
    %327 = vector.load %arg3[%c5_263, %c0_264, %c0_265] : memref<9x1x512xf32, #tpu.memory_space<vmem>>, vector<1x1x512xf32>
    %328 = vector.shape_cast %327 : vector<1x1x512xf32> to vector<1x512xf32>
    %c511_i32_266 = arith.constant 511 : i32
    %329 = tpu.dynamic_rotate %297 by %c511_i32_266 dim 1 : vector<8x512xf32>, i32 -> vector<8x512xf32>
    %330 = vector.broadcast %328 : vector<1x512xf32> to vector<8x512xf32>
    %331 = arith.mulf %329, %330 : vector<8x512xf32>
    %c40_267 = arith.constant 40 : index
    %c0_268 = arith.constant 0 : index
    %332 = vector.load %arg18[%c40_267, %c0_268] : memref<216x512xf32, #tpu.memory_space<vmem>>, vector<8x512xf32>
    tpu.vector_store %arg18[%c40_267, %c0_268], %331 {strides = array<i32>} : memref<216x512xf32, #tpu.memory_space<vmem>>, vector<8x512xf32>,
    %c6_269 = arith.constant 6 : index
    %c0_270 = arith.constant 0 : index
    %c0_271 = arith.constant 0 : index
    %333 = vector.load %arg3[%c6_269, %c0_270, %c0_271] : memref<9x1x512xf32, #tpu.memory_space<vmem>>, vector<1x1x512xf32>
    %334 = vector.shape_cast %333 : vector<1x1x512xf32> to vector<1x512xf32>
    %c497_i32_272 = arith.constant 497 : i32
    %335 = tpu.dynamic_rotate %297 by %c497_i32_272 dim 1 : vector<8x512xf32>, i32 -> vector<8x512xf32>
    %336 = vector.broadcast %334 : vector<1x512xf32> to vector<8x512xf32>
    %337 = arith.mulf %335, %336 : vector<8x512xf32>
    %c48_273 = arith.constant 48 : index
    %c0_274 = arith.constant 0 : index
    %338 = vector.load %arg18[%c48_273, %c0_274] : memref<216x512xf32, #tpu.memory_space<vmem>>, vector<8x512xf32>
    tpu.vector_store %arg18[%c48_273, %c0_274], %337 {strides = array<i32>} : memref<216x512xf32, #tpu.memory_space<vmem>>, vector<8x512xf32>,
    %c7_275 = arith.constant 7 : index
    %c0_276 = arith.constant 0 : index
    %c0_277 = arith.constant 0 : index
    %339 = vector.load %arg3[%c7_275, %c0_276, %c0_277] : memref<9x1x512xf32, #tpu.memory_space<vmem>>, vector<1x1x512xf32>
    %340 = vector.shape_cast %339 : vector<1x1x512xf32> to vector<1x512xf32>
    %c496_i32_278 = arith.constant 496 : i32
    %341 = tpu.dynamic_rotate %297 by %c496_i32_278 dim 1 : vector<8x512xf32>, i32 -> vector<8x512xf32>
    %342 = vector.broadcast %340 : vector<1x512xf32> to vector<8x512xf32>
    %343 = arith.mulf %341, %342 : vector<8x512xf32>
    %c56_279 = arith.constant 56 : index
    %c0_280 = arith.constant 0 : index
    %344 = vector.load %arg18[%c56_279, %c0_280] : memref<216x512xf32, #tpu.memory_space<vmem>>, vector<8x512xf32>
    tpu.vector_store %arg18[%c56_279, %c0_280], %343 {strides = array<i32>} : memref<216x512xf32, #tpu.memory_space<vmem>>, vector<8x512xf32>,
    %c8_281 = arith.constant 8 : index
    %c0_282 = arith.constant 0 : index
    %c0_283 = arith.constant 0 : index
    %345 = vector.load %arg3[%c8_281, %c0_282, %c0_283] : memref<9x1x512xf32, #tpu.memory_space<vmem>>, vector<1x1x512xf32>
    %346 = vector.shape_cast %345 : vector<1x1x512xf32> to vector<1x512xf32>
    %c495_i32_284 = arith.constant 495 : i32
    %347 = tpu.dynamic_rotate %297 by %c495_i32_284 dim 1 : vector<8x512xf32>, i32 -> vector<8x512xf32>
    %348 = vector.broadcast %346 : vector<1x512xf32> to vector<8x512xf32>
    %349 = arith.mulf %347, %348 : vector<8x512xf32>
    %c64_285 = arith.constant 64 : index
    %c0_286 = arith.constant 0 : index
    %350 = vector.load %arg18[%c64_285, %c0_286] : memref<216x512xf32, #tpu.memory_space<vmem>>, vector<8x512xf32>
    tpu.vector_store %arg18[%c64_285, %c0_286], %349 {strides = array<i32>} : memref<216x512xf32, #tpu.memory_space<vmem>>, vector<8x512xf32>,
    %c0_287 = arith.constant 0 : index
    %c0_288 = arith.constant 0 : index
    %351 = vector.load %arg18[%c0_287, %c0_288] : memref<216x512xf32, #tpu.memory_space<vmem>>, vector<72x512xf32>
    %352 = arith.truncf %351 : vector<72x512xf32> to vector<72x512xbf16>
    %c0_289 = arith.constant 0 : index
    %c0_290 = arith.constant 0 : index
    %353 = vector.load %arg15[%c0_289, %c0_290] : memref<2x72xbf16, #tpu.memory_space<vmem>>, vector<2x72xbf16>
    %cst_291 = arith.constant dense<0.000000e+00> : vector<2x512xf32>
    %354 = tpu.matmul %353, %352, %cst_291 {dimension_numbers = #tpu.dot_dimension_numbers<[1], [0], [0], [1], [0, 0, 1, 1], [], []>} : vector<2x72xbf16>, vector<72x512xbf16>, vector<2x512xf32> -> vector<2x512xf32>
    %c0_292 = arith.constant 0 : index
    %c0_293 = arith.constant 0 : index
    %355 = vector.load %arg16[%c0_292, %c0_293] : memref<2x1xf32, #tpu.memory_space<vmem>>, vector<2x1xf32>
    %356 = vector.broadcast %355 : vector<2x1xf32> to vector<2x512xf32>
    %357 = arith.addf %354, %356 : vector<2x512xf32>
    %c0_294 = arith.constant 0 : index
    %c0_295 = arith.constant 0 : index
    %358 = vector.load %arg2[%c0_294, %c0_295] : memref<3x512xf32, #tpu.memory_space<vmem>>, vector<1x512xf32>
    %c1_296 = arith.constant 1 : index
    %c0_297 = arith.constant 0 : index
    %359 = vector.load %arg2[%c1_296, %c0_297] : memref<3x512xf32, #tpu.memory_space<vmem>>, vector<1x512xf32>
    %c2_298 = arith.constant 2 : index
    %c0_299 = arith.constant 0 : index
    %360 = vector.load %arg2[%c2_298, %c0_299] : memref<3x512xf32, #tpu.memory_space<vmem>>, vector<1x512xf32>
    %361 = vector.extract_strided_slice %357 {offsets = [0, 0], sizes = [1, 512], strides = [1, 1]} : vector<2x512xf32> to vector<1x512xf32>
    %362 = arith.addf %358, %361 : vector<1x512xf32>
    %363 = vector.extract_strided_slice %357 {offsets = [1, 0], sizes = [1, 512], strides = [1, 1]} : vector<2x512xf32> to vector<1x512xf32>
    %364 = arith.addf %359, %363 : vector<1x512xf32>
    %365 = math.floor %362 : vector<1x512xf32>
    %366 = math.floor %364 : vector<1x512xf32>
    %367 = arith.subf %362, %365 : vector<1x512xf32>
    %368 = arith.subf %364, %366 : vector<1x512xf32>
    %369 = arith.fptosi %365 : vector<1x512xf32> to vector<1x512xi32>
    %370 = arith.fptosi %366 : vector<1x512xf32> to vector<1x512xi32>
    %371 = arith.fptosi %360 : vector<1x512xf32> to vector<1x512xi32>
    %c0_i32 = arith.constant 0 : i32
    %372 = vector.broadcast %c0_i32 : i32 to vector<1x512xi32>
    %373 = arith.cmpi sge, %369, %372 : vector<1x512xi32>
    %c15_i32_300 = arith.constant 15 : i32
    %374 = vector.broadcast %c15_i32_300 : i32 to vector<1x512xi32>
    %375 = arith.cmpi sle, %369, %374 : vector<1x512xi32>
    %376 = arith.andi %373, %375 : vector<1x512xi1>
    %377 = arith.extui %376 : vector<1x512xi1> to vector<1x512xi32>
    %378 = arith.sitofp %377 : vector<1x512xi32> to vector<1x512xf32>
    %c-1_i32 = arith.constant -1 : i32
    %379 = vector.broadcast %c-1_i32 : i32 to vector<1x512xi32>
    %380 = arith.cmpi sge, %369, %379 : vector<1x512xi32>
    %c14_i32 = arith.constant 14 : i32
    %381 = vector.broadcast %c14_i32 : i32 to vector<1x512xi32>
    %382 = arith.cmpi sle, %369, %381 : vector<1x512xi32>
    %383 = arith.andi %380, %382 : vector<1x512xi1>
    %384 = arith.extui %383 : vector<1x512xi1> to vector<1x512xi32>
    %385 = arith.sitofp %384 : vector<1x512xi32> to vector<1x512xf32>
    %c0_i32_301 = arith.constant 0 : i32
    %386 = vector.broadcast %c0_i32_301 : i32 to vector<1x512xi32>
    %387 = arith.cmpi sge, %370, %386 : vector<1x512xi32>
    %c15_i32_302 = arith.constant 15 : i32
    %388 = vector.broadcast %c15_i32_302 : i32 to vector<1x512xi32>
    %389 = arith.cmpi sle, %370, %388 : vector<1x512xi32>
    %390 = arith.andi %387, %389 : vector<1x512xi1>
    %391 = arith.extui %390 : vector<1x512xi1> to vector<1x512xi32>
    %392 = arith.sitofp %391 : vector<1x512xi32> to vector<1x512xf32>
    %c-1_i32_303 = arith.constant -1 : i32
    %393 = vector.broadcast %c-1_i32_303 : i32 to vector<1x512xi32>
    %394 = arith.cmpi sge, %370, %393 : vector<1x512xi32>
    %c14_i32_304 = arith.constant 14 : i32
    %395 = vector.broadcast %c14_i32_304 : i32 to vector<1x512xi32>
    %396 = arith.cmpi sle, %370, %395 : vector<1x512xi32>
    %397 = arith.andi %394, %396 : vector<1x512xi1>
    %398 = arith.extui %397 : vector<1x512xi1> to vector<1x512xi32>
    %399 = arith.sitofp %398 : vector<1x512xi32> to vector<1x512xf32>
    %400 = arith.addi %369, %371 : vector<1x512xi32>
    %401 = tpu.iota {dimensions = array<i32: 0>} : vector<32x512xi32>
    %402 = tpu.iota {dimensions = array<i32: 0>} : vector<16x512xi32>
    %403 = vector.broadcast %400 : vector<1x512xi32> to vector<32x512xi32>
    %404 = arith.cmpi eq, %401, %403 : vector<32x512xi32>
    %405 = arith.extui %404 : vector<32x512xi1> to vector<32x512xi32>
    %406 = arith.sitofp %405 : vector<32x512xi32> to vector<32x512xf32>
    %cst_305 = arith.constant 1.000000e+00 : f32
    %407 = vector.broadcast %cst_305 : f32 to vector<1x512xf32>
    %408 = arith.subf %407, %367 : vector<1x512xf32>
    %409 = arith.mulf %408, %378 : vector<1x512xf32>
    %410 = vector.broadcast %409 : vector<1x512xf32> to vector<32x512xf32>
    %411 = arith.mulf %406, %410 : vector<32x512xf32>
    %c1_i32_306 = arith.constant 1 : i32
    %412 = vector.broadcast %c1_i32_306 : i32 to vector<1x512xi32>
    %413 = arith.addi %400, %412 : vector<1x512xi32>
    %414 = vector.broadcast %413 : vector<1x512xi32> to vector<32x512xi32>
    %415 = arith.cmpi eq, %401, %414 : vector<32x512xi32>
    %416 = arith.extui %415 : vector<32x512xi1> to vector<32x512xi32>
    %417 = arith.sitofp %416 : vector<32x512xi32> to vector<32x512xf32>
    %418 = arith.mulf %367, %385 : vector<1x512xf32>
    %419 = vector.broadcast %418 : vector<1x512xf32> to vector<32x512xf32>
    %420 = arith.mulf %417, %419 : vector<32x512xf32>
    %421 = arith.addf %411, %420 : vector<32x512xf32>
    %422 = vector.broadcast %370 : vector<1x512xi32> to vector<16x512xi32>
    %423 = arith.cmpi eq, %402, %422 : vector<16x512xi32>
    %424 = arith.extui %423 : vector<16x512xi1> to vector<16x512xi32>
    %425 = arith.sitofp %424 : vector<16x512xi32> to vector<16x512xf32>
    %cst_307 = arith.constant 1.000000e+00 : f32
    %426 = vector.broadcast %cst_307 : f32 to vector<1x512xf32>
    %427 = arith.subf %426, %368 : vector<1x512xf32>
    %428 = arith.mulf %427, %392 : vector<1x512xf32>
    %429 = vector.broadcast %428 : vector<1x512xf32> to vector<16x512xf32>
    %430 = arith.mulf %425, %429 : vector<16x512xf32>
    %c1_i32_308 = arith.constant 1 : i32
    %431 = vector.broadcast %c1_i32_308 : i32 to vector<1x512xi32>
    %432 = arith.addi %370, %431 : vector<1x512xi32>
    %433 = vector.broadcast %432 : vector<1x512xi32> to vector<16x512xi32>
    %434 = arith.cmpi eq, %402, %433 : vector<16x512xi32>
    %435 = arith.extui %434 : vector<16x512xi1> to vector<16x512xi32>
    %436 = arith.sitofp %435 : vector<16x512xi32> to vector<16x512xf32>
    %437 = arith.mulf %368, %399 : vector<1x512xf32>
    %438 = vector.broadcast %437 : vector<1x512xf32> to vector<16x512xf32>
    %439 = arith.mulf %436, %438 : vector<16x512xf32>
    %440 = arith.addf %430, %439 : vector<16x512xf32>
    %c0_309 = arith.constant 0 : index
    %c0_310 = arith.constant 0 : index
    %441 = vector.load %arg1[%c0_309, %c0_310] : memref<16x32xf32, #tpu.memory_space<vmem>>, vector<16x32xf32>
    %cst_311 = arith.constant dense<0.000000e+00> : vector<16x512xf32>
    %442 = tpu.matmul %441, %421, %cst_311 {dimension_numbers = #tpu.dot_dimension_numbers<[1], [0], [0], [1], [0, 0, 1, 1], [], []>} : vector<16x32xf32>, vector<32x512xf32>, vector<16x512xf32> -> vector<16x512xf32>
    %443 = arith.mulf %442, %440 : vector<16x512xf32>
    %cst_312 = arith.constant dense<0.000000e+00> : vector<512xf32>
    %444 = vector.multi_reduction <add>, %443, %cst_312 [0] : vector<16x512xf32> to vector<512xf32>
    %445 = vector.shape_cast %444 : vector<512xf32> to vector<1x512xf32>
    %446 = tpu.concatenate %445, %357 in 0 : vector<1x512xf32>, vector<2x512xf32> -> vector<3x512xf32>
    %c0_313 = arith.constant 0 : index
    %c0_314 = arith.constant 0 : index
    %447 = vector.load %arg17[%c0_313, %c0_314] : memref<3x512xf32, #tpu.memory_space<vmem>>, vector<3x512xf32>
    tpu.vector_store %arg17[%c0_313, %c0_314], %446 {strides = array<i32>} : memref<3x512xf32, #tpu.memory_space<vmem>>, vector<3x512xf32>,
    return
  }
}

</mosaic_0001>

<bundles_post_ra>
// kernel: reg_pair_forward.1
= control target key start
LH: loop header
LB: loop body
LE: loop exit
PB: predicated region body
PF: predicated region fallthrough
CT: control target
= control target key end

     0   :  { %s4261_s29 = smov 17   ;;  %s6433_s20 = smov 15   ;;  %v6439_v4 = vmov 0   ;;  %v70_v6 = vlaneseq  ;;  %vm512_vm8 = vcmask 1043456   ;;  %vm508_vm9 = vcmask 588800   ;;  %s6408_s0 = inlined_call_operand.vmem [shape: f32[8,512], index: 0, kind: input, shape index: {}]   ;;  %s6409_s8 = inlined_call_operand.vmem [shape: f32[8,1], index: 8, kind: input, shape index: {}]   ;;  %s6410_s3 = inlined_call_operand.vmem [shape: f32[9,1,512], index: 3, kind: input, shape index: {}]   ;;  %s6411_s7 = inlined_call_operand.vmem [shape: bf16[8,72], index: 7, kind: input, shape index: {}]   ;;  %s6412_s5 = inlined_call_operand.vmem [shape: bf16[512,128], index: 5, kind: input, shape index: {}]   ;;  %s6413_s9 = inlined_call_operand.vmem [shape: bf16[16,72], index: 9, kind: input, shape index: {}]   ;;  %s6414_s10 = inlined_call_operand.vmem [shape: f32[16,1], index: 10, kind: input, shape index: {}]   ;;  %s6415_s4 = inlined_call_operand.vmem [shape: f32[9,1,128], index: 4, kind: input, shape index: {}]   ;;  %s6416_s11 = inlined_call_operand.vmem [shape: bf16[16,144], index: 11, kind: input, shape index: {}]   ;;  %s6417_s12 = inlined_call_operand.vmem [shape: f32[16,1], index: 12, kind: input, shape index: {}]   ;;  %s6418_s6 = inlined_call_operand.vmem [shape: bf16[128,512], index: 6, kind: input, shape index: {}]   ;;  %s6419_s13 = inlined_call_operand.vmem [shape: bf16[8,216], index: 13, kind: input, shape index: {}]   ;;  %s6420_s14 = inlined_call_operand.vmem [shape: f32[8,1], index: 14, kind: input, shape index: {}]   ;;  %s6421_s16 = inlined_call_operand.vmem [shape: f32[2,1], index: 16, kind: input, shape index: {}]   ;;  %s6422_s15 = inlined_call_operand.vmem [shape: bf16[2,72], index: 15, kind: input, shape index: {}]   ;;  %s6423_s2 = inlined_call_operand.vmem [shape: f32[3,512], index: 2, kind: input, shape index: {}]   ;;  %s6424_s1 = inlined_call_operand.vmem [shape: f32[16,32], index: 1, kind: input, shape index: {}]   ;;  %s6425_s17 = inlined_call_operand.vmem [shape: f32[3,512], index: 17, kind: output, shape index: {}]  }
   0x1   :  { %6476 = sst [smem:[#allocation51_spill]] %s6408_s0  ;;  %s4264_s21 = smov 1   ;;  %557 = vmatprep.mubr.bf16.mxu0 %v6439_v4  ;;  %598 = vmatprep.mubr.bf16.mxu1 %v6439_v4  ;;  %v61_v12 = vld [vmem:[%s6410_s3] sm:$0xf]  ;;  %v3860_v13 = vld [vmem:[%s6410_s3 + $0x4] sm:$0xf] }
   0x2   :  { %6477 = sst [smem:[#allocation52_spill]] %s6409_s8  ;;  %s6478_s26 = sld [smem:[#allocation51_spill]]  ;;  %4163 = vset.pattern.permute.xlu0 %v6439_v4  ;;  %4174 = vset.pattern.permute.xlu1 %v6439_v4  ;;  %v4460_v7 = vshrl.u32 %v70_v6, 7  ;;  %v4462_v10 = vand.u32 127, %v70_v6  ;;  %v3861_v53 = vld [vmem:[%s6410_s3 + $0x8] sm:$0xf] }
   0x3   :  { %s6435_s8 = smov 16   ;;  %s4265_s22 = smov 127   ;;  %v3862_v54 = vld [vmem:[%s6410_s3 + $0xc] sm:$0xf]  ;;  %vm4275_vm10 = vmmov 0   ;;  %vm1357_vm11 = vcmask 130048  }
   0x4   :  { %s6429_s23 = smov 113   ;;  %s6431_s24 = smov 112   ;;  %6480 = vst [vmem:[#allocation3_spill] sm:$0xff] %v4460_v7  ;;  %v4465_v11 = vsub.s32 1, %v4460_v7  ;;  %vm72_vm0 = vcmp.lt.s32.totalorder %v4462_v10, 17  ;;  %v4475_v16 = vsub.s32 0, %v4460_v7 }
   0x5   :  { %s6427_s25 = smov 111   ;;  %s6479_s28 = sld [smem:[#allocation52_spill]]  ;;  %v4478_v17 = vsub.s32 3, %v4460_v7  ;;  %v4481_v18 = vsub.s32 2, %v4460_v7  ;;  %vm116_vm1 = vcmp.lt.s32.totalorder %v4462_v10, 16  ;;  %vm160_vm2 = vcmp.lt.s32.totalorder %v4462_v10, 15 }
   0x6   :  { %v85_v19 = vrot.slane %v61_v12, %v4465_v11  ;;  %v129_v20 = vrot.slane %v3860_v13, %v4465_v11  ;;  %v81_v24 = vrot.slane %v61_v12, %v4475_v16  ;;  %v125_v25 = vrot.slane %v3860_v13, %v4475_v16  ;;  %s4273_s27 = smov 7   ;;  %s4277_s0 = smov 120  }
   0x7   :  { %v93_v26 = vrot.slane %v61_v12, %v4478_v17  ;;  %v137_v29 = vrot.slane %v3860_v13, %v4478_v17  ;;  %v89_v30 = vrot.slane %v61_v12, %v4481_v18  ;;  %v133_v34 = vrot.slane %v3860_v13, %v4481_v18 }
   0x8   :  { %v4372_v0 = vld [vmem:[%s6478_s26 + $0x10] sm:$0xff]  ;;  %v4377_v1 = vld [vmem:[%s6478_s26] sm:$0xff]  ;;  %v4386_v2 = vld [vmem:[%s6478_s26 + $0x18] sm:$0xff]  ;;  %v173_v57 = vrot.slane %v3861_v53, %v4465_v11  ;;  %vm204_vm3 = vcmp.lt.s32.totalorder %v4462_v10, 1  ;;  %v217_v58 = vrot.slane %v3862_v54, %v4465_v11  ;;  %v169_v60 = vrot.slane %v3861_v53, %v4475_v16 }
   0x9   :  { %66 = vrot.lane.b32.xlu1 %v4372_v0, %s4261_s29  ;;  %62 = vrot.lane.b32.xlu0 %v4377_v1, %s4261_s29  ;;  %v4391_v3 = vld [vmem:[%s6478_s26 + $0x8] sm:$0xff]  ;;  %v177_v61 = vrot.slane %v3861_v53, %v4481_v18  ;;  %v181_v62 = vrot.slane %v3861_v53, %v4478_v17  ;;  %v221_v12 = vrot.slane %v3862_v54, %v4481_v18  ;;  %vm279_vm4 = vcmp.lt.s32.totalorder %v4462_v10, 127  ;;  %s4272_s26 = smov 9  }
   0xa   :  { %vm367_vm5 = vcmp.lt.s32.totalorder %v4462_v10, 112  ;;  %vm323_vm6 = vcmp.lt.s32.totalorder %v4462_v10, 113  ;;  %vm411_vm7 = vcmp.lt.s32.totalorder %v4462_v10, 111  ;;  %vm2552_vm12 = vcmask 719872  }
   0xb   :  { %v502_v5 = vld [vmem:[%s6479_s28] sm:$0xff]  ;;  %s4276_s28 = smov 119   ;;  %v6585_v10 = vmov 0.0  }
   0xd   :  { %68 = vrot.lane.b32.xlu1 %v4386_v2, %s4261_s29  ;;  %64 = vrot.lane.b32.xlu0 %v4391_v3, %s4261_s29 }
  0x11   :  { %110 = vrot.lane.b32.xlu1 %v4391_v3, %s6435_s8  ;;  %108 = vrot.lane.b32.xlu0 %v4377_v1, %s6435_s8 }
  0x15   :  { %114 = vrot.lane.b32.xlu1 %v4386_v2, %s6435_s8  ;;  %112 = vrot.lane.b32.xlu0 %v4372_v0, %s6435_s8 }
  0x19   :  { %154 = vrot.lane.b32.xlu1 %v4391_v3, %s6433_s20  ;;  %152 = vrot.lane.b32.xlu0 %v4377_v1, %s6433_s20 }
  0x1d   :  { %158 = vrot.lane.b32.xlu1 %v4386_v2, %s6433_s20  ;;  %156 = vrot.lane.b32.xlu0 %v4372_v0, %s6433_s20 }
  0x21   :  { %198 = vrot.lane.b32.xlu1 %v4391_v3, %s4264_s21  ;;  %196 = vrot.lane.b32.xlu0 %v4377_v1, %s4264_s21 }
  0x25   :  { %202 = vrot.lane.b32.xlu1 %v4386_v2, %s4264_s21  ;;  %200 = vrot.lane.b32.xlu0 %v4372_v0, %s4264_s21 }
  0x29   :  { %273 = vrot.lane.b32.xlu1 %v4391_v3, %s4265_s22  ;;  %271 = vrot.lane.b32.xlu0 %v4377_v1, %s4265_s22 }
  0x2d   :  { %277 = vrot.lane.b32.xlu1 %v4386_v2, %s4265_s22  ;;  %275 = vrot.lane.b32.xlu0 %v4372_v0, %s4265_s22 }
  0x31   :  { %317 = vrot.lane.b32.xlu1 %v4391_v3, %s6429_s23  ;;  %315 = vrot.lane.b32.xlu0 %v4377_v1, %s6429_s23 }
  0x35   :  { %321 = vrot.lane.b32.xlu1 %v4386_v2, %s6429_s23  ;;  %319 = vrot.lane.b32.xlu0 %v4372_v0, %s6429_s23  ;;  %s6484_s23 = smov 112  }
  0x39   :  { %361 = vrot.lane.b32.xlu1 %v4391_v3, %s6431_s24  ;;  %359 = vrot.lane.b32.xlu0 %v4377_v1, %s6431_s24 }
  0x3d   :  { %365 = vrot.lane.b32.xlu1 %v4386_v2, %s6431_s24  ;;  %363 = vrot.lane.b32.xlu0 %v4372_v0, %s6431_s24 }
  0x41   :  { %405 = vrot.lane.b32.xlu1 %v4391_v3, %s6427_s25  ;;  %403 = vrot.lane.b32.xlu0 %v4377_v1, %s6427_s25 }
  0x45   :  { %409 = vrot.lane.b32.xlu1 %v4386_v2, %s6427_s25  ;;  %407 = vrot.lane.b32.xlu0 %v4372_v0, %s6427_s25 }
  0x49   :  { %505 = vperm.xlu0 %4163, %v502_v5  }
  0x7b   :  { %v67_v8 = vpop.permute.xlu1 %66  ;;  %v63_v9 = vpop.permute.xlu0 %62 }
  0x7f   :  { %v69_v14 = vpop.permute.xlu1 %68  ;;  %v65_v15 = vpop.permute.xlu0 %64 }
  0x80   :  { %v75_v21 = vsel %vm72_vm0, %v63_v9, %v65_v15  ;;  %v76_v27 = vsel %vm72_vm0, %v69_v14, %v63_v9  ;;  %v73_v33 = vsel %vm72_vm0, %v67_v8, %v69_v14  ;;  %v74_v35 = vsel %vm72_vm0, %v65_v15, %v67_v8 }
  0x81   :  { %v99_v31 = vmul.f32 %v85_v19, %v75_v21  ;;  %v98_v39 = vmul.f32 %v81_v24, %v76_v27  ;;  %v101_v42 = vmul.f32 %v93_v26, %v73_v33  ;;  %v100_v46 = vmul.f32 %v89_v30, %v74_v35 }
  0x82   :  { %v213_v9 = vrot.slane %v3862_v54, %v4475_v16  ;;  %v225_v19 = vrot.slane %v3862_v54, %v4478_v17 }
  0x83   :  { %v111_v22 = vpop.permute.xlu1 %110  ;;  %v109_v23 = vpop.permute.xlu0 %108 }
  0x84   :  { %v119_v28 = vsel %vm116_vm1, %v109_v23, %v111_v22 }
  0x85   :  { %v143_v32 = vmul.f32 %v129_v20, %v119_v28 }
  0x87   :  { %v115_v36 = vpop.permute.xlu1 %114  ;;  %v113_v37 = vpop.permute.xlu0 %112  ;;  %v482_v38 = vpack.c.bf16 %v143_v32, %v99_v31 }
  0x88   :  { %v120_v40 = vsel %vm116_vm1, %v115_v36, %v109_v23  ;;  %v118_v41 = vsel %vm116_vm1, %v111_v22, %v113_v37  ;;  %v117_v43 = vsel %vm116_vm1, %v113_v37, %v115_v36 }
  0x89   :  { %525 = vmatprep.subr.bf16.mxu0 %v482_v38  ;;  %v142_v44 = vmul.f32 %v125_v25, %v120_v40  ;;  %v145_v45 = vmul.f32 %v137_v29, %v117_v43  ;;  %v144_v47 = vmul.f32 %v133_v34, %v118_v41  ;;  %v3863_v25 = vld [vmem:[%s6410_s3 + $0x10] sm:$0xf]  ;;  %v3864_v34 = vld [vmem:[%s6410_s3 + $0x14] sm:$0xf] }
  0x8a   :  { %v248_v35 = vrot.slane %v3863_v25, %v4465_v11  ;;  %v256_v36 = vrot.slane %v3863_v25, %v4478_v17  ;;  %v244_v37 = vrot.slane %v3863_v25, %v4475_v16  ;;  %v252_v43 = vrot.slane %v3863_v25, %v4481_v18 }
  0x8b   :  { %v155_v48 = vpop.permute.xlu1 %154  ;;  %v153_v49 = vpop.permute.xlu0 %152  ;;  %v481_v50 = vpack.c.bf16 %v142_v44, %v98_v39  ;;  %v484_v51 = vpack.c.bf16 %v145_v45, %v101_v42  ;;  %v483_v52 = vpack.c.bf16 %v144_v47, %v100_v46  ;;  %v288_v44 = vrot.slane %v3864_v34, %v4475_v16 }
  0x8c   :  { %v163_v59 = vsel %vm160_vm2, %v153_v49, %v155_v48  ;;  %v300_v45 = vrot.slane %v3864_v34, %v4478_v17  ;;  %v292_v47 = vrot.slane %v3864_v34, %v4465_v11  ;;  %v261_v53 = vmul.f32 %v244_v37, %v4377_v1 }
  0x8d   :  { %526 = vmatpush1.bf16.msra.mxu0 %v481_v50  ;;  %566 = vmatprep.subr.bf16.mxu1 %v484_v51  ;;  %v187_v13 = vmul.f32 %v173_v57, %v163_v59  ;;  %v262_v51 = vmul.f32 %v248_v35, %v4391_v3  ;;  %v263_v54 = vmul.f32 %v252_v43, %v4372_v0 }
  0x8e   :  { %567 = vmatpush1.bf16.msra.mxu1 %v483_v52  ;;  %v264_v52 = vmul.f32 %v256_v36, %v4386_v2 }
  0x8f   :  { %v159_v55 = vpop.permute.xlu1 %158  ;;  %v157_v56 = vpop.permute.xlu0 %156 }
  0x90   :  { %v164_v6 = vsel %vm160_vm2, %v159_v55, %v153_v49  ;;  %v162_v14 = vsel %vm160_vm2, %v155_v48, %v157_v56  ;;  %v161_v20 = vsel %vm160_vm2, %v157_v56, %v159_v55  ;;  %v296_v48 = vrot.slane %v3864_v34, %v4481_v18 }
  0x91   :  { %v186_v21 = vmul.f32 %v169_v60, %v164_v6  ;;  %v188_v26 = vmul.f32 %v177_v61, %v162_v14  ;;  %v189_v30 = vmul.f32 %v181_v62, %v161_v20 }
  0x93   :  { %v199_v63 = vpop.permute.xlu1 %198  ;;  %v197_v5 = vpop.permute.xlu0 %196 }
  0x94   :  { %v207_v8 = vsel %vm204_vm3, %v197_v5, %v199_v63 }
  0x95   :  { %v231_v15 = vmul.f32 %v217_v58, %v207_v8  ;;  %v3866_v8 = vld [vmem:[%s6410_s3 + $0x1c] sm:$0xf] }
  0x96   :  { %v388_v25 = vrot.slane %v3866_v8, %v4478_v17 }
  0x97   :  { %v203_v22 = vpop.permute.xlu1 %202  ;;  %v201_v23 = vpop.permute.xlu0 %200  ;;  %v486_v24 = vpack.c.bf16 %v231_v15, %v187_v13 }
  0x98   :  { %v208_v27 = vsel %vm204_vm3, %v203_v22, %v197_v5  ;;  %v205_v28 = vsel %vm204_vm3, %v201_v23, %v203_v22  ;;  %v206_v29 = vsel %vm204_vm3, %v199_v63, %v201_v23  ;;  %v376_v22 = vrot.slane %v3866_v8, %v4475_v16  ;;  %v3867_v23 = vld [vmem:[%s6410_s3 + $0x20] sm:$0xf] }
  0x99   :  { %v230_v31 = vmul.f32 %v213_v9, %v208_v27  ;;  %v232_v32 = vmul.f32 %v221_v12, %v206_v29  ;;  %v233_v33 = vmul.f32 %v225_v19, %v205_v28  ;;  %527 = vmatprep.subr.bf16.mxu0 %v486_v24  ;;  %v3865_v9 = vld [vmem:[%s6410_s3 + $0x18] sm:$0xf]  ;;  %v384_v27 = vrot.slane %v3866_v8, %v4481_v18 }
  0x9a   :  { %v344_v12 = vrot.slane %v3865_v9, %v4478_v17  ;;  %v336_v13 = vrot.slane %v3865_v9, %v4465_v11  ;;  %v340_v20 = vrot.slane %v3865_v9, %v4481_v18  ;;  %v332_v28 = vrot.slane %v3865_v9, %v4475_v16 }
  0x9b   :  { %v274_v38 = vpop.permute.xlu1 %273  ;;  %v272_v39 = vpop.permute.xlu0 %271  ;;  %v485_v40 = vpack.c.bf16 %v230_v31, %v186_v21  ;;  %v488_v41 = vpack.c.bf16 %v233_v33, %v189_v30  ;;  %v487_v42 = vpack.c.bf16 %v232_v32, %v188_v26  ;;  %v380_v26 = vrot.slane %v3866_v8, %v4465_v11  ;;  %v501_v8 = vld [vmem:[%s6411_s7] sm:$0xf]  ;;  %s4274_s7 = smov 121  }
  0x9c   :  { %v282_v46 = vsel %vm279_vm4, %v272_v39, %v274_v38  ;;  %v420_v35 = vrot.slane %v3867_v23, %v4475_v16 }
  0x9d   :  { %528 = vmatpush1.bf16.msra.mxu0 %v485_v40  ;;  %568 = vmatprep.subr.bf16.mxu1 %v488_v41  ;;  %v305_v55 = vmul.f32 %v288_v44, %v282_v46 }
  0x9e   :  { %569 = vmatpush1.bf16.msra.mxu1 %v487_v42 }
  0x9f   :  { %v278_v49 = vpop.permute.xlu1 %277  ;;  %v276_v50 = vpop.permute.xlu0 %275  ;;  %v489_v5 = vpack.c.bf16 %v305_v55, %v261_v53  ;;  %v424_v53 = vrot.slane %v3867_v23, %v4465_v11  ;;  %v428_v55 = vrot.slane %v3867_v23, %v4481_v18 }
  0xa0   :  { %v283_v56 = vsel %vm279_vm4, %v278_v49, %v272_v39  ;;  %v280_v57 = vsel %vm279_vm4, %v276_v50, %v278_v49  ;;  %v281_v58 = vsel %vm279_vm4, %v274_v38, %v276_v50 }
  0xa1   :  { %v308_v59 = vmul.f32 %v300_v45, %v283_v56  ;;  %v306_v60 = vmul.f32 %v292_v47, %v281_v58  ;;  %v307_v61 = vmul.f32 %v296_v48, %v280_v57 }
  0xa3   :  { %v318_v3 = vpop.permute.xlu1 %317  ;;  %v316_v62 = vpop.permute.xlu0 %315  ;;  %v490_v2 = vpack.c.bf16 %v306_v60, %v262_v51  ;;  %v492_v63 = vpack.c.bf16 %v308_v59, %v264_v52  ;;  %v491_v1 = vpack.c.bf16 %v307_v61, %v263_v54  ;;  %v432_v52 = vrot.slane %v3867_v23, %v4478_v17 }
  0xa4   :  { %v326_v30 = vsel %vm323_vm6, %v316_v62, %v318_v3 }
  0xa5   :  { %529 = vmatprep.subr.bf16.mxu0 %v490_v2  ;;  %570 = vmatprep.subr.bf16.mxu1 %v492_v63  ;;  %v349_v44 = vmul.f32 %v332_v28, %v326_v30 }
  0xa6   :  { %530 = vmatpush1.bf16.msra.mxu0 %v489_v5  ;;  %571 = vmatpush1.bf16.msra.mxu1 %v491_v1 }
  0xa7   :  { %v322_v0 = vpop.permute.xlu1 %321  ;;  %v320_v6 = vpop.permute.xlu0 %319 }
  0xa8   :  { %v327_v19 = vsel %vm323_vm6, %v322_v0, %v316_v62  ;;  %v325_v21 = vsel %vm323_vm6, %v318_v3, %v320_v6  ;;  %v324_v29 = vsel %vm323_vm6, %v320_v6, %v322_v0 }
  0xa9   :  { %v352_v31 = vmul.f32 %v344_v12, %v327_v19  ;;  %v350_v32 = vmul.f32 %v336_v13, %v325_v21  ;;  %v351_v40 = vmul.f32 %v340_v20, %v324_v29 }
  0xab   :  { %v362_v14 = vpop.permute.xlu1 %361  ;;  %v360_v15 = vpop.permute.xlu0 %359 }
  0xac   :  { %v370_v24 = vsel %vm367_vm5, %v360_v15, %v362_v14 }
  0xad   :  { %v393_v36 = vmul.f32 %v376_v22, %v370_v24 }
  0xaf   :  { %v366_v33 = vpop.permute.xlu1 %365  ;;  %v364_v34 = vpop.permute.xlu0 %363  ;;  %v493_v51 = vpack.c.bf16 %v393_v36, %v349_v44  ;;  %v4177_v36 = vld [vmem:[%s6412_s5] sm:$0xff]   ;;  %v4184_v44 = vld [vmem:[%s6412_s5 + $0xd0] sm:$0xff]  }
  0xb0   :  { %v371_v37 = vsel %vm367_vm5, %v366_v33, %v360_v15  ;;  %v368_v38 = vsel %vm367_vm5, %v364_v34, %v366_v33  ;;  %v369_v39 = vsel %vm367_vm5, %v362_v14, %v364_v34  ;;  %v4175_v33 = vld [vmem:[%s6412_s5 + $0x40] sm:$0xff]  }
  0xb1   :  { %v396_v41 = vmul.f32 %v388_v25, %v371_v37  ;;  %v394_v42 = vmul.f32 %v380_v26, %v369_v39  ;;  %v395_v43 = vmul.f32 %v384_v27, %v368_v38  ;;  %v4178_v37 = vld [vmem:[%s6412_s5 + $0x80] sm:$0xff]   ;;  %v4179_v38 = vld [vmem:[%s6412_s5 + $0x48] sm:$0xff]  }
  0xb3   :  { %v406_v45 = vpop.permute.xlu1 %405  ;;  %v404_v46 = vpop.permute.xlu0 %403  ;;  %v494_v47 = vpack.c.bf16 %v394_v42, %v350_v32  ;;  %v496_v48 = vpack.c.bf16 %v396_v41, %v352_v31  ;;  %v495_v49 = vpack.c.bf16 %v395_v43, %v351_v40  ;;  %v4180_v40 = vld [vmem:[%s6412_s5 + $0xc8] sm:$0xff]   ;;  %v4183_v43 = vld [vmem:[%s6412_s5 + $0x50] sm:$0xff]  }
  0xb4   :  { %v414_v50 = vsel %vm411_vm7, %v404_v46, %v406_v45  ;;  %v4181_v41 = vld [vmem:[%s6412_s5 + $0x8] sm:$0xff]  }
  0xb5   :  { %531 = vmatprep.subr.bf16.mxu0 %v494_v47  ;;  %572 = vmatprep.subr.bf16.mxu1 %v496_v48  ;;  %v437_v54 = vmul.f32 %v420_v35, %v414_v50  ;;  %v4176_v35 = vld [vmem:[%s6412_s5 + $0xc0] sm:$0xff]   ;;  %v4182_v42 = vld [vmem:[%s6412_s5 + $0x88] sm:$0xff]   ;;  %v4187_v47 = vld [vmem:[%s6412_s5 + $0x58] sm:$0xff]  }
  0xb6   :  { %532 = vmatpush1.bf16.msra.mxu0 %v493_v51  ;;  %573 = vmatpush1.bf16.msra.mxu1 %v495_v49  ;;  %v4188_v48 = vld [vmem:[%s6412_s5 + $0xd8] sm:$0xff]   ;;  %v4191_v51 = vld [vmem:[%s6412_s5 + $0x60] sm:$0xff]  }
  0xb7   :  { %v410_v56 = vpop.permute.xlu1 %409  ;;  %v408_v57 = vpop.permute.xlu0 %407  ;;  %v497_v62 = vpack.c.bf16 %v437_v54, %v437_v54  ;;  %v4189_v49 = vld [vmem:[%s6412_s5 + $0x18] sm:$0xff]   ;;  %v4194_v54 = vld [vmem:[%s6412_s5 + $0xa0] sm:$0xff]  }
  0xb8   :  { %v415_v58 = vsel %vm411_vm7, %v410_v56, %v404_v46  ;;  %v412_v59 = vsel %vm411_vm7, %v408_v57, %v410_v56  ;;  %v413_v60 = vsel %vm411_vm7, %v406_v45, %v408_v57  ;;  %v4185_v45 = vld [vmem:[%s6412_s5 + $0x10] sm:$0xff]   ;;  %v4190_v50 = vld [vmem:[%s6412_s5 + $0x98] sm:$0xff]   ;;  %v4196_v56 = vld [vmem:[%s6412_s5 + $0xe8] sm:$0xff]  }
  0xb9   :  { %v440_v61 = vmul.f32 %v432_v52, %v415_v58  ;;  %v438_v3 = vmul.f32 %v424_v53, %v413_v60  ;;  %v439_v2 = vmul.f32 %v428_v55, %v412_v59  ;;  %v514_v0 = vsel %vm512_vm8, %v497_v62, 0  ;;  %v4186_v46 = vld [vmem:[%s6412_s5 + $0x90] sm:$0xff]   ;;  %v4192_v52 = vld [vmem:[%s6412_s5 + $0xe0] sm:$0xff]   ;;  %v4195_v55 = vld [vmem:[%s6412_s5 + $0x68] sm:$0xff]  }
  0xba   :  { %v4193_v53 = vld [vmem:[%s6412_s5 + $0x20] sm:$0xff]   ;;  %v4197_v57 = vld [vmem:[%s6412_s5 + $0x28] sm:$0xff]   ;;  %v4199_v59 = vld [vmem:[%s6412_s5 + $0x70] sm:$0xff]  }
  0xbb   :  { %v500_v63 = vpack.c.bf16 %v440_v61, %v440_v61  ;;  %v498_v1 = vpack.c.bf16 %v438_v3, %v438_v3  ;;  %v499_v5 = vpack.c.bf16 %v439_v2, %v439_v2  ;;  %v4198_v58 = vld [vmem:[%s6412_s5 + $0xa8] sm:$0xff]   ;;  %v4200_v60 = vld [vmem:[%s6412_s5 + $0xf0] sm:$0xff]   ;;  %v4203_v2 = vld [vmem:[%s6412_s5 + $0x78] sm:$0xff]  }
  0xbc   :  { %v4201_v3 = vld [vmem:[%s6412_s5 + $0x30] sm:$0xff]  }
  0xbd   :  { %3868 = vmatprep.subr.msk.bf16.mxu0 %vm512_vm8, %v498_v1  ;;  %3870 = vmatprep.subr.msk.bf16.mxu1 %vm512_vm8, %v500_v63  ;;  %v520_v6 = vsel %vm512_vm8, %v499_v5, 0  ;;  %v4202_v62 = vld [vmem:[%s6412_s5 + $0xb0] sm:$0xff]   ;;  %v4204_v63 = vld [vmem:[%s6412_s5 + $0xf8] sm:$0xff]  }
  0xbe   :  { %534 = vmatpush1.bf16.msra.mxu0 %v514_v0  ;;  %575 = vmatpush1.bf16.msra.mxu1 %v520_v6  ;;  %v4205_v1 = vld [vmem:[%s6412_s5 + $0x38] sm:$0xff]  }
  0xbf   :  { %4059 = vmatprep.subr.bf16.mxu0 %v4175_v33  ;;  %4081 = vmatprep.subr.bf16.mxu1 %v4176_v35  ;;  %v4206_v6 = vld [vmem:[%s6412_s5 + $0xb8] sm:$0xff]   ;;  %s4271_s5 = smov 8  }
  0xc1   :  { %3869 = vmatmul.mubr.msk.bf16.vlgmr.msra.gmra.mrb[0].mxu0 %vm508_vm9, %v501_v8  ;;  %3871 = vmatmul.mubr.msk.bf16.vlgmr.msra.gmra.mrb[0].mxu1 %vm508_vm9, %v501_v8 }
  0xc2   :  { %4060 = vmatpush3.bf16.msra.mxu0 %v4177_v36  ;;  %4082 = vmatpush3.bf16.msra.mxu1 %v4178_v37 }
  0xc3   :  { %4061 = vmatprep.subr.bf16.mxu0 %v4179_v38  ;;  %4083 = vmatprep.subr.bf16.mxu1 %v4180_v40 }
  0xc6   :  { %4062 = vmatpush3.bf16.msra.mxu0 %v4181_v41  ;;  %4084 = vmatpush3.bf16.msra.mxu1 %v4182_v42 }
  0xc7   :  { %4063 = vmatprep.subr.bf16.mxu0 %v4183_v43  ;;  %4085 = vmatprep.subr.bf16.mxu1 %v4184_v44 }
  0xc8   :  { %v506_v9 = vpop.permute.xlu0 %505 }
  0xca   :  { %4064 = vmatpush3.bf16.msra.mxu0 %v4185_v45  ;;  %4086 = vmatpush3.bf16.msra.mxu1 %v4186_v46  ;;  %v6437_v46 = vmov 0.0  }
  0xcb   :  { %4065 = vmatprep.subr.bf16.mxu0 %v4187_v47  ;;  %4087 = vmatprep.subr.bf16.mxu1 %v4188_v48 }
  0xce   :  { %4066 = vmatpush3.bf16.msra.mxu0 %v4189_v49  ;;  %4088 = vmatpush3.bf16.msra.mxu1 %v4190_v50 }
  0xcf   :  { %4067 = vmatprep.subr.bf16.mxu0 %v4191_v51  ;;  %4089 = vmatprep.subr.bf16.mxu1 %v4192_v52 }
  0xd2   :  { %4068 = vmatpush3.bf16.msra.mxu0 %v4193_v53  ;;  %4090 = vmatpush3.bf16.msra.mxu1 %v4194_v54 }
  0xd3   :  { %4069 = vmatprep.subr.bf16.mxu0 %v4195_v55  ;;  %4091 = vmatprep.subr.bf16.mxu1 %v4196_v56 }
  0xd6   :  { %4070 = vmatpush3.bf16.msra.mxu0 %v4197_v57  ;;  %4092 = vmatpush3.bf16.msra.mxu1 %v4198_v58  ;;  %v1108_v58 = vld [vmem:[%s6414_s10] sm:$0xff] }
  0xd7   :  { %4071 = vmatprep.subr.bf16.mxu0 %v4199_v59  ;;  %4093 = vmatprep.subr.bf16.mxu1 %v4200_v60  ;;  %v1109_v59 = vld [vmem:[%s6414_s10 + $0x8] sm:$0xff]  ;;  %v4790_v60 = vld [vmem:[%s6415_s4 + $0x1] ss:$0 sm:$0xff] }
  0xda   :  { %4072 = vmatpush3.bf16.msra.mxu0 %v4201_v3  ;;  %4094 = vmatpush3.bf16.msra.mxu1 %v4202_v62 }
  0xdb   :  { %4073 = vmatprep.subr.bf16.mxu0 %v4203_v2  ;;  %4095 = vmatprep.subr.bf16.mxu1 %v4204_v63 }
  0xde   :  { %4074 = vmatpush3.bf16.msra.mxu0 %v4205_v1  ;;  %4096 = vmatpush3.bf16.msra.mxu1 %v4206_v6  ;;  %v4802_v1 = vld [vmem:[%s6415_s4 + $0x3] ss:$0 sm:$0xff] }
  0xdf   :  { %1361 = vmatprep.subr.bf16.mxu1 %v6439_v4  ;;  %4109 = vmatprep.subr.bf16.mxu0 %v6437_v46 }
 0x194   :  { %v600_v12 = vpop.f32.mrb[0].mxu1  ;;  %v559_v13 = vpop.f32.mrb[0].mxu0 }
 0x195   :  { %v601_v14 = vadd.f32 %v600_v12, %v506_v9  ;;  %v560_v15 = vadd.f32 %v559_v13, %v506_v9  ;;  %v561_v19 = vpop.f32.mrb[1].mxu0  ;;  %v602_v20 = vpop.f32.mrb[1].mxu1 }
 0x196   :  { %v562_v21 = vadd.f32 %v561_v19, %v506_v9  ;;  %v563_v22 = vpop.f32.mrb[2].mxu0  ;;  %v604_v23 = vpop.f32.mrb[2].mxu1  ;;  %v603_v26 = vadd.f32 %v602_v20, %v506_v9 }
 0x197   :  { %v609_v24 = vmul.f32 0.2, %v601_v14  ;;  %v607_v25 = vmul.f32 0.2, %v560_v15  ;;  %v564_v27 = vpop.f32.mrb[3].mxu0  ;;  %v605_v28 = vpop.f32.mrb[3].mxu1 }
 0x198   :  { %v608_v31 = vmul.f32 0.2, %v562_v21  ;;  %v610_v32 = vmul.f32 0.2, %v603_v26 }
 0x199   :  { %v4624_v29 = vmax.f32 %v601_v14, %v609_v24  ;;  %v4626_v30 = vmax.f32 %v560_v15, %v607_v25 }
 0x19a   :  { %v4635_v34 = vmax.f32 %v562_v21, %v608_v31  ;;  %v4651_v39 = vmax.f32 %v603_v26, %v610_v32 }
 0x19b   :  { %619 = vrot.lane.b32.xlu0 %v4624_v29, %s4265_s22  ;;  %615 = vrot.lane.b32.xlu1 %v4626_v30, %s4265_s22 }
 0x19f   :  { %617 = vrot.lane.b32.xlu1 %v4635_v34, %s4265_s22 }
 0x1a3   :  { %621 = vrot.lane.b32.xlu1 %v4651_v39, %s4265_s22 }
 0x20d   :  { %v616_v61 = vpop.permute.xlu1 %615  ;;  %v620_v5 = vpop.permute.xlu0 %619 }
 0x211   :  { %v618_v0 = vpop.permute.xlu1 %617 }
 0x212   :  { %v4738_v8 = vsel %vm279_vm4, %v618_v0, %v620_v5  ;;  %v4742_v9 = vsel %vm279_vm4, %v616_v61, %v618_v0 }
 0x213   :  { %v627_v12 = vmax.f32 %v4626_v30, %v4742_v9  ;;  %v628_v13 = vmax.f32 %v4635_v34, %v4738_v8 }
 0x215   :  { %v622_v14 = vpop.permute.xlu1 %621  ;;  %v4164_v15 = vpack.i.bf16 %v628_v13, %v627_v12 }
 0x216   :  { %v4751_v19 = vsel %vm279_vm4, %v620_v5, %v622_v14  ;;  %v4755_v20 = vsel %vm279_vm4, %v622_v14, %v616_v61  ;;  %v4795_v61 = vld [vmem:[%s6415_s4] ss:$0 sm:$0xff]  ;;  %v4807_v5 = vld [vmem:[%s6415_s4 + $0x2] ss:$0 sm:$0xff] }
 0x217   :  { %v629_v21 = vmax.f32 %v4624_v29, %v4751_v19  ;;  %v630_v22 = vmax.f32 %v4651_v39, %v4755_v20  ;;  %4165 = vrot.lane.b32.xlu0 %v4164_v15, %s6431_s24  ;;  %v3912_v15 = vld [vmem:[%s6415_s4 + $0x4] ss:$0 sm:$0xff] }
 0x219   :  { %v4169_v23 = vpack.i.bf16 %v630_v22, %v629_v21 }
 0x21b   :  { %4170 = vrot.lane.b32.xlu1 %v4169_v23, %s6431_s24 }
 0x289   :  { %v4166_v24 = vpop.permute.xlu0 %4165 }
 0x28a   :  { %v4168_v25 = vunpack.i.h.bf16 %v4166_v24  ;;  %v4167_v26 = vunpack.i.l.bf16 %v4166_v24 }
 0x28c   :  { %v641_v27 = vsel %vm367_vm5, %v4167_v26, %v4168_v25 }
 0x28d   :  { %v4171_v28 = vpop.permute.xlu1 %4170  ;;  %v643_v37 = vmax.f32 %v627_v12, %v641_v27  ;;  %v4824_v27 = vld [vmem:[%s6415_s4 + $0x6] ss:$0 sm:$0xff] }
 0x28e   :  { %v4173_v31 = vunpack.i.h.bf16 %v4171_v28  ;;  %v4172_v32 = vunpack.i.l.bf16 %v4171_v28  ;;  %v4829_v28 = vld [vmem:[%s6415_s4 + $0x8] ss:$0 sm:$0xff] }
 0x28f   :  { %v647_v45 = vpack.c.bf16 %v643_v37, %v643_v37 }
 0x290   :  { %v639_v33 = vsel %vm367_vm5, %v4172_v32, %v4173_v31  ;;  %v640_v35 = vsel %vm367_vm5, %v4168_v25, %v4172_v32  ;;  %v642_v36 = vsel %vm367_vm5, %v4173_v31, %v4167_v26  ;;  %v4835_v31 = vld [vmem:[%s6415_s4 + $0x7] ss:$0 sm:$0xff] }
 0x291   :  { %v644_v38 = vmax.f32 %v628_v13, %v640_v35  ;;  %v646_v40 = vmax.f32 %v630_v22, %v642_v36  ;;  %v645_v41 = vmax.f32 %v629_v21, %v639_v33  ;;  %v4818_v21 = vld [vmem:[%s6415_s4 + $0x5] ss:$0 sm:$0xff] }
 0x293   :  { %v648_v42 = vpack.c.bf16 %v644_v38, %v644_v38  ;;  %v650_v43 = vpack.c.bf16 %v646_v40, %v646_v40  ;;  %v649_v44 = vpack.c.bf16 %v645_v41, %v645_v41 }
 0x295   :  { %939 = vmatprep.mubr.bf16.mxu0 %v648_v42  ;;  %979 = vmatprep.mubr.bf16.mxu1 %v650_v43  ;;  %v4207_v43 = vld [vmem:[%s6413_s9] sm:$0xff]   ;;  %s6493_s9 = smov 111  }
 0x296   :  { %940 = vmatmul.mubr.bf16.vlgmr.msra.gmra.mrb[4].mxu0 %v647_v45  ;;  %980 = vmatmul.mubr.bf16.vlgmr.msra.gmra.mrb[4].mxu1 %v649_v44 }
 0x297   :  { %4119 = vmatprep.mubr.msk.bf16.mxu0 %vm4275_vm10, %v6437_v46 }
 0x369   :  { %v4075_v47 = vpop.f32.mrb[4].mxu0  ;;  %v4097_v48 = vpop.f32.mrb[4].mxu1 }
 0x36a   :  { %v4076_v49 = vpop.f32.mrb[5].mxu0  ;;  %v4098_v50 = vpop.f32.mrb[5].mxu1 }
 0x36b   :  { %v4077_v51 = vadd.f32 %v4076_v49, %v4075_v47  ;;  %v4099_v52 = vadd.f32 %v4098_v50, %v4097_v48  ;;  %v4078_v53 = vpop.f32.mrb[6].mxu0  ;;  %v4100_v54 = vpop.f32.mrb[6].mxu1 }
 0x36c   :  { %v4079_v55 = vpop.f32.mrb[7].mxu0  ;;  %v4101_v56 = vpop.f32.mrb[7].mxu1 }
 0x36d   :  { %v982_v57 = vadd.f32 %v4099_v52, %v4077_v51 }
 0x36f   :  { %1000 = vrot.lane.b32.xlu1 %v982_v57, %s4271_s5  ;;  %988 = vrot.lane.b32.xlu0 %v982_v57, %s4272_s26  ;;  %v1042_v25 = vmul.f32 %v3912_v15, %v982_v57 }
 0x373   :  { %1024 = vrot.lane.b32.xlu1 %v982_v57, %s4264_s21  ;;  %1012 = vrot.lane.b32.xlu0 %v982_v57, %s4273_s27 }
 0x377   :  { %1058 = vrot.lane.b32.xlu1 %v982_v57, %s4274_s7  ;;  %1046 = vrot.lane.b32.xlu0 %v982_v57, %s4265_s22 }
 0x37b   :  { %1082 = vrot.lane.b32.xlu1 %v982_v57, %s4276_s28  ;;  %1070 = vrot.lane.b32.xlu0 %v982_v57, %s4277_s0 }
 0x37f   :  { %1112 = vperm.xlu0 %4163, %v1108_v58   ;;  %1117 = vperm.xlu1 %4174, %v1109_v59  }
 0x3e1   :  { %v1001_v3 = vpop.permute.xlu1 %1000  ;;  %v989_v62 = vpop.permute.xlu0 %988 }
 0x3e2   :  { %v1008_v2 = vmul.f32 %v4790_v60, %v1001_v3  ;;  %v996_v63 = vmul.f32 %v4795_v61, %v989_v62  ;;  %v4208_v3 = vld [vmem:[%s6416_s11 + $0x4] ss:$8 sps:$4 sm:$0xff]  }
 0x3e3   :  { %3942 = vmatprep.mubr.msk.bf16.mxu1 %vm1357_vm11, %v4208_v3  ;;  %v1336_v62 = vld [vmem:[%s6417_s12] sm:$0xff] }
 0x3e4   :  { %v1101_v0 = vpack.c.bf16 %v1008_v2, %v996_v63  ;;  %v1337_v2 = vld [vmem:[%s6417_s12 + $0x8] sm:$0xff]  ;;  %s6482_s12 = smov 15   ;;  %v4211_v63 = vld [vmem:[%s6418_s6] ss:$16 sps:$4 sm:$0xff]  }
 0x3e5   :  { %v1025_v6 = vpop.permute.xlu1 %1024  ;;  %v1013_v12 = vpop.permute.xlu0 %1012 }
 0x3e6   :  { %v1032_v13 = vmul.f32 %v4802_v1, %v1025_v6  ;;  %v1020_v14 = vmul.f32 %v4807_v5, %v1013_v12  ;;  %4110 = vmatpush3.bf16.msra.mxu0 %v1101_v0  ;;  %v4213_v0 = vld [vmem:[%s6418_s6 + $0x4] ss:$16 sps:$4 sm:$0xff]   ;;  %v4217_v12 = vld [vmem:[%s6418_s6 + $0x20] ss:$16 sps:$4 sm:$0xff]  }
 0x3e7   :  { %4111 = vmatprep.subr.bf16.mxu0 %v6437_v46  ;;  %v4219_v6 = vld [vmem:[%s6418_s6 + $0x24] ss:$16 sps:$4 sm:$0xff]  }
 0x3e8   :  { %v1102_v22 = vpack.c.bf16 %v1032_v13, %v1020_v14  ;;  %v4225_v13 = vld [vmem:[%s6418_s6 + $0x44] ss:$16 sps:$4 sm:$0xff]   ;;  %v4223_v14 = vld [vmem:[%s6418_s6 + $0x40] ss:$16 sps:$4 sm:$0xff]  }
 0x3e9   :  { %v1059_v23 = vpop.permute.xlu1 %1058  ;;  %v1047_v24 = vpop.permute.xlu0 %1046 }
 0x3ea   :  { %v1054_v26 = vmul.f32 %v4818_v21, %v1047_v24  ;;  %4112 = vmatpush3.bf16.msra.mxu0 %v1102_v22  ;;  %v1066_v36 = vmul.f32 %v4824_v27, %v1059_v23  ;;  %v4229_v22 = vld [vmem:[%s6418_s6 + $0x60] ss:$16 sps:$4 sm:$0xff]   ;;  %v4237_v23 = vld [vmem:[%s6418_s6 + $0x84] ss:$16 sps:$4 sm:$0xff]  }
 0x3eb   :  { %4113 = vmatprep.subr.bf16.mxu0 %v6437_v46  ;;  %v4235_v24 = vld [vmem:[%s6418_s6 + $0x80] ss:$16 sps:$4 sm:$0xff]  }
 0x3ec   :  { %v1103_v32 = vpack.c.bf16 %v1054_v26, %v1042_v25  ;;  %v4243_v25 = vld [vmem:[%s6418_s6 + $0xa4] ss:$16 sps:$4 sm:$0xff]   ;;  %v4241_v26 = vld [vmem:[%s6418_s6 + $0xa0] ss:$16 sps:$4 sm:$0xff]  }
 0x3ed   :  { %v1083_v33 = vpop.permute.xlu1 %1082  ;;  %v1071_v35 = vpop.permute.xlu0 %1070 }
 0x3ee   :  { %v1090_v37 = vmul.f32 %v4829_v28, %v1083_v33  ;;  %v1078_v38 = vmul.f32 %v4835_v31, %v1071_v35  ;;  %4114 = vmatpush3.bf16.msra.mxu0 %v1103_v32 }
 0x3ef   :  { %4115 = vmatprep.subr.bf16.mxu0 %v6437_v46 }
 0x3f0   :  { %v1104_v40 = vpack.c.bf16 %v1078_v38, %v1066_v36  ;;  %v1105_v41 = vpack.c.bf16 %v1090_v37, %v1090_v37 }
 0x3f2   :  { %4116 = vmatpush3.bf16.msra.mxu0 %v1104_v40  ;;  %v1129_v42 = vsel %vm512_vm8, %v1105_v41, 0 }
 0x3f3   :  { %4117 = vmatprep.subr.bf16.mxu0 %v6437_v46 }
 0x3f6   :  { %4118 = vmatpush3.bf16.msra.mxu0 %v1129_v42 }
 0x3f7   :  { %1599 = vmatprep.subr.bf16.mxu0 %v4213_v0 }
 0x3f9   :  { %4120 = vmatmul.mubr.msk.bf16.vlgmr.msra.gmra.mrb[8].mxu0 %vm508_vm9, %v4207_v43 }
 0x3fa   :  { %1631 = vmatprep.mubr.bf16.mxu0 %v6439_v4  ;;  %1600 = vmatpush1.bf16.msra.mxu0 %v4211_v63 }
 0x3fb   :  { %1601 = vmatprep.subr.bf16.mxu0 %v4219_v6 }
 0x3fe   :  { %v1113_v44 = vpop.permute.xlu0 %1112  ;;  %v1118_v47 = vpop.permute.xlu1 %1117  ;;  %1602 = vmatpush1.bf16.msra.mxu0 %v4217_v12 }
 0x3ff   :  { %1603 = vmatprep.subr.bf16.mxu0 %v4225_v13 }
 0x402   :  { %1604 = vmatpush1.bf16.msra.mxu0 %v4223_v14 }
 0x4cc   :  { %v1165_v45 = vpop.f32.mrb[8].mxu0 }
 0x4cd   :  { %v1166_v48 = vadd.f32 %v1165_v45, %v1113_v44  ;;  %v4121_v49 = vpop.f32.mrb[9].mxu0 }
 0x4ce   :  { %v1168_v50 = vpop.f32.mrb[10].mxu0 }
 0x4cf   :  { %v1172_v51 = vmul.f32 0.2, %v1166_v48  ;;  %v1169_v52 = vadd.f32 %v1168_v50, %v1118_v47  ;;  %v4122_v53 = vpop.f32.mrb[11].mxu0 }
 0x4d1   :  { %v1174_v54 = vmax.f32 %v1166_v48, %v1172_v51  ;;  %v1173_v55 = vmul.f32 0.2, %v1169_v52 }
 0x4d3   :  { %v1175_v56 = vmax.f32 %v1169_v52, %v1173_v55  ;;  %1177 = vrot.lane.b32.xlu0 %v1174_v54, %s4272_s26  ;;  %v4850_v57 = vmul.f32 %v3912_v15, %v1174_v54 }
 0x4d5   :  { %1179 = vrot.lane.b32.xlu1 %v1175_v56, %s4272_s26  ;;  %v4852_v58 = vmul.f32 %v3912_v15, %v1175_v56  ;;  %v4231_v15 = vld [vmem:[%s6418_s6 + $0x64] ss:$16 sps:$4 sm:$0xff]  }
 0x4d6   :  { %1605 = vmatprep.subr.bf16.mxu0 %v4231_v15 }
 0x4d7   :  { %1192 = vrot.lane.b32.xlu0 %v1174_v54, %s4271_s5  ;;  %v1329_v59 = vpack.c.bf16 %v4852_v58, %v4850_v57  ;;  %1606 = vmatpush1.bf16.msra.mxu0 %v4229_v22  ;;  %v4214_v22 = vld [vmem:[%s6418_s6 + $0x8] ss:$16 sps:$4 sm:$0xff]  }
 0x4d8   :  { %1607 = vmatprep.subr.bf16.mxu0 %v4237_v23  ;;  %v4220_v23 = vld [vmem:[%s6418_s6 + $0x28] ss:$16 sps:$4 sm:$0xff]  }
 0x4d9   :  { %1194 = vrot.lane.b32.xlu1 %v1175_v56, %s4271_s5 }
 0x4db   :  { %1207 = vrot.lane.b32.xlu0 %v1174_v54, %s4273_s27  ;;  %1608 = vmatpush1.bf16.msra.mxu0 %v4235_v24  ;;  %v4228_v24 = vld [vmem:[%s6418_s6 + $0x4c] ss:$16 sps:$4 sm:$0xff]  }
 0x4dc   :  { %1609 = vmatprep.subr.bf16.mxu0 %v4243_v25  ;;  %v4226_v25 = vld [vmem:[%s6418_s6 + $0x48] ss:$16 sps:$4 sm:$0xff]  }
 0x4dd   :  { %1209 = vrot.lane.b32.xlu1 %v1175_v56, %s4273_s27 }
 0x4df   :  { %1222 = vrot.lane.b32.xlu0 %v1174_v54, %s4264_s21  ;;  %1610 = vmatpush1.bf16.msra.mxu0 %v4241_v26  ;;  %v4234_v26 = vld [vmem:[%s6418_s6 + $0x6c] ss:$16 sps:$4 sm:$0xff]  }
 0x4e1   :  { %1224 = vrot.lane.b32.xlu1 %v1175_v56, %s4264_s21 }
 0x4e3   :  { %1248 = vrot.lane.b32.xlu0 %v1174_v54, %s4265_s22 }
 0x4e5   :  { %1250 = vrot.lane.b32.xlu1 %v1175_v56, %s4265_s22 }
 0x4e7   :  { %1263 = vrot.lane.b32.xlu0 %v1174_v54, %s4274_s7 }
 0x4e9   :  { %1265 = vrot.lane.b32.xlu1 %v1175_v56, %s4274_s7 }
 0x4eb   :  { %1278 = vrot.lane.b32.xlu0 %v1174_v54, %s4277_s0 }
 0x4ed   :  { %1280 = vrot.lane.b32.xlu1 %v1175_v56, %s4277_s0  ;;  %s6481_s0 = smov 16  }
 0x4ef   :  { %1293 = vrot.lane.b32.xlu0 %v1174_v54, %s4276_s28 }
 0x4f1   :  { %1295 = vrot.lane.b32.xlu1 %v1175_v56, %s4276_s28  ;;  %s6483_s28 = smov 113  }
 0x4f3   :  { %1340 = vperm.xlu0 %4163, %v1336_v62  }
 0x4f5   :  { %1345 = vperm.xlu1 %4174, %v1337_v2  }
 0x4f7   :  { %1747 = vrot.lane.b32.xlu0 %v4626_v30, %s4261_s29 }
 0x4f9   :  { %1749 = vrot.lane.b32.xlu1 %v4635_v34, %s4261_s29 }
 0x4fb   :  { %1751 = vrot.lane.b32.xlu0 %v4624_v29, %s4261_s29 }
 0x4fd   :  { %1753 = vrot.lane.b32.xlu1 %v4651_v39, %s4261_s29 }
 0x4ff   :  { %1829 = vrot.lane.b32.xlu0 %v4626_v30, %s6481_s0 }
 0x501   :  { %1831 = vrot.lane.b32.xlu1 %v4635_v34, %s6481_s0 }
 0x503   :  { %1833 = vrot.lane.b32.xlu0 %v4624_v29, %s6481_s0 }
 0x505   :  { %1835 = vrot.lane.b32.xlu1 %v4651_v39, %s6481_s0 }
 0x507   :  { %1911 = vrot.lane.b32.xlu0 %v4626_v30, %s6482_s12 }
 0x509   :  { %1913 = vrot.lane.b32.xlu1 %v4635_v34, %s6482_s12 }
 0x50b   :  { %1915 = vrot.lane.b32.xlu0 %v4624_v29, %s6482_s12 }
 0x50d   :  { %1917 = vrot.lane.b32.xlu1 %v4651_v39, %s6482_s12 }
 0x50f   :  { %1993 = vrot.lane.b32.xlu0 %v4626_v30, %s4264_s21 }
 0x511   :  { %1995 = vrot.lane.b32.xlu1 %v4635_v34, %s4264_s21 }
 0x513   :  { %1997 = vrot.lane.b32.xlu0 %v4624_v29, %s4264_s21 }
 0x515   :  { %1999 = vrot.lane.b32.xlu1 %v4651_v39, %s4264_s21 }
 0x517   :  { %2191 = vrot.lane.b32.xlu0 %v4626_v30, %s6483_s28 }
 0x519   :  { %2193 = vrot.lane.b32.xlu1 %v4635_v34, %s6483_s28 }
 0x51b   :  { %2195 = vrot.lane.b32.xlu0 %v4624_v29, %s6483_s28 }
 0x51d   :  { %2197 = vrot.lane.b32.xlu1 %v4651_v39, %s6483_s28 }
 0x51f   :  { %2273 = vrot.lane.b32.xlu0 %v4626_v30, %s6484_s23 }
 0x521   :  { %2275 = vrot.lane.b32.xlu1 %v4635_v34, %s6484_s23 }
 0x523   :  { %2277 = vrot.lane.b32.xlu0 %v4624_v29, %s6484_s23 }
 0x525   :  { %2279 = vrot.lane.b32.xlu1 %v4651_v39, %s6484_s23 }
 0x545   :  { %v1178_v32 = vpop.permute.xlu0 %1177 }
 0x546   :  { %v1187_v35 = vmul.f32 %v4795_v61, %v1178_v32  ;;  %v4232_v32 = vld [vmem:[%s6418_s6 + $0x68] ss:$16 sps:$4 sm:$0xff]  }
 0x547   :  { %v1180_v33 = vpop.permute.xlu1 %1179 }
 0x548   :  { %v1188_v36 = vmul.f32 %v4795_v61, %v1180_v33  ;;  %v4240_v33 = vld [vmem:[%s6418_s6 + $0x8c] ss:$16 sps:$4 sm:$0xff]  }
 0x549   :  { %v1193_v37 = vpop.permute.xlu0 %1192 }
 0x54a   :  { %v1325_v38 = vpack.c.bf16 %v1188_v36, %v1187_v35  ;;  %v1202_v41 = vmul.f32 %v4790_v60, %v1193_v37  ;;  %v4238_v35 = vld [vmem:[%s6418_s6 + $0x88] ss:$16 sps:$4 sm:$0xff]   ;;  %v4246_v36 = vld [vmem:[%s6418_s6 + $0xac] ss:$16 sps:$4 sm:$0xff]  }
 0x54b   :  { %v1195_v40 = vpop.permute.xlu1 %1194  ;;  %v4244_v37 = vld [vmem:[%s6418_s6 + $0xa8] ss:$16 sps:$4 sm:$0xff]  }
 0x54c   :  { %v1203_v42 = vmul.f32 %v4790_v60, %v1195_v40  ;;  %1362 = vmatpush1.bf16.msra.mxu1 %v1325_v38  ;;  %v4249_v38 = vld [vmem:[%s6418_s6 + $0xc4] ss:$16 sps:$4 sm:$0xff]   ;;  %v4252_v40 = vld [vmem:[%s6418_s6 + $0xcc] ss:$16 sps:$4 sm:$0xff]  }
 0x54d   :  { %v1208_v43 = vpop.permute.xlu0 %1207  ;;  %1363 = vmatprep.subr.bf16.mxu1 %v6439_v4  ;;  %1611 = vmatprep.subr.bf16.mxu0 %v4249_v38 }
 0x54e   :  { %v1326_v44 = vpack.c.bf16 %v1203_v42, %v1202_v41  ;;  %v1217_v47 = vmul.f32 %v4807_v5, %v1208_v43  ;;  %v4247_v41 = vld [vmem:[%s6418_s6 + $0xc0] ss:$16 sps:$4 sm:$0xff]   ;;  %v4250_v42 = vld [vmem:[%s6418_s6 + $0xc8] ss:$16 sps:$4 sm:$0xff]   ;;  %v4255_v43 = vld [vmem:[%s6418_s6 + $0xe4] ss:$16 sps:$4 sm:$0xff]  }
 0x54f   :  { %v1210_v45 = vpop.permute.xlu1 %1209  ;;  %1612 = vmatpush1.bf16.msra.mxu0 %v4247_v41 }
 0x550   :  { %v1218_v48 = vmul.f32 %v4807_v5, %v1210_v45  ;;  %1364 = vmatpush1.bf16.msra.mxu1 %v1326_v44  ;;  %v4258_v44 = vld [vmem:[%s6418_s6 + $0xec] ss:$16 sps:$4 sm:$0xff]   ;;  %v4253_v45 = vld [vmem:[%s6418_s6 + $0xe0] ss:$16 sps:$4 sm:$0xff]   ;;  %1613 = vmatprep.subr.bf16.mxu0 %v4255_v43 }
 0x551   :  { %v1223_v49 = vpop.permute.xlu0 %1222  ;;  %1365 = vmatprep.subr.bf16.mxu1 %v6439_v4 }
 0x552   :  { %v1327_v61 = vpack.c.bf16 %v1218_v48, %v1217_v47  ;;  %v1232_v51 = vmul.f32 %v4802_v1, %v1223_v49  ;;  %v4256_v47 = vld [vmem:[%s6418_s6 + $0xe8] ss:$16 sps:$4 sm:$0xff]  }
 0x553   :  { %v1225_v50 = vpop.permute.xlu1 %1224  ;;  %1614 = vmatpush1.bf16.msra.mxu0 %v4253_v45 }
 0x554   :  { %v1233_v60 = vmul.f32 %v4802_v1, %v1225_v50  ;;  %1366 = vmatpush1.bf16.msra.mxu1 %v1327_v61 }
 0x555   :  { %v1249_v52 = vpop.permute.xlu0 %1248  ;;  %1367 = vmatprep.subr.bf16.mxu1 %v6439_v4 }
 0x556   :  { %v1328_v53 = vpack.c.bf16 %v1233_v60, %v1232_v51  ;;  %v1258_v3 = vmul.f32 %v4818_v21, %v1249_v52 }
 0x557   :  { %v1251_v54 = vpop.permute.xlu1 %1250 }
 0x558   :  { %1368 = vmatpush1.bf16.msra.mxu1 %v1328_v53  ;;  %v1259_v5 = vmul.f32 %v4818_v21, %v1251_v54 }
 0x559   :  { %v1264_v55 = vpop.permute.xlu0 %1263  ;;  %1369 = vmatprep.subr.bf16.mxu1 %v6439_v4 }
 0x55a   :  { %v1330_v1 = vpack.c.bf16 %v1259_v5, %v1258_v3  ;;  %v1273_v0 = vmul.f32 %v4824_v27, %v1264_v55 }
 0x55b   :  { %v1266_v56 = vpop.permute.xlu1 %1265 }
 0x55c   :  { %1370 = vmatpush1.bf16.msra.mxu1 %v1329_v59  ;;  %v1274_v62 = vmul.f32 %v4824_v27, %v1266_v56  ;;  %v4216_v27 = vld [vmem:[%s6418_s6 + $0xc] ss:$16 sps:$4 sm:$0xff]  }
 0x55d   :  { %1371 = vmatprep.subr.bf16.mxu1 %v6439_v4  ;;  %v1279_v2 = vpop.permute.xlu0 %1278 }
 0x55e   :  { %v1331_v6 = vpack.c.bf16 %v1274_v62, %v1273_v0  ;;  %v1288_v13 = vmul.f32 %v4835_v31, %v1279_v2 }
 0x55f   :  { %v1281_v63 = vpop.permute.xlu1 %1280 }
 0x560   :  { %1372 = vmatpush1.bf16.msra.mxu1 %v1330_v1  ;;  %v1289_v12 = vmul.f32 %v4835_v31, %v1281_v63  ;;  %v4210_v31 = vld [vmem:[%s6416_s11] ss:$8 sps:$4 sm:$0xff]   ;;  %v3978_v1 = vld [vmem:[%s6410_s3 + $0x10] sm:$0xf] }
 0x561   :  { %1373 = vmatprep.subr.bf16.mxu1 %v6439_v4  ;;  %v1294_v57 = vpop.permute.xlu0 %1293 }
 0x562   :  { %v1332_v58 = vpack.c.bf16 %v1289_v12, %v1288_v13  ;;  %v1303_v14 = vmul.f32 %v4829_v28, %v1294_v57  ;;  %v5068_v12 = vrot.slane %v3978_v1, %v4481_v18  ;;  %v5077_v57 = vrot.slane %v3978_v1, %v4465_v11 }
 0x563   :  { %v1296_v21 = vpop.permute.xlu1 %1295 }
 0x564   :  { %1374 = vmatpush1.bf16.msra.mxu1 %v1331_v6  ;;  %v1304_v59 = vmul.f32 %v4829_v28, %v1296_v21  ;;  %v4222_v28 = vld [vmem:[%s6418_s6 + $0x2c] ss:$16 sps:$4 sm:$0xff]   ;;  %v5065_v6 = vrot.slane %v3978_v1, %v4475_v16 }
 0x565   :  { %1375 = vmatprep.subr.bf16.mxu1 %v6439_v4 }
 0x566   :  { %v1333_v15 = vpack.c.bf16 %v1304_v59, %v1303_v14 }
 0x568   :  { %1376 = vmatpush1.bf16.msra.mxu1 %v1332_v58  ;;  %v5080_v58 = vrot.slane %v3978_v1, %v4478_v17 }
 0x569   :  { %1377 = vmatprep.subr.bf16.mxu1 %v6439_v4 }
 0x56c   :  { %1378 = vmatpush1.bf16.msra.mxu1 %v1333_v15 }
 0x56d   :  { %1642 = vmatprep.subr.bf16.mxu1 %v4216_v27 }
 0x56f   :  { %1394 = vmatmul.mubr.bf16.vlgmr.msra.gmra.mrb[8].mxu1 %v4210_v31 }
 0x570   :  { %1643 = vmatpush1.bf16.msra.mxu1 %v4214_v22  ;;  %1674 = vmatprep.mubr.bf16.mxu1 %v6439_v4 }
 0x571   :  { %1644 = vmatprep.subr.bf16.mxu1 %v4222_v28 }
 0x572   :  { %v1341_v48 = vpop.permute.xlu0 %1340 }
 0x574   :  { %1645 = vmatpush1.bf16.msra.mxu1 %v4220_v23  ;;  %v1346_v51 = vpop.permute.xlu1 %1345 }
 0x575   :  { %1646 = vmatprep.subr.bf16.mxu1 %v4228_v24 }
 0x578   :  { %1647 = vmatpush1.bf16.msra.mxu1 %v4226_v25 }
 0x579   :  { %1648 = vmatprep.subr.bf16.mxu1 %v4234_v26 }
 0x57c   :  { %1649 = vmatpush1.bf16.msra.mxu1 %v4232_v32 }
 0x57d   :  { %1650 = vmatprep.subr.bf16.mxu1 %v4240_v33 }
 0x580   :  { %1651 = vmatpush1.bf16.msra.mxu1 %v4238_v35 }
 0x581   :  { %1652 = vmatprep.subr.bf16.mxu1 %v4246_v36  ;;  %v5160_v36 = vpop.permute.xlu0 %1747 }
 0x584   :  { %1653 = vmatpush1.bf16.msra.mxu1 %v4244_v37  ;;  %v5164_v37 = vpop.permute.xlu1 %1749 }
 0x585   :  { %1654 = vmatprep.subr.bf16.mxu1 %v4252_v40  ;;  %v5171_v38 = vpop.permute.xlu0 %1751 }
 0x588   :  { %1655 = vmatpush1.bf16.msra.mxu1 %v4250_v42  ;;  %v5173_v40 = vpop.permute.xlu1 %1753 }
 0x589   :  { %1656 = vmatprep.subr.bf16.mxu1 %v4258_v44  ;;  %v5179_v41 = vpop.permute.xlu0 %1829 }
 0x58c   :  { %1657 = vmatpush1.bf16.msra.mxu1 %v4256_v47  ;;  %v5182_v42 = vpop.permute.xlu1 %1831 }
 0x58d   :  { %v5190_v43 = vpop.permute.xlu0 %1833 }
 0x590   :  { %v5192_v44 = vpop.permute.xlu1 %1835 }
 0x591   :  { %v5198_v45 = vpop.permute.xlu0 %1911 }
 0x594   :  { %v5202_v47 = vpop.permute.xlu1 %1913 }
 0x642   :  { %v1395_v49 = vpop.f32.mrb[8].mxu1 }
 0x643   :  { %v1396_v61 = vadd.f32 %v1395_v49, %v1341_v48  ;;  %v1397_v50 = vpop.f32.mrb[9].mxu1  ;;  %v5210_v48 = vpop.permute.xlu0 %1915 }
 0x644   :  { %v1398_v60 = vpop.f32.mrb[10].mxu1  ;;  %v5212_v49 = vpop.permute.xlu1 %1917 }
 0x645   :  { %v1402_v52 = vmul.f32 0.2, %v1396_v61  ;;  %v1399_v53 = vadd.f32 %v1398_v60, %v1346_v51  ;;  %v1400_v54 = vpop.f32.mrb[11].mxu1 }
 0x647   :  { %v1403_v55 = vmul.f32 0.2, %v1399_v53  ;;  %v1404_v5 = vmax.f32 %v1396_v61, %v1402_v52  ;;  %v5218_v61 = vpop.permute.xlu0 %1993 }
 0x648   :  { %6494 = vst [vmem:[#allocation12_spill] sm:$0xff] %v5218_v61  ;;  %v5222_v50 = vpop.permute.xlu1 %1995 }
 0x649   :  { %v1405_v56 = vmax.f32 %v1399_v53, %v1403_v55  ;;  %6495 = vst [vmem:[#allocation13_spill] sm:$0xff] %v5222_v50 }
 0x64b   :  { %v1406_v3 = vpack.c.bf16 %v1405_v56, %v1404_v5  ;;  %v5230_v51 = vpop.permute.xlu0 %1997 }
 0x64c   :  { %6496 = vst [vmem:[#allocation14_spill] sm:$0xff] %v5230_v51  ;;  %v5232_v60 = vpop.permute.xlu1 %1999 }
 0x64d   :  { %1632 = vmatmul.mubr.bf16.vlgmr.msra.gmra.mrb[12].mxu0 %v1406_v3  ;;  %1675 = vmatmul.mubr.bf16.vlgmr.msra.gmra.mrb[12].mxu1 %v1406_v3  ;;  %6497 = vst [vmem:[#allocation15_spill] sm:$0xff] %v5232_v60 }
 0x64f   :  { %v5238_v52 = vpop.permute.xlu0 %2191 }
 0x650   :  { %6498 = vst [vmem:[#allocation16_spill] sm:$0xff] %v5238_v52  ;;  %v5242_v53 = vpop.permute.xlu1 %2193  ;;  %v5435_v52 = vmul.f32 %v5077_v57, %v4635_v34 }
 0x651   :  { %6499 = vst [vmem:[#allocation17_spill] sm:$0xff] %v5242_v53  ;;  %v1755_v53 = vsel %vm72_vm0, %v5171_v38, %v5173_v40 }
 0x652   :  { %6531 = vst [vmem:[#allocation49_spill] sm:$0xff] %v5435_v52 }
 0x653   :  { %v5250_v54 = vpop.permute.xlu0 %2195 }
 0x654   :  { %6500 = vst [vmem:[#allocation18_spill] sm:$0xff] %v5250_v54  ;;  %v5252_v55 = vpop.permute.xlu1 %2197  ;;  %v5423_v54 = vmul.f32 %v5068_v12, %v4624_v29 }
 0x655   :  { %6501 = vst [vmem:[#allocation19_spill] sm:$0xff] %v5252_v55 }
 0x656   :  { %6528 = vst [vmem:[#allocation46_spill] sm:$0xff] %v5423_v54 }
 0x657   :  { %v5258_v5 = vpop.permute.xlu0 %2273 }
 0x658   :  { %6502 = vst [vmem:[#allocation20_spill] sm:$0xff] %v5258_v5  ;;  %v5262_v56 = vpop.permute.xlu1 %2275 }
 0x659   :  { %6503 = vst [vmem:[#allocation21_spill] sm:$0xff] %v5262_v56 }
 0x65b   :  { %v5270_v3 = vpop.permute.xlu0 %2277 }
 0x65c   :  { %6504 = vst [vmem:[#allocation22_spill] sm:$0xff] %v5270_v3  ;;  %v5272_v1 = vpop.permute.xlu1 %2279 }
 0x65d   :  { %6505 = vst [vmem:[#allocation23_spill] sm:$0xff] %v5272_v1 }
 0x720   :  { %v1633_v62 = vpop.f32.mrb[12].mxu0  ;;  %v5057_v2 = vpop.f32.mrb[12].mxu1 }
 0x721   :  { %v5059_v63 = vpop.f32.mrb[13].mxu1  ;;  %1686 = vrot.lane.b32.xlu0 %v1633_v62, %s4261_s29  ;;  %v5062_v0 = vpop.f32.mrb[13].mxu0  ;;  %v5087_v27 = vmul.f32 %v5065_v6, %v1633_v62  ;;  %v5095_v31 = vmul.f32 %v5068_v12, %v5057_v2 }
 0x722   :  { %v5070_v21 = vpop.f32.mrb[14].mxu1  ;;  %1772 = vrot.lane.b32.xlu1 %v5062_v0, %s6481_s0  ;;  %v5074_v13 = vpop.f32.mrb[14].mxu0  ;;  %v5103_v28 = vmul.f32 %v5077_v57, %v5062_v0  ;;  %v5111_v24 = vmul.f32 %v5080_v58, %v5059_v63 }
 0x723   :  { %v5082_v59 = vpop.f32.mrb[15].mxu0  ;;  %v5084_v14 = vpop.f32.mrb[15].mxu1  ;;  %6485 = vst [vmem:[#allocation4_spill] sm:$0xff] %v5087_v27  ;;  %v5091_v15 = vmul.f32 %v5065_v6, %v5074_v13  ;;  %6487 = vst [vmem:[#allocation6_spill] sm:$0xff] %v5095_v31  ;;  %v5099_v22 = vmul.f32 %v5068_v12, %v5070_v21 }
 0x724   :  { %6489 = vst [vmem:[#allocation8_spill] sm:$0xff] %v5103_v28  ;;  %v5107_v23 = vmul.f32 %v5077_v57, %v5082_v59  ;;  %6491 = vst [vmem:[#allocation10_spill] sm:$0xff] %v5111_v24  ;;  %v5115_v25 = vmul.f32 %v5080_v58, %v5084_v14 }
 0x725   :  { %6486 = vst [vmem:[#allocation5_spill] sm:$0xff] %v5091_v15  ;;  %6488 = vst [vmem:[#allocation7_spill] sm:$0xff] %v5099_v22  ;;  %1694 = vrot.lane.b32.xlu0 %v5057_v2, %s4261_s29 }
 0x726   :  { %6490 = vst [vmem:[#allocation9_spill] sm:$0xff] %v5107_v23  ;;  %6492 = vst [vmem:[#allocation11_spill] sm:$0xff] %v5115_v25  ;;  %1780 = vrot.lane.b32.xlu1 %v5059_v63, %s6481_s0 }
 0x729   :  { %1768 = vrot.lane.b32.xlu0 %v1633_v62, %s6481_s0 }
 0x72a   :  { %1936 = vrot.lane.b32.xlu1 %v5062_v0, %s4264_s21 }
 0x72d   :  { %1776 = vrot.lane.b32.xlu0 %v5057_v2, %s6481_s0 }
 0x72e   :  { %1944 = vrot.lane.b32.xlu1 %v5059_v63, %s4264_s21 }
 0x731   :  { %1850 = vrot.lane.b32.xlu0 %v1633_v62, %s6482_s12 }
 0x732   :  { %2064 = vrot.lane.b32.xlu1 %v5062_v0, %s4265_s22 }
 0x735   :  { %1858 = vrot.lane.b32.xlu0 %v5057_v2, %s6482_s12 }
 0x736   :  { %2072 = vrot.lane.b32.xlu1 %v5059_v63, %s4265_s22 }
 0x739   :  { %1932 = vrot.lane.b32.xlu0 %v1633_v62, %s4264_s21 }
 0x73a   :  { %2216 = vrot.lane.b32.xlu1 %v5062_v0, %s6484_s23 }
 0x73d   :  { %1940 = vrot.lane.b32.xlu0 %v5057_v2, %s4264_s21 }
 0x73e   :  { %2224 = vrot.lane.b32.xlu1 %v5059_v63, %s6484_s23 }
 0x741   :  { %2060 = vrot.lane.b32.xlu0 %v1633_v62, %s4265_s22 }
 0x742   :  { %1688 = vrot.lane.b32.xlu1 %v5074_v13, %s4261_s29 }
 0x745   :  { %2068 = vrot.lane.b32.xlu0 %v5057_v2, %s4265_s22 }
 0x746   :  { %1696 = vrot.lane.b32.xlu1 %v5070_v21, %s4261_s29 }
 0x749   :  { %2130 = vrot.lane.b32.xlu0 %v1633_v62, %s6483_s28 }
 0x74a   :  { %1852 = vrot.lane.b32.xlu1 %v5074_v13, %s6482_s12 }
 0x74d   :  { %2138 = vrot.lane.b32.xlu0 %v5057_v2, %s6483_s28 }
 0x74e   :  { %1860 = vrot.lane.b32.xlu1 %v5070_v21, %s6482_s12 }
 0x751   :  { %2212 = vrot.lane.b32.xlu0 %v1633_v62, %s6484_s23 }
 0x752   :  { %2132 = vrot.lane.b32.xlu1 %v5074_v13, %s6483_s28 }
 0x755   :  { %2220 = vrot.lane.b32.xlu0 %v5057_v2, %s6484_s23 }
 0x756   :  { %2140 = vrot.lane.b32.xlu1 %v5070_v21, %s6483_s28 }
 0x759   :  { %2294 = vrot.lane.b32.xlu0 %v1633_v62, %s6493_s9 }
 0x75a   :  { %2357 = vrot.lane.b32.xlu1 %v4635_v34, %s6493_s9 }
 0x75d   :  { %1690 = vrot.lane.b32.xlu0 %v5062_v0, %s4261_s29 }
 0x75e   :  { %2296 = vrot.lane.b32.xlu1 %v5074_v13, %s6493_s9 }
 0x761   :  { %1698 = vrot.lane.b32.xlu0 %v5059_v63, %s4261_s29 }
 0x762   :  { %2304 = vrot.lane.b32.xlu1 %v5070_v21, %s6493_s9 }
 0x765   :  { %1854 = vrot.lane.b32.xlu0 %v5062_v0, %s6482_s12 }
 0x766   :  { %1692 = vrot.lane.b32.xlu1 %v5082_v59, %s4261_s29 }
 0x769   :  { %1862 = vrot.lane.b32.xlu0 %v5059_v63, %s6482_s12 }
 0x76a   :  { %1700 = vrot.lane.b32.xlu1 %v5084_v14, %s4261_s29 }
 0x76d   :  { %2134 = vrot.lane.b32.xlu0 %v5062_v0, %s6483_s28 }
 0x76e   :  { %1774 = vrot.lane.b32.xlu1 %v5082_v59, %s6481_s0 }
 0x771   :  { %2142 = vrot.lane.b32.xlu0 %v5059_v63, %s6483_s28 }
 0x772   :  { %1782 = vrot.lane.b32.xlu1 %v5084_v14, %s6481_s0 }
 0x775   :  { %1770 = vrot.lane.b32.xlu0 %v5074_v13, %s6481_s0 }
 0x776   :  { %1856 = vrot.lane.b32.xlu1 %v5082_v59, %s6482_s12 }
 0x779   :  { %1778 = vrot.lane.b32.xlu0 %v5070_v21, %s6481_s0 }
 0x77a   :  { %1864 = vrot.lane.b32.xlu1 %v5084_v14, %s6482_s12 }
 0x77d   :  { %2298 = vrot.lane.b32.xlu0 %v5062_v0, %s6493_s9 }
 0x77e   :  { %1938 = vrot.lane.b32.xlu1 %v5082_v59, %s4264_s21 }
 0x781   :  { %1934 = vrot.lane.b32.xlu0 %v5074_v13, %s4264_s21 }
 0x782   :  { %1946 = vrot.lane.b32.xlu1 %v5084_v14, %s4264_s21 }
 0x785   :  { %1942 = vrot.lane.b32.xlu0 %v5070_v21, %s4264_s21 }
 0x786   :  { %2066 = vrot.lane.b32.xlu1 %v5082_v59, %s4265_s22 }
 0x789   :  { %2302 = vrot.lane.b32.xlu0 %v5057_v2, %s6493_s9 }
 0x78a   :  { %2074 = vrot.lane.b32.xlu1 %v5084_v14, %s4265_s22 }
 0x78d   :  { %2062 = vrot.lane.b32.xlu0 %v5074_v13, %s4265_s22 }
 0x78e   :  { %2136 = vrot.lane.b32.xlu1 %v5082_v59, %s6483_s28 }
 0x791   :  { %2070 = vrot.lane.b32.xlu0 %v5070_v21, %s4265_s22 }
 0x792   :  { %2144 = vrot.lane.b32.xlu1 %v5084_v14, %s6483_s28 }
 0x793   :  { %v5278_v62 = vpop.permute.xlu0 %1686 }
 0x794   :  { %v5280_v2 = vpop.permute.xlu1 %1772 }
 0x795   :  { %2306 = vrot.lane.b32.xlu0 %v5059_v63, %s6493_s9  ;;  %v5301_v63 = vld [vmem:[%s6419_s13] sm:$0xff] }
 0x796   :  { %2218 = vrot.lane.b32.xlu1 %v5082_v59, %s6484_s23  ;;  %6506 = vst [vmem:[#allocation24_spill] sm:$0xff] %v5301_v63 }
 0x797   :  { %v5286_v0 = vpop.permute.xlu0 %1694 }
 0x798   :  { %v5288_v46 = vpop.permute.xlu1 %1780 }
 0x799   :  { %2214 = vrot.lane.b32.xlu0 %v5074_v13, %s6484_s23  ;;  %v3984_v13 = vcombine.high %v5301_v63, %v5301_v63 }
 0x79a   :  { %2226 = vrot.lane.b32.xlu1 %v5084_v14, %s6484_s23 }
 0x79b   :  { %v5294_v4 = vpop.permute.xlu0 %1768  ;;  %3986 = vmatprep.mubr.msk.bf16.mxu0 %vm2552_vm12, %v3984_v13  ;;  %3988 = vmatprep.mubr.msk.bf16.mxu1 %vm2552_vm12, %v3984_v13 }
 0x79c   :  { %v1937_v32 = vpop.permute.xlu1 %1936 }
 0x79d   :  { %2222 = vrot.lane.b32.xlu0 %v5070_v21, %s6484_s23 }
 0x79e   :  { %2300 = vrot.lane.b32.xlu1 %v5082_v59, %s6493_s9  ;;  %v2540_v59 = vld [vmem:[%s6420_s14] sm:$0xff] }
 0x79f   :  { %v5307_v35 = vpop.permute.xlu0 %1776 }
 0x7a0   :  { %v1945_v26 = vpop.permute.xlu1 %1944 }
 0x7a1   :  { %2355 = vrot.lane.b32.xlu0 %v4626_v30, %s6493_s9 }
 0x7a2   :  { %2308 = vrot.lane.b32.xlu1 %v5084_v14, %s6493_s9 }
 0x7a3   :  { %v5313_v21 = vpop.permute.xlu0 %1850 }
 0x7a4   :  { %v2065_v33 = vpop.permute.xlu1 %2064 }
 0x7a5   :  { %2359 = vrot.lane.b32.xlu0 %v4624_v29, %s6493_s9 }
 0x7a6   :  { %2361 = vrot.lane.b32.xlu1 %v4651_v39, %s6493_s9 }
 0x7a7   :  { %v5322_v13 = vpop.permute.xlu0 %1858 }
 0x7a8   :  { %v2073_v7 = vpop.permute.xlu1 %2072 }
 0x7a9   :  { %2543 = vperm.xlu0 %4163, %v2540_v59  }
 0x7ab   :  { %v1933_v63 = vpop.permute.xlu0 %1932 }
 0x7ac   :  { %v5326_v14 = vsel %vm204_vm3, %v1933_v63, %v1937_v32  ;;  %v5330_v1 = vsel %vm204_vm3, %v1945_v26, %v1933_v63  ;;  %v2217_v3 = vpop.permute.xlu1 %2216 }
 0x7af   :  { %v1941_v31 = vpop.permute.xlu0 %1940 }
 0x7b0   :  { %v5334_v22 = vsel %vm204_vm3, %v1941_v31, %v1945_v26  ;;  %v5338_v24 = vsel %vm204_vm3, %v1937_v32, %v1941_v31  ;;  %v2225_v59 = vpop.permute.xlu1 %2224 }
 0x7b1   :  { %6507 = vst [vmem:[#allocation25_spill] sm:$0xff] %v5334_v22  ;;  %6508 = vst [vmem:[#allocation26_spill] sm:$0xff] %v5338_v24  ;;  %v1786_v24 = vsel %vm116_vm1, %v5280_v2, %v5307_v35 }
 0x7b3   :  { %v2061_v25 = vpop.permute.xlu0 %2060 }
 0x7b4   :  { %v5342_v5 = vsel %vm279_vm4, %v2061_v25, %v2065_v33  ;;  %v5346_v63 = vsel %vm279_vm4, %v2073_v7, %v2061_v25  ;;  %v5348_v56 = vpop.permute.xlu1 %1688 }
 0x7b5   :  { %6509 = vst [vmem:[#allocation27_spill] sm:$0xff] %v5342_v5  ;;  %6510 = vst [vmem:[#allocation28_spill] sm:$0xff] %v5346_v63 }
 0x7b7   :  { %v2069_v27 = vpop.permute.xlu0 %2068 }
 0x7b8   :  { %v5352_v26 = vsel %vm279_vm4, %v2069_v27, %v2073_v7  ;;  %v5356_v31 = vsel %vm279_vm4, %v2065_v33, %v2069_v27  ;;  %v5358_v32 = vpop.permute.xlu1 %1696 }
 0x7b9   :  { %6511 = vst [vmem:[#allocation29_spill] sm:$0xff] %v5352_v26  ;;  %6512 = vst [vmem:[#allocation30_spill] sm:$0xff] %v5356_v31 }
 0x7bb   :  { %v5360_v15 = vpop.permute.xlu0 %2130 }
 0x7bc   :  { %6513 = vst [vmem:[#allocation31_spill] sm:$0xff] %v5360_v15  ;;  %v5362_v5 = vpop.permute.xlu1 %1852 }
 0x7bf   :  { %v5364_v55 = vpop.permute.xlu0 %2138 }
 0x7c0   :  { %6514 = vst [vmem:[#allocation32_spill] sm:$0xff] %v5364_v55  ;;  %v5366_v25 = vpop.permute.xlu1 %1860 }
 0x7c3   :  { %v2213_v63 = vpop.permute.xlu0 %2212 }
 0x7c4   :  { %v5370_v28 = vsel %vm367_vm5, %v2213_v63, %v2217_v3  ;;  %v5374_v7 = vsel %vm367_vm5, %v2225_v59, %v2213_v63  ;;  %v5376_v27 = vpop.permute.xlu1 %2132  ;;  %v3979_v63 = vld [vmem:[%s6410_s3 + $0x14] sm:$0xf] }
 0x7c5   :  { %6515 = vst [vmem:[#allocation33_spill] sm:$0xff] %v5370_v28  ;;  %6516 = vst [vmem:[#allocation34_spill] sm:$0xff] %v5374_v7 }
 0x7c6   :  { %6517 = vst [vmem:[#allocation35_spill] sm:$0xff] %v5376_v27 }
 0x7c7   :  { %v2221_v33 = vpop.permute.xlu0 %2220 }
 0x7c8   :  { %v5380_v15 = vsel %vm367_vm5, %v2221_v33, %v2225_v59  ;;  %v5384_v55 = vsel %vm367_vm5, %v2217_v3, %v2221_v33  ;;  %v5386_v26 = vpop.permute.xlu1 %2140  ;;  %v5398_v59 = vrot.slane %v3979_v63, %v4475_v16  ;;  %v1685_v33 = vld [vmem:[%s6410_s3] sm:$0xf] }
 0x7c9   :  { %6518 = vst [vmem:[#allocation36_spill] sm:$0xff] %v5380_v15  ;;  %6519 = vst [vmem:[#allocation37_spill] sm:$0xff] %v5384_v55  ;;  %v5401_v15 = vrot.slane %v3979_v63, %v4465_v11  ;;  %v5412_v55 = vrot.slane %v3979_v63, %v4478_v17  ;;  %v1722_v29 = vrot.slane %v1685_v33, %v4481_v18 }
 0x7ca   :  { %6520 = vst [vmem:[#allocation38_spill] sm:$0xff] %v5386_v26  ;;  %6524 = vst [vmem:[#allocation42_spill] sm:$0xff] %v5398_v59  ;;  %v5419_v26 = vmul.f32 %v5065_v6, %v4626_v30  ;;  %v5439_v30 = vmul.f32 %v5080_v58, %v4651_v39  ;;  %v1718_v6 = vrot.slane %v1685_v33, %v4465_v11 }
 0x7cb   :  { %v5388_v23 = vpop.permute.xlu0 %2294  ;;  %6525 = vst [vmem:[#allocation43_spill] sm:$0xff] %v5401_v15  ;;  %v1714_v12 = vrot.slane %v1685_v33, %v4475_v16 }
 0x7cc   :  { %6521 = vst [vmem:[#allocation39_spill] sm:$0xff] %v5388_v23  ;;  %v5390_v28 = vpop.permute.xlu1 %2357  ;;  %6527 = vst [vmem:[#allocation45_spill] sm:$0xff] %v5419_v26  ;;  %v1784_v26 = vsel %vm116_vm1, %v5307_v35, %v5288_v46 }
 0x7cd   :  { %6522 = vst [vmem:[#allocation40_spill] sm:$0xff] %v5390_v28  ;;  %v5409_v28 = vrot.slane %v3979_v63, %v4481_v18  ;;  %v5431_v63 = vmul.f32 %v5401_v15, %v4738_v8  ;;  %6532 = vst [vmem:[#allocation50_spill] sm:$0xff] %v5439_v30  ;;  %v1790_v15 = vsel %vm116_vm1, %v5288_v46, %v5294_v4 }
 0x7cf   :  { %v1691_v7 = vpop.permute.xlu0 %1690  ;;  %6530 = vst [vmem:[#allocation48_spill] sm:$0xff] %v5431_v63  ;;  %v1757_v63 = vsel %vm72_vm0, %v5160_v36, %v5164_v37 }
 0x7d0   :  { %v5395_v27 = vpop.permute.xlu1 %2296  ;;  %v1760_v22 = vmul.f32 %v1757_v63, %v1718_v6 }
 0x7d1   :  { %6523 = vst [vmem:[#allocation41_spill] sm:$0xff] %v5395_v27  ;;  %v3975_v27 = vld [vmem:[%s6410_s3 + $0x4] sm:$0xf] }
 0x7d2   :  { %v5451_v34 = vrot.slane %v3975_v27, %v4465_v11  ;;  %v5454_v39 = vrot.slane %v3975_v27, %v4481_v18  ;;  %v5457_v57 = vrot.slane %v3975_v27, %v4475_v16  ;;  %v5464_v54 = vrot.slane %v3975_v27, %v4478_v17 }
 0x7d3   :  { %v1699_v3 = vpop.permute.xlu0 %1698 }
 0x7d4   :  { %v5406_v23 = vpop.permute.xlu1 %2304  ;;  %v1702_v31 = vsel %vm72_vm0, %v5286_v0, %v1699_v3  ;;  %v1816_v51 = vmul.f32 %v5464_v54, %v1784_v26 }
 0x7d5   :  { %6526 = vst [vmem:[#allocation44_spill] sm:$0xff] %v5406_v23  ;;  %v5427_v23 = vmul.f32 %v5398_v59, %v4742_v9  ;;  %v1706_v9 = vsel %vm72_vm0, %v5278_v62, %v1691_v7 }
 0x7d6   :  { %v1732_v52 = vmul.f32 %v1718_v6, %v1706_v9  ;;  %v1708_v9 = vsel %vm72_vm0, %v1699_v3, %v5278_v62 }
 0x7d7   :  { %6529 = vst [vmem:[#allocation47_spill] sm:$0xff] %v5427_v23  ;;  %v5447_v8 = vpop.permute.xlu0 %1854  ;;  %v1726_v23 = vrot.slane %v1685_v33, %v4478_v17  ;;  %v1788_v33 = vsel %vm116_vm1, %v5294_v4, %v5280_v2  ;;  %v1704_v4 = vsel %vm72_vm0, %v1691_v7, %v5286_v0  ;;  %v1758_v0 = vsel %vm72_vm0, %v5173_v40, %v5160_v36 }
 0x7d8   :  { %v1693_v58 = vpop.permute.xlu1 %1692  ;;  %v1733_v26 = vmul.f32 %v1722_v29, %v1704_v4 }
 0x7d9   :  { %v1707_v30 = vsel %vm72_vm0, %v5348_v56, %v1693_v58  ;;  %v1705_v27 = vsel %vm72_vm0, %v1693_v58, %v5358_v32  ;;  %v1734_v50 = vmul.f32 %v1726_v23, %v1702_v31  ;;  %v3976_v31 = vld [vmem:[%s6410_s3 + $0x8] sm:$0xf] }
 0x7da   :  { %v1736_v59 = vmul.f32 %v1718_v6, %v1707_v30  ;;  %v1814_v30 = vmul.f32 %v5451_v34, %v1788_v33  ;;  %v1737_v61 = vmul.f32 %v1722_v29, %v1705_v27  ;;  %v1731_v33 = vmul.f32 %v1714_v12, %v1708_v9 }
 0x7db   :  { %v5494_v58 = vpop.permute.xlu0 %1862  ;;  %v1882_v27 = vrot.slane %v3976_v31, %v4465_v11  ;;  %v1921_v9 = vsel %vm160_vm2, %v5198_v45, %v5202_v47  ;;  %v5567_v4 = vrot.slane %v3976_v31, %v4478_v17 }
 0x7dc   :  { %v1701_v46 = vpop.permute.xlu1 %1700  ;;  %v2484_v60 = vpack.c.bf16 %v1736_v59, %v1732_v52  ;;  %v1756_v52 = vsel %vm72_vm0, %v5164_v37, %v5171_v38  ;;  %v5527_v37 = vmul.f32 %v5409_v28, %v4751_v19  ;;  %v1815_v38 = vmul.f32 %v5454_v39, %v1786_v24  ;;  %v5541_v19 = vld [vmem:[%s6410_s3 + $0xc] sm:$0xf] }
 0x7dd   :  { %v1703_v62 = vsel %vm72_vm0, %v5358_v32, %v1701_v46  ;;  %v1709_v3 = vsel %vm72_vm0, %v1701_v46, %v5348_v56  ;;  %v1762_v56 = vmul.f32 %v1755_v53, %v1726_v23  ;;  %v2485_v36 = vpack.c.bf16 %v1737_v61, %v1733_v26 }
 0x7de   :  { %v1735_v35 = vmul.f32 %v1714_v12, %v1709_v3  ;;  %v1738_v2 = vmul.f32 %v1726_v23, %v1703_v62  ;;  %2568 = vmatprep.subr.bf16.mxu0 %v2484_v60  ;;  %v1813_v60 = vmul.f32 %v5457_v57, %v1790_v15  ;;  %v2488_v40 = vpack.c.bf16 %v1814_v30, %v1760_v22 }
 0x7df   :  { %v5519_v32 = vpop.permute.xlu0 %2134  ;;  %v5532_v23 = vmul.f32 %v5412_v55, %v4755_v20  ;;  %v1759_v53 = vmul.f32 %v1758_v0, %v1714_v12  ;;  %v2490_v6 = vpack.c.bf16 %v1816_v51, %v1762_v56  ;;  %v1761_v15 = vmul.f32 %v1756_v52, %v1722_v29 }
 0x7e0   :  { %v2483_v7 = vpack.c.bf16 %v1735_v35, %v1731_v33  ;;  %v1775_v59 = vpop.permute.xlu1 %1774  ;;  %v2486_v63 = vpack.c.bf16 %v1738_v2, %v1734_v50  ;;  %v5536_v50 = vrot.slane %v3976_v31, %v4481_v18  ;;  %v1839_v20 = vsel %vm116_vm1, %v5179_v41, %v5182_v42 }
 0x7e1   :  { %v1838_v24 = vsel %vm116_vm1, %v5182_v42, %v5190_v43  ;;  %v1840_v61 = vsel %vm116_vm1, %v5192_v44, %v5179_v41  ;;  %v2487_v51 = vpack.c.bf16 %v1813_v60, %v1759_v53  ;;  %v1837_v12 = vsel %vm116_vm1, %v5190_v43, %v5192_v44 }
 0x7e2   :  { %2569 = vmatpush1.bf16.msra.mxu0 %v2483_v7  ;;  %2609 = vmatprep.subr.bf16.mxu1 %v2486_v63  ;;  %v1878_v42 = vrot.slane %v3976_v31, %v4475_v16  ;;  %v2489_v30 = vpack.c.bf16 %v1815_v38, %v1761_v15  ;;  %v5571_v41 = vrot.slane %v5541_v19, %v4465_v11 }
 0x7e3   :  { %v5543_v22 = vpop.permute.xlu0 %2142  ;;  %2570 = vmatprep.subr.bf16.mxu0 %v2488_v40  ;;  %2610 = vmatpush1.bf16.msra.mxu1 %v2485_v36  ;;  %v5575_v46 = vrot.slane %v5541_v19, %v4475_v16  ;;  %v5579_v43 = vrot.slane %v5541_v19, %v4478_v17  ;;  %v1842_v44 = vmul.f32 %v1839_v20, %v5451_v34 }
 0x7e4   :  { %2611 = vmatprep.subr.bf16.mxu1 %v2490_v6  ;;  %v1783_v29 = vpop.permute.xlu1 %1782  ;;  %v1843_v62 = vmul.f32 %v1838_v24, %v5454_v39  ;;  %v1841_v3 = vmul.f32 %v1840_v61, %v5457_v57  ;;  %v1870_v33 = vsel %vm160_vm2, %v5313_v21, %v5447_v8  ;;  %v1844_v2 = vmul.f32 %v1837_v12, %v5464_v54 }
 0x7e5   :  { %v1924_v52 = vmul.f32 %v1921_v9, %v1882_v27  ;;  %v1920_v31 = vsel %vm160_vm2, %v5202_v47, %v5210_v48  ;;  %v1919_v38 = vsel %vm160_vm2, %v5210_v48, %v5212_v49  ;;  %v1978_v36 = vmul.f32 %v5571_v41, %v5326_v14 }
 0x7e6   :  { %2571 = vmatpush1.bf16.msra.mxu0 %v2487_v51  ;;  %v1896_v40 = vmul.f32 %v1882_v27, %v1870_v33  ;;  %v1866_v47 = vsel %vm160_vm2, %v5322_v13, %v5494_v58 }
 0x7e7   :  { %v1771_v35 = vpop.permute.xlu0 %1770  ;;  %2612 = vmatpush1.bf16.msra.mxu1 %v2489_v30 }
 0x7e8   :  { %v1789_v0 = vsel %vm116_vm1, %v1771_v35, %v1775_v59  ;;  %v1791_v26 = vsel %vm116_vm1, %v1783_v29, %v1771_v35  ;;  %v1857_v56 = vpop.permute.xlu1 %1856 }
 0x7e9   :  { %v1817_v60 = vmul.f32 %v5457_v57, %v1791_v26  ;;  %v1818_v7 = vmul.f32 %v5451_v34, %v1789_v0  ;;  %v1871_v63 = vsel %vm160_vm2, %v5362_v5, %v1857_v56  ;;  %v1872_v34 = vsel %vm160_vm2, %v5494_v58, %v5313_v21  ;;  %v6533_v26 = vld [vmem:[#allocation25_spill] sm:$0xff] }
 0x7ea   :  { %v1900_v53 = vmul.f32 %v1882_v27, %v1871_v63  ;;  %v1869_v48 = vsel %vm160_vm2, %v1857_v56, %v5366_v25  ;;  %v1895_v12 = vmul.f32 %v1878_v42, %v1872_v34  ;;  %v6535_v56 = vld [vmem:[#allocation12_spill] sm:$0xff]  ;;  %v6537_v63 = vld [vmem:[#allocation15_spill] sm:$0xff] }
 0x7eb   :  { %v2491_v57 = vpack.c.bf16 %v1841_v3, %v1817_v60  ;;  %v1779_v6 = vpop.permute.xlu0 %1778  ;;  %v2492_v15 = vpack.c.bf16 %v1842_v44, %v1818_v7  ;;  %v1977_v44 = vmul.f32 %v5575_v46, %v5330_v1  ;;  %v1901_v3 = vmul.f32 %v5536_v50, %v1869_v48  ;;  %v6536_v7 = vld [vmem:[#allocation14_spill] sm:$0xff] }
 0x7ec   :  { %v1785_v14 = vsel %vm116_vm1, %v1779_v6, %v1783_v29  ;;  %v1787_v27 = vsel %vm116_vm1, %v1775_v59, %v1779_v6  ;;  %v1865_v20 = vpop.permute.xlu1 %1864  ;;  %v2496_v24 = vpack.c.bf16 %v1900_v53, %v1896_v40  ;;  %v1898_v29 = vmul.f32 %v5567_v4, %v1866_v47  ;;  %v6538_v40 = vld [vmem:[#allocation26_spill] sm:$0xff] }
 0x7ed   :  { %v1819_v61 = vmul.f32 %v5454_v39, %v1787_v27  ;;  %v1820_v51 = vmul.f32 %v5464_v54, %v1785_v14  ;;  %v1867_v21 = vsel %vm160_vm2, %v5366_v25, %v1865_v20  ;;  %v1873_v58 = vsel %vm160_vm2, %v1865_v20, %v5362_v5  ;;  %2572 = vmatprep.subr.bf16.mxu0 %v2492_v15 }
 0x7ee   :  { %v1899_v9 = vmul.f32 %v1878_v42, %v1873_v58  ;;  %v1902_v59 = vmul.f32 %v5567_v4, %v1867_v21  ;;  %2573 = vmatpush1.bf16.msra.mxu0 %v2491_v57  ;;  %v1922_v54 = vsel %vm160_vm2, %v5212_v49, %v5198_v45  ;;  %v1868_v25 = vsel %vm160_vm2, %v5447_v8, %v5322_v13 }
 0x7ef   :  { %v2493_v39 = vpack.c.bf16 %v1843_v62, %v1819_v61  ;;  %v5641_v5 = vpop.permute.xlu0 %2298  ;;  %2574 = vmatprep.subr.bf16.mxu0 %v2496_v24  ;;  %v2494_v30 = vpack.c.bf16 %v1844_v2, %v1820_v51  ;;  %v1925_v45 = vmul.f32 %v1920_v31, %v5536_v50  ;;  %v1968_v49 = vrot.slane %v5541_v19, %v4481_v18  ;;  %v6534_v2 = vld [vmem:[#allocation13_spill] sm:$0xff]  ;;  %v3981_v61 = vld [vmem:[%s6410_s3 + $0x1c] sm:$0xf] }
 0x7f0   :  { %v2495_v33 = vpack.c.bf16 %v1899_v9, %v1895_v12  ;;  %v1939_v35 = vpop.permute.xlu1 %1938  ;;  %v2498_v0 = vpack.c.bf16 %v1902_v59, %v1898_v29  ;;  %v1980_v13 = vmul.f32 %v5579_v43, %v6533_v26  ;;  %v2500_v8 = vpack.c.bf16 %v1978_v36, %v1924_v52 }
 0x7f1   :  { %2613 = vmatprep.subr.bf16.mxu1 %v2494_v30  ;;  %v1923_v62 = vmul.f32 %v1922_v54, %v1878_v42  ;;  %v2003_v1 = vsel %vm204_vm3, %v6535_v56, %v6534_v2  ;;  %v1897_v60 = vmul.f32 %v5536_v50, %v1868_v25  ;;  %v1926_v31 = vmul.f32 %v1919_v38, %v5567_v4  ;;  %v3980_v50 = vld [vmem:[%s6410_s3 + $0x18] sm:$0xf]  ;;  %v6540_v25 = vld [vmem:[#allocation43_spill] sm:$0xff] }
 0x7f2   :  { %2575 = vmatpush1.bf16.msra.mxu0 %v2495_v33  ;;  %2614 = vmatpush1.bf16.msra.mxu1 %v2493_v39  ;;  %v2002_v19 = vsel %vm204_vm3, %v6534_v2, %v6536_v7  ;;  %v2004_v42 = vsel %vm204_vm3, %v6537_v63, %v6535_v56  ;;  %v1979_v4 = vmul.f32 %v1968_v49, %v6538_v40  ;;  %v6539_v54 = vld [vmem:[#allocation30_spill] sm:$0xff]  ;;  %v6545_v2 = vld [vmem:[#allocation8_spill] sm:$0xff] }
 0x7f3   :  { %v1935_v52 = vpop.permute.xlu0 %1934  ;;  %2576 = vmatprep.subr.bf16.mxu0 %v2500_v8  ;;  %2615 = vmatprep.subr.bf16.mxu1 %v2498_v0  ;;  %v2499_v36 = vpack.c.bf16 %v1977_v44, %v1923_v62  ;;  %v2497_v38 = vpack.c.bf16 %v1901_v3, %v1897_v60  ;;  %v2006_v34 = vmul.f32 %v2003_v1, %v5571_v41  ;;  %v6544_v62 = vld [vmem:[#allocation9_spill] sm:$0xff]  ;;  %v6547_v60 = vld [vmem:[#allocation19_spill] sm:$0xff] }
 0x7f4   :  { %v1953_v53 = vsel %vm204_vm3, %v1935_v52, %v1939_v35  ;;  %v1947_v47 = vpop.permute.xlu1 %1946  ;;  %v2502_v15 = vpack.c.bf16 %v1980_v13, %v1926_v31  ;;  %v2001_v48 = vsel %vm204_vm3, %v6536_v7, %v6537_v63  ;;  %v2005_v14 = vmul.f32 %v2004_v42, %v5575_v46  ;;  %v6549_v63 = vld [vmem:[#allocation42_spill] sm:$0xff] }
 0x7f5   :  { %v1982_v57 = vmul.f32 %v5571_v41, %v1953_v53  ;;  %v1955_v6 = vsel %vm204_vm3, %v1947_v47, %v1935_v52  ;;  %v2007_v20 = vmul.f32 %v2002_v19, %v1968_v49  ;;  %v2158_v24 = vrot.slane %v3980_v50, %v4475_v16  ;;  %v6548_v19 = vld [vmem:[#allocation27_spill] sm:$0xff]  ;;  %v6550_v52 = vld [vmem:[#allocation28_spill] sm:$0xff] }
 0x7f6   :  { %v1981_v27 = vmul.f32 %v5575_v46, %v1955_v6  ;;  %2577 = vmatpush1.bf16.msra.mxu0 %v2499_v36  ;;  %2616 = vmatpush1.bf16.msra.mxu1 %v2497_v38  ;;  %v5683_v41 = vrot.slane %v3980_v50, %v4465_v11  ;;  %v2501_v58 = vpack.c.bf16 %v1979_v4, %v1925_v45  ;;  %v6542_v45 = vld [vmem:[#allocation16_spill] sm:$0xff]  ;;  %v6551_v38 = vld [vmem:[#allocation29_spill] sm:$0xff] }
 0x7f7   :  { %v1943_v51 = vpop.permute.xlu0 %1942  ;;  %2617 = vmatprep.subr.bf16.mxu1 %v2502_v15  ;;  %v2504_v21 = vpack.c.bf16 %v2006_v34, %v1982_v57  ;;  %v2008_v59 = vmul.f32 %v2001_v48, %v5579_v43  ;;  %v2106_v39 = vmul.f32 %v6540_v25, %v6539_v54  ;;  %v5697_v3 = vrot.slane %v3980_v50, %v4481_v18  ;;  %v6553_v48 = vld [vmem:[#allocation5_spill] sm:$0xff] }
 0x7f8   :  { %v2503_v12 = vpack.c.bf16 %v2005_v14, %v1981_v27  ;;  %v1949_v46 = vsel %vm204_vm3, %v1943_v51, %v1947_v47  ;;  %v1951_v29 = vsel %vm204_vm3, %v1939_v35, %v1943_v51  ;;  %v2067_v9 = vpop.permute.xlu1 %2066  ;;  %v5700_v33 = vrot.slane %v3980_v50, %v4478_v17  ;;  %v6541_v35 = vld [vmem:[#allocation17_spill] sm:$0xff]  ;;  %v6554_v14 = vld [vmem:[#allocation4_spill] sm:$0xff] }
 0x7f9   :  { %v1983_v30 = vmul.f32 %v1968_v49, %v1951_v29  ;;  %v1984_v44 = vmul.f32 %v5579_v43, %v1949_v46  ;;  %2578 = vmatprep.subr.bf16.mxu0 %v2504_v21  ;;  %v5703_v0 = vrot.slane %v3981_v61, %v4475_v16  ;;  %v2201_v26 = vsel %vm323_vm6, %v6542_v45, %v6541_v35  ;;  %v6543_v49 = vld [vmem:[#allocation18_spill] sm:$0xff]  ;;  %v6552_v47 = vld [vmem:[#allocation49_spill] sm:$0xff]  ;;  %v6557_v51 = vld [vmem:[#allocation20_spill] sm:$0xff] }
 0x7fa   :  { %2579 = vmatpush1.bf16.msra.mxu0 %v2503_v12  ;;  %2618 = vmatpush1.bf16.msra.mxu1 %v2501_v58  ;;  %v2200_v43 = vsel %vm323_vm6, %v6541_v35, %v6543_v49  ;;  %v6546_v56 = vpack.c.bf16 %v6544_v62, %v6545_v2  ;;  %v2199_v31 = vsel %vm323_vm6, %v6543_v49, %v6547_v60  ;;  %v6558_v58 = vld [vmem:[#allocation31_spill] sm:$0xff]  ;;  %v6565_v2 = vld [vmem:[#allocation38_spill] sm:$0xff] }
 0x7fb   :  { %v2505_v13 = vpack.c.bf16 %v2007_v20, %v1983_v30  ;;  %v5713_v8 = vpop.permute.xlu0 %2302  ;;  %v2506_v1 = vpack.c.bf16 %v2008_v59, %v1984_v44  ;;  %v5723_v7 = vrot.slane %v3981_v61, %v4465_v11  ;;  %v2105_v42 = vmul.f32 %v6549_v63, %v6548_v19  ;;  %v6559_v29 = vld [vmem:[#allocation11_spill] sm:$0xff]  ;;  %v6560_v59 = vld [vmem:[#allocation10_spill] sm:$0xff] }
 0x7fc   :  { %2580 = vmatprep.subr.bf16.mxu0 %v6546_v56  ;;  %v2108_v50 = vmul.f32 %v5412_v55, %v6550_v52  ;;  %v2075_v36 = vpop.permute.xlu1 %2074  ;;  %v5730_v40 = vrot.slane %v3981_v61, %v4481_v18  ;;  %v5733_v4 = vrot.slane %v3981_v61, %v4478_v17  ;;  %v2107_v53 = vmul.f32 %v5409_v28, %v6551_v38  ;;  %v6556_v61 = vld [vmem:[#allocation21_spill] sm:$0xff] }
 0x7fd   :  { %2619 = vmatprep.subr.bf16.mxu1 %v2506_v1  ;;  %v2512_v34 = vpack.c.bf16 %v2106_v39, %v6552_v47  ;;  %v5738_v57 = vmul.f32 %v2201_v26, %v2158_v24  ;;  %v5741_v6 = vmul.f32 %v2200_v43, %v5683_v41  ;;  %v2202_v15 = vsel %vm323_vm6, %v6547_v60, %v6542_v45  ;;  %v6562_v39 = vld [vmem:[#allocation45_spill] sm:$0xff]  ;;  %v6563_v26 = vld [vmem:[#allocation50_spill] sm:$0xff]  ;;  %v6566_v1 = vld [vmem:[#allocation35_spill] sm:$0xff] }
 0x7fe   :  { %v6555_v27 = vpack.c.bf16 %v6553_v48, %v6554_v14  ;;  %2620 = vmatpush1.bf16.msra.mxu1 %v2505_v13  ;;  %v5751_v20 = vmul.f32 %v2199_v31, %v5697_v3  ;;  %v2283_v21 = vsel %vm367_vm5, %v6557_v51, %v6556_v61  ;;  %v2150_v12 = vsel %vm323_vm6, %v6558_v58, %v5519_v32  ;;  %v6564_v43 = vld [vmem:[#allocation46_spill] sm:$0xff]  ;;  %v6567_v31 = vld [vmem:[#allocation32_spill] sm:$0xff] }
 0x7ff   :  { %v2063_v46 = vpop.permute.xlu0 %2062  ;;  %v6561_v54 = vpack.c.bf16 %v6559_v29, %v6560_v59  ;;  %v2511_v30 = vpack.c.bf16 %v2105_v42, %v6562_v39  ;;  %v2514_v49 = vpack.c.bf16 %v2108_v50, %v6563_v26  ;;  %v2513_v13 = vpack.c.bf16 %v2107_v53, %v6564_v43  ;;  %v6568_v50 = vld [vmem:[#allocation7_spill] sm:$0xff] }
 0x800   :  { %2581 = vmatpush1.bf16.msra.mxu0 %v6555_v27  ;;  %v2081_v44 = vsel %vm279_vm4, %v2063_v46, %v2067_v9  ;;  %v2083_v35 = vsel %vm279_vm4, %v2075_v36, %v2063_v46  ;;  %v2137_v45 = vpop.permute.xlu1 %2136  ;;  %v2148_v19 = vsel %vm323_vm6, %v5519_v32, %v6567_v31  ;;  %v5782_v42 = vmul.f32 %v2158_v24, %v2150_v12  ;;  %v6574_v26 = vld [vmem:[#allocation47_spill] sm:$0xff] }
 0x801   :  { %2582 = vmatprep.subr.bf16.mxu0 %v2512_v34  ;;  %2621 = vmatprep.subr.bf16.mxu1 %v6561_v54  ;;  %v2112_v62 = vmul.f32 %v5412_v55, %v2083_v35  ;;  %v2149_v56 = vsel %vm323_vm6, %v2137_v45, %v6565_v2  ;;  %v2151_v60 = vsel %vm323_vm6, %v6566_v1, %v2137_v45  ;;  %v6569_v55 = vld [vmem:[#allocation6_spill] sm:$0xff]  ;;  %v6573_v45 = vld [vmem:[#allocation23_spill] sm:$0xff] }
 0x802   :  { %v5784_v52 = vmul.f32 %v2158_v24, %v2151_v60  ;;  %v6570_v38 = vpack.c.bf16 %v6568_v50, %v6569_v55  ;;  %v2146_v53 = vsel %vm323_vm6, %v6567_v31, %v5543_v22  ;;  %v2152_v47 = vsel %vm323_vm6, %v5543_v22, %v6558_v58  ;;  %v6578_v55 = vld [vmem:[#allocation36_spill] sm:$0xff] }
 0x803   :  { %v2109_v32 = vmul.f32 %v6549_v63, %v2081_v44  ;;  %v2180_v24 = vmul.f32 %v5683_v41, %v2149_v56  ;;  %v2071_v34 = vpop.permute.xlu0 %2070  ;;  %v2518_v46 = vpack.c.bf16 %v5532_v23, %v2112_v62  ;;  %v2178_v59 = vmul.f32 %v5700_v33, %v2152_v47  ;;  %v6572_v44 = vld [vmem:[#allocation48_spill] sm:$0xff] }
 0x804   :  { %2583 = vmatpush1.bf16.msra.mxu0 %v2511_v30  ;;  %2622 = vmatpush1.bf16.msra.mxu1 %v6570_v38  ;;  %v2519_v48 = vpack.c.bf16 %v5784_v52, %v5782_v42  ;;  %v2077_v14 = vsel %vm279_vm4, %v2071_v34, %v2075_v36  ;;  %v2079_v27 = vsel %vm279_vm4, %v2067_v9, %v2071_v34  ;;  %v2145_v12 = vpop.permute.xlu1 %2144  ;;  %v6577_v42 = vld [vmem:[#allocation33_spill] sm:$0xff] }
 0x805   :  { %2623 = vmatprep.subr.bf16.mxu1 %v2514_v49  ;;  %v2110_v22 = vmul.f32 %v6540_v25, %v2079_v27  ;;  %v2111_v63 = vmul.f32 %v5409_v28, %v2077_v14  ;;  %v2147_v58 = vsel %vm323_vm6, %v6565_v2, %v2145_v12  ;;  %v2153_v29 = vsel %vm323_vm6, %v2145_v12, %v6566_v1  ;;  %v6571_v25 = vld [vmem:[#allocation22_spill] sm:$0xff]  ;;  %v6576_v2 = vld [vmem:[#allocation37_spill] sm:$0xff]  ;;  %v3982_v1 = vld [vmem:[%s6410_s3 + $0x20] sm:$0xf] }
 0x806   :  { %v2177_v36 = vmul.f32 %v5697_v3, %v2146_v53  ;;  %v2181_v9 = vmul.f32 %v5697_v3, %v2147_v58  ;;  %v2182_v23 = vmul.f32 %v5700_v33, %v2153_v29  ;;  %v2282_v28 = vsel %vm367_vm5, %v6556_v61, %v6571_v25  ;;  %v6579_v58 = vld [vmem:[#allocation39_spill] sm:$0xff] }
 0x807   :  { %v2176_v54 = vmul.f32 %v5683_v41, %v2148_v19  ;;  %v2517_v39 = vpack.c.bf16 %v5527_v37, %v2111_v63  ;;  %v2307_v30 = vpop.permute.xlu0 %2306  ;;  %v2516_v35 = vpack.c.bf16 %v6572_v44, %v2110_v22  ;;  %v2281_v3 = vsel %vm367_vm5, %v6571_v25, %v6573_v45  ;;  %v6575_v37 = vld [vmem:[#allocation34_spill] sm:$0xff]  ;;  %v6580_v25 = vld [vmem:[#allocation44_spill] sm:$0xff] }
 0x808   :  { %2624 = vmatpush1.bf16.msra.mxu1 %v2513_v13  ;;  %v2515_v49 = vpack.c.bf16 %v6574_v26, %v2109_v32  ;;  %v2521_v43 = vpack.c.bf16 %v2181_v9, %v2177_v36  ;;  %v2219_v13 = vpop.permute.xlu1 %2218  ;;  %v2522_v62 = vpack.c.bf16 %v2182_v23, %v2178_v59  ;;  %v2284_v41 = vsel %vm367_vm5, %v6573_v45, %v6557_v51 }
 0x809   :  { %2625 = vmatprep.subr.bf16.mxu1 %v2518_v46  ;;  %v2260_v61 = vmul.f32 %v5733_v4, %v6575_v37  ;;  %v2258_v56 = vmul.f32 %v5723_v7, %v6576_v2  ;;  %2584 = vmatprep.subr.bf16.mxu0 %v2516_v35  ;;  %v2520_v60 = vpack.c.bf16 %v2180_v24, %v2176_v54 }
 0x80a   :  { %v2206_v31 = vmul.f32 %v2202_v15, %v5700_v33  ;;  %v5843_v19 = vmul.f32 %v2283_v21, %v5703_v0  ;;  %v2257_v51 = vmul.f32 %v5703_v0, %v6577_v42  ;;  %2585 = vmatpush1.bf16.msra.mxu0 %v2515_v49  ;;  %v2286_v52 = vmul.f32 %v2282_v28, %v5723_v7  ;;  %v6581_v28 = vld [vmem:[#allocation41_spill] sm:$0xff] }
 0x80b   :  { %v2287_v50 = vmul.f32 %v2281_v3, %v5730_v40  ;;  %v2259_v38 = vmul.f32 %v5730_v40, %v6578_v55  ;;  %v2215_v53 = vpop.permute.xlu0 %2214  ;;  %2586 = vmatprep.subr.bf16.mxu0 %v2520_v60  ;;  %v2288_v33 = vmul.f32 %v2284_v41, %v5733_v4  ;;  %v2322_v15 = vrot.slane %v3982_v1, %v4475_v16 }
 0x80c   :  { %2626 = vmatpush1.bf16.msra.mxu1 %v2517_v39  ;;  %v2326_v21 = vrot.slane %v3982_v1, %v4465_v11  ;;  %v5855_v47 = vrot.slane %v3982_v1, %v4481_v18  ;;  %v2227_v32 = vpop.permute.xlu1 %2226  ;;  %v2233_v24 = vsel %vm367_vm5, %v2215_v53, %v2219_v13  ;;  %v2524_v14 = vpack.c.bf16 %v2258_v56, %v5741_v6 }
 0x80d   :  { %2627 = vmatprep.subr.bf16.mxu1 %v2522_v62  ;;  %v2235_v34 = vsel %vm367_vm5, %v2227_v32, %v2215_v53  ;;  %v2526_v27 = vpack.c.bf16 %v2260_v61, %v2206_v31  ;;  %v2523_v12 = vpack.c.bf16 %v2257_v51, %v5738_v57  ;;  %v2334_v46 = vrot.slane %v3982_v1, %v4478_v17 }
 0x80e   :  { %v2264_v22 = vmul.f32 %v5733_v4, %v2235_v34  ;;  %2587 = vmatpush1.bf16.msra.mxu0 %v2519_v48  ;;  %v2525_v63 = vpack.c.bf16 %v2259_v38, %v5751_v20  ;;  %v2314_v29 = vsel %vm411_vm7, %v6579_v58, %v5641_v5  ;;  %v2312_v6 = vsel %vm411_vm7, %v5641_v5, %v5713_v8 }
 0x80f   :  { %v2223_v36 = vpop.permute.xlu0 %2222  ;;  %2588 = vmatprep.subr.bf16.mxu0 %v2524_v14  ;;  %v2261_v57 = vmul.f32 %v5703_v0, %v2233_v24  ;;  %v2340_v54 = vmul.f32 %v2326_v21, %v2312_v6  ;;  %v2310_v39 = vsel %vm411_vm7, %v5713_v8, %v2307_v30  ;;  %v2339_v35 = vmul.f32 %v2322_v15, %v2314_v29 }
 0x810   :  { %2628 = vmatpush1.bf16.msra.mxu1 %v2521_v43  ;;  %v2229_v4 = vsel %vm367_vm5, %v2223_v36, %v2227_v32  ;;  %v2231_v20 = vsel %vm367_vm5, %v2219_v13, %v2223_v36  ;;  %v2301_v48 = vpop.permute.xlu1 %2300  ;;  %v2530_v59 = vpack.c.bf16 %v2288_v33, %v2264_v22  ;;  %v6582_v43 = vld [vmem:[#allocation40_spill] sm:$0xff]  ;;  %v2341_v41 = vmul.f32 %v5855_v47, %v2310_v39 }
 0x811   :  { %2629 = vmatprep.subr.bf16.mxu1 %v2526_v27  ;;  %v2262_v9 = vmul.f32 %v5723_v7, %v2231_v20  ;;  %v2263_v23 = vmul.f32 %v5730_v40, %v2229_v4  ;;  %v2313_v5 = vsel %vm411_vm7, %v2301_v48, %v6580_v25  ;;  %v2315_v0 = vsel %vm411_vm7, %v6581_v28, %v2301_v48 }
 0x812   :  { %v2344_v44 = vmul.f32 %v2326_v21, %v2313_v5  ;;  %2589 = vmatpush1.bf16.msra.mxu0 %v2523_v12  ;;  %v2316_v7 = vsel %vm411_vm7, %v2307_v30, %v6579_v58  ;;  %v2527_v26 = vpack.c.bf16 %v5843_v19, %v2261_v57  ;;  %v2343_v49 = vmul.f32 %v2322_v15, %v2315_v0 }
 0x813   :  { %v2529_v40 = vpack.c.bf16 %v2287_v50, %v2263_v23  ;;  %v2356_v45 = vpop.permute.xlu0 %2355  ;;  %v2528_v3 = vpack.c.bf16 %v2286_v52, %v2262_v9  ;;  %v2342_v2 = vmul.f32 %v2334_v46, %v2316_v7 }
 0x814   :  { %2630 = vmatpush1.bf16.msra.mxu1 %v2525_v63  ;;  %v2365_v13 = vsel %vm411_vm7, %v2356_v45, %v6582_v43  ;;  %v2309_v8 = vpop.permute.xlu1 %2308  ;;  %v2532_v62 = vpack.c.bf16 %v2344_v44, %v2340_v54  ;;  %v2531_v31 = vpack.c.bf16 %v2343_v49, %v2339_v35  ;;  %v3081_v35 = vld [vmem:[%s6421_s16] sm:$0x3] }
 0x815   :  { %2631 = vmatprep.subr.bf16.mxu1 %v2530_v59  ;;  %v2367_v37 = vmul.f32 %v2365_v13, %v2322_v15  ;;  %v2311_v30 = vsel %vm411_vm7, %v6580_v25, %v2309_v8  ;;  %v2317_v61 = vsel %vm411_vm7, %v2309_v8, %v6581_v28  ;;  %2590 = vmatprep.subr.bf16.mxu0 %v2528_v3 }
 0x816   :  { %v2345_v56 = vmul.f32 %v5855_v47, %v2311_v30  ;;  %v2346_v1 = vmul.f32 %v2334_v46, %v2317_v61  ;;  %2591 = vmatpush1.bf16.msra.mxu0 %v2527_v26  ;;  %v3989_v26 = vld [vmem:[%s6410_s3 + $0x4] sm:$0xf] }
 0x817   :  { %v2360_v60 = vpop.permute.xlu0 %2359  ;;  %2592 = vmatprep.subr.bf16.mxu0 %v2532_v62  ;;  %v2535_v50 = vpack.c.bf16 %v2367_v37, %v2367_v37  ;;  %v2721_v13 = vrot.slane %v3989_v26, %v4465_v11 }
 0x818   :  { %2632 = vmatpush1.bf16.msra.mxu1 %v2529_v40  ;;  %v2533_v19 = vpack.c.bf16 %v2345_v56, %v2341_v41  ;;  %v2364_v42 = vsel %vm411_vm7, %v6582_v43, %v2360_v60  ;;  %v2362_v51 = vpop.permute.xlu1 %2361  ;;  %v2534_v52 = vpack.c.bf16 %v2346_v1, %v2342_v2  ;;  %v2725_v2 = vrot.slane %v3989_v26, %v4481_v18 }
 0x819   :  { %v2368_v55 = vmul.f32 %v2364_v42, %v2326_v21  ;;  %v2363_v38 = vsel %vm411_vm7, %v2360_v60, %v2362_v51  ;;  %v2366_v53 = vsel %vm411_vm7, %v2362_v51, %v2356_v45  ;;  %v2557_v14 = vsel %vm512_vm8, %v2535_v50, 0  ;;  %v6583_v21 = vld [vmem:[#allocation24_spill] sm:$0xff]  ;;  %v2658_v45 = vld [vmem:[%s6410_s3] sm:$0xf] }
 0x81a   :  { %v2369_v33 = vmul.f32 %v2363_v38, %v5855_v47  ;;  %v2370_v15 = vmul.f32 %v2366_v53, %v2334_v46  ;;  %2593 = vmatpush1.bf16.msra.mxu0 %v2531_v31  ;;  %2633 = vmatprep.subr.bf16.mxu1 %v2534_v52  ;;  %v3983_v27 = vcombine.low %v6583_v21, %v6583_v21  ;;  %v6584_v47 = vmov 0  }
 0x81b   :  { %v2536_v32 = vpack.c.bf16 %v2368_v55, %v2368_v55  ;;  %v2679_v43 = vrot.slane %v2658_v45, %v4465_v11  ;;  %v2675_v37 = vrot.slane %v2658_v45, %v4475_v16  ;;  %v2687_v30 = vrot.slane %v2658_v45, %v4478_v17 }
 0x81c   :  { %2634 = vmatpush1.bf16.msra.mxu1 %v2533_v19  ;;  %v2537_v24 = vpack.c.bf16 %v2369_v33, %v2369_v33  ;;  %v2538_v34 = vpack.c.bf16 %v2370_v15, %v2370_v15  ;;  %v2717_v60 = vrot.slane %v3989_v26, %v4475_v16  ;;  %v2729_v31 = vrot.slane %v3989_v26, %v4478_v17 }
 0x81d   :  { %3985 = vmatprep.subr.msk.bf16.mxu0 %vm512_vm8, %v2536_v32  ;;  %v2683_v19 = vrot.slane %v2658_v45, %v4481_v18 }
 0x81e   :  { %2595 = vmatpush1.bf16.msra.mxu0 %v2557_v14  ;;  %3987 = vmatprep.subr.msk.bf16.mxu1 %vm512_vm8, %v2538_v34  ;;  %v2563_v12 = vsel %vm512_vm8, %v2537_v24, 0 }
 0x820   :  { %2636 = vmatpush1.bf16.msra.mxu1 %v2563_v12 }
 0x821   :  { %2601 = vmatmul.mubr.bf16.vlgmr.msra.gmra.mrb[16].mxu0 %v3983_v27 }
 0x822   :  { %3134 = vmatprep.mubr.bf16.mxu0 %v6584_v47 }
 0x823   :  { %2642 = vmatmul.mubr.bf16.vlgmr.msra.gmra.mrb[16].mxu1 %v3983_v27 }
 0x824   :  { %3175 = vmatprep.mubr.bf16.mxu1 %v6584_v47 }
 0x828   :  { %v2544_v46 = vpop.permute.xlu0 %2543 }
 0x8f4   :  { %v2602_v22 = vpop.f32.mrb[16].mxu0 }
 0x8f5   :  { %v2603_v63 = vadd.f32 %v2602_v22, %v2544_v46  ;;  %v2604_v58 = vpop.f32.mrb[17].mxu0 }
 0x8f6   :  { %v2643_v29 = vpop.f32.mrb[16].mxu1  ;;  %v2605_v6 = vadd.f32 %v2604_v58, %v2544_v46  ;;  %v2606_v57 = vpop.f32.mrb[18].mxu0  ;;  %v3990_v58 = vld [vmem:[%s6410_s3 + $0x8] sm:$0xf] }
 0x8f7   :  { %v2644_v36 = vadd.f32 %v2643_v29, %v2544_v46  ;;  %v2645_v4 = vpop.f32.mrb[17].mxu1  ;;  %v2650_v20 = vmul.f32 0.2, %v2603_v63  ;;  %v2607_v59 = vpop.f32.mrb[19].mxu0  ;;  %v2763_v57 = vrot.slane %v3990_v58, %v4465_v11  ;;  %v2767_v45 = vrot.slane %v3990_v58, %v4481_v18 }
 0x8f8   :  { %v2646_v48 = vadd.f32 %v2645_v4, %v2544_v46  ;;  %v2647_v9 = vpop.f32.mrb[18].mxu1  ;;  %v2651_v23 = vmul.f32 0.2, %v2605_v6 }
 0x8f9   :  { %v2648_v25 = vpop.f32.mrb[19].mxu1  ;;  %v5921_v5 = vmax.f32 %v2603_v63, %v2650_v20  ;;  %v2652_v28 = vmul.f32 0.2, %v2644_v36  ;;  %v2759_v9 = vrot.slane %v3990_v58, %v4475_v16 }
 0x8fa   :  { %v5923_v0 = vmax.f32 %v2605_v6, %v2651_v23  ;;  %v2653_v54 = vmul.f32 0.2, %v2646_v48  ;;  %v3991_v6 = vld [vmem:[%s6410_s3 + $0xc] sm:$0xf]  ;;  %v2771_v23 = vrot.slane %v3990_v58, %v4478_v17 }
 0x8fb   :  { %2659 = vrot.lane.b32.xlu1 %v5921_v5, %s4261_s29  ;;  %v5929_v39 = vmax.f32 %v2644_v36, %v2652_v28  ;;  %v2805_v4 = vrot.slane %v3991_v6, %v4465_v11  ;;  %v2809_v28 = vrot.slane %v3991_v6, %v4481_v18 }
 0x8fc   :  { %2661 = vrot.lane.b32.xlu0 %v5923_v0, %s4261_s29  ;;  %v5931_v44 = vmax.f32 %v2646_v48, %v2653_v54 }
 0x8ff   :  { %2663 = vrot.lane.b32.xlu1 %v5929_v39, %s4261_s29 }
 0x900   :  { %2665 = vrot.lane.b32.xlu0 %v5931_v44, %s4261_s29 }
 0x903   :  { %2701 = vrot.lane.b32.xlu1 %v5921_v5, %s6481_s0 }
 0x904   :  { %2703 = vrot.lane.b32.xlu0 %v5923_v0, %s6481_s0 }
 0x907   :  { %2705 = vrot.lane.b32.xlu1 %v5929_v39, %s6481_s0 }
 0x908   :  { %2707 = vrot.lane.b32.xlu0 %v5931_v44, %s6481_s0 }
 0x90b   :  { %2743 = vrot.lane.b32.xlu1 %v5921_v5, %s6482_s12 }
 0x90c   :  { %2745 = vrot.lane.b32.xlu0 %v5923_v0, %s6482_s12 }
 0x90f   :  { %2747 = vrot.lane.b32.xlu1 %v5929_v39, %s6482_s12 }
 0x910   :  { %2749 = vrot.lane.b32.xlu0 %v5931_v44, %s6482_s12 }
 0x913   :  { %2785 = vrot.lane.b32.xlu1 %v5921_v5, %s4264_s21 }
 0x914   :  { %2787 = vrot.lane.b32.xlu0 %v5923_v0, %s4264_s21 }
 0x917   :  { %2789 = vrot.lane.b32.xlu1 %v5929_v39, %s4264_s21 }
 0x918   :  { %2791 = vrot.lane.b32.xlu0 %v5931_v44, %s4264_s21 }
 0x91b   :  { %2857 = vrot.lane.b32.xlu1 %v5921_v5, %s4265_s22 }
 0x91c   :  { %2859 = vrot.lane.b32.xlu0 %v5923_v0, %s4265_s22 }
 0x91f   :  { %2861 = vrot.lane.b32.xlu1 %v5929_v39, %s4265_s22 }
 0x920   :  { %2863 = vrot.lane.b32.xlu0 %v5931_v44, %s4265_s22 }
 0x923   :  { %2899 = vrot.lane.b32.xlu1 %v5921_v5, %s6483_s28 }
 0x924   :  { %2901 = vrot.lane.b32.xlu0 %v5923_v0, %s6483_s28 }
 0x927   :  { %2903 = vrot.lane.b32.xlu1 %v5929_v39, %s6483_s28 }
 0x928   :  { %2905 = vrot.lane.b32.xlu0 %v5931_v44, %s6483_s28 }
 0x92b   :  { %2941 = vrot.lane.b32.xlu1 %v5921_v5, %s6484_s23 }
 0x92c   :  { %2943 = vrot.lane.b32.xlu0 %v5923_v0, %s6484_s23 }
 0x92f   :  { %2945 = vrot.lane.b32.xlu1 %v5929_v39, %s6484_s23 }
 0x930   :  { %2947 = vrot.lane.b32.xlu0 %v5931_v44, %s6484_s23 }
 0x933   :  { %2983 = vrot.lane.b32.xlu1 %v5921_v5, %s6493_s9 }
 0x934   :  { %2985 = vrot.lane.b32.xlu0 %v5923_v0, %s6493_s9 }
 0x937   :  { %2987 = vrot.lane.b32.xlu1 %v5929_v39, %s6493_s9 }
 0x938   :  { %2989 = vrot.lane.b32.xlu0 %v5931_v44, %s6493_s9 }
 0x93b   :  { %3084 = vperm.xlu1 %4174, %v3081_v35  }
 0x96d   :  { %v2660_v7 = vpop.permute.xlu1 %2659 }
 0x96e   :  { %v2662_v40 = vpop.permute.xlu0 %2661 }
 0x96f   :  { %v2669_v8 = vsel %vm72_vm0, %v2660_v7, %v2662_v40 }
 0x970   :  { %v2693_v56 = vmul.f32 %v2679_v43, %v2669_v8 }
 0x971   :  { %v2664_v3 = vpop.permute.xlu1 %2663 }
 0x972   :  { %v2666_v49 = vpop.permute.xlu0 %2665  ;;  %v2668_v50 = vsel %vm72_vm0, %v2662_v40, %v2664_v3  ;;  %v2813_v40 = vrot.slane %v3991_v6, %v4478_v17 }
 0x973   :  { %v2667_v42 = vsel %vm72_vm0, %v2664_v3, %v2666_v49  ;;  %v2670_v51 = vsel %vm72_vm0, %v2666_v49, %v2660_v7  ;;  %v2694_v27 = vmul.f32 %v2683_v19, %v2668_v50  ;;  %v2801_v7 = vrot.slane %v3991_v6, %v4475_v16 }
 0x974   :  { %v2692_v24 = vmul.f32 %v2675_v37, %v2670_v51  ;;  %v2695_v34 = vmul.f32 %v2687_v30, %v2667_v42 }
 0x975   :  { %v2702_v62 = vpop.permute.xlu1 %2701 }
 0x976   :  { %v2704_v41 = vpop.permute.xlu0 %2703 }
 0x977   :  { %v2711_v61 = vsel %vm116_vm1, %v2702_v62, %v2704_v41 }
 0x978   :  { %v2735_v1 = vmul.f32 %v2721_v13, %v2711_v61 }
 0x979   :  { %v2706_v52 = vpop.permute.xlu1 %2705 }
 0x97a   :  { %v2710_v55 = vsel %vm116_vm1, %v2704_v41, %v2706_v52  ;;  %v2708_v38 = vpop.permute.xlu0 %2707  ;;  %v3061_v53 = vpack.c.bf16 %v2735_v1, %v2693_v56  ;;  %v3992_v41 = vld [vmem:[%s6410_s3 + $0x10] sm:$0xf] }
 0x97b   :  { %v2736_v33 = vmul.f32 %v2725_v2, %v2710_v55  ;;  %v2709_v15 = vsel %vm116_vm1, %v2706_v52, %v2708_v38  ;;  %v2712_v32 = vsel %vm116_vm1, %v2708_v38, %v2702_v62  ;;  %v3993_v2 = vld [vmem:[%s6410_s3 + $0x14] sm:$0xf]  ;;  %v2831_v51 = vrot.slane %v3992_v41, %v4475_v16 }
 0x97c   :  { %v2734_v14 = vmul.f32 %v2717_v60, %v2712_v32  ;;  %v2737_v21 = vmul.f32 %v2729_v31, %v2709_v15  ;;  %3102 = vmatprep.subr.bf16.mxu0 %v3061_v53  ;;  %v2873_v50 = vrot.slane %v3993_v2, %v4475_v16  ;;  %v2839_v53 = vrot.slane %v3992_v41, %v4481_v18 }
 0x97d   :  { %v2744_v12 = vpop.permute.xlu1 %2743  ;;  %v3062_v63 = vpack.c.bf16 %v2736_v33, %v2694_v27  ;;  %v2877_v32 = vrot.slane %v3993_v2, %v4465_v11 }
 0x97e   :  { %v3060_v47 = vpack.c.bf16 %v2734_v14, %v2692_v24  ;;  %v2746_v46 = vpop.permute.xlu0 %2745  ;;  %v3063_v22 = vpack.c.bf16 %v2737_v21, %v2695_v34  ;;  %v2835_v24 = vrot.slane %v3992_v41, %v4465_v11  ;;  %v2881_v34 = vrot.slane %v3993_v2, %v4481_v18 }
 0x97f   :  { %v2753_v20 = vsel %vm160_vm2, %v2744_v12, %v2746_v46  ;;  %v2885_v14 = vrot.slane %v3993_v2, %v4478_v17  ;;  %v2843_v21 = vrot.slane %v3992_v41, %v4478_v17 }
 0x980   :  { %3103 = vmatpush1.bf16.msra.mxu0 %v3060_v47  ;;  %3143 = vmatprep.subr.bf16.mxu1 %v3063_v22  ;;  %v2777_v54 = vmul.f32 %v2763_v57, %v2753_v20  ;;  %v2849_v6 = vmul.f32 %v2835_v24, %v5923_v0  ;;  %v3994_v0 = vld [vmem:[%s6410_s3 + $0x18] sm:$0xf] }
 0x981   :  { %3144 = vmatpush1.bf16.msra.mxu1 %v3062_v63  ;;  %v2748_v29 = vpop.permute.xlu1 %2747 }
 0x982   :  { %v2750_v36 = vpop.permute.xlu0 %2749  ;;  %v2752_v43 = vsel %vm160_vm2, %v2746_v46, %v2748_v29 }
 0x983   :  { %v2751_v3 = vsel %vm160_vm2, %v2748_v29, %v2750_v36  ;;  %v2754_v26 = vsel %vm160_vm2, %v2750_v36, %v2744_v12  ;;  %v2778_v19 = vmul.f32 %v2767_v45, %v2752_v43  ;;  %v2848_v12 = vmul.f32 %v2831_v51, %v5921_v5 }
 0x984   :  { %v2776_v56 = vmul.f32 %v2759_v9, %v2754_v26  ;;  %v2779_v1 = vmul.f32 %v2771_v23, %v2751_v3  ;;  %v2850_v36 = vmul.f32 %v2839_v53, %v5929_v39  ;;  %v2851_v5 = vmul.f32 %v2843_v21, %v5931_v44  ;;  %v3995_v39 = vld [vmem:[%s6410_s3 + $0x1c] sm:$0xf] }
 0x985   :  { %v2786_v48 = vpop.permute.xlu1 %2785  ;;  %v2923_v26 = vrot.slane %v3994_v0, %v4481_v18  ;;  %v2961_v43 = vrot.slane %v3995_v39, %v4465_v11  ;;  %v2965_v41 = vrot.slane %v3995_v39, %v4481_v18 }
 0x986   :  { %v2788_v59 = vpop.permute.xlu0 %2787 }
 0x987   :  { %v2795_v25 = vsel %vm204_vm3, %v2786_v48, %v2788_v59 }
 0x988   :  { %v2819_v35 = vmul.f32 %v2805_v4, %v2795_v25 }
 0x989   :  { %v2790_v49 = vpop.permute.xlu1 %2789 }
 0x98a   :  { %v2794_v13 = vsel %vm204_vm3, %v2788_v59, %v2790_v49  ;;  %v2792_v8 = vpop.permute.xlu0 %2791  ;;  %v3065_v62 = vpack.c.bf16 %v2819_v35, %v2777_v54  ;;  %v2915_v35 = vrot.slane %v3994_v0, %v4475_v16 }
 0x98b   :  { %v2820_v37 = vmul.f32 %v2809_v28, %v2794_v13  ;;  %v2793_v30 = vsel %vm204_vm3, %v2790_v49, %v2792_v8  ;;  %v2796_v61 = vsel %vm204_vm3, %v2792_v8, %v2786_v48  ;;  %v3996_v13 = vld [vmem:[%s6410_s3 + $0x20] sm:$0xf] }
 0x98c   :  { %v2818_v60 = vmul.f32 %v2801_v7, %v2796_v61  ;;  %v2821_v31 = vmul.f32 %v2813_v40, %v2793_v30  ;;  %3104 = vmatprep.subr.bf16.mxu0 %v3065_v62  ;;  %v2919_v7 = vrot.slane %v3994_v0, %v4465_v11  ;;  %v2957_v40 = vrot.slane %v3995_v39, %v4475_v16 }
 0x98d   :  { %v2858_v42 = vpop.permute.xlu1 %2857  ;;  %v3066_v33 = vpack.c.bf16 %v2820_v37, %v2778_v19  ;;  %v2927_v62 = vrot.slane %v3994_v0, %v4478_v17  ;;  %v2969_v37 = vrot.slane %v3995_v39, %v4478_v17  ;;  %v2999_v19 = vrot.slane %v3996_v13, %v4475_v16 }
 0x98e   :  { %v3064_v52 = vpack.c.bf16 %v2818_v60, %v2776_v56  ;;  %v2860_v55 = vpop.permute.xlu0 %2859  ;;  %v3067_v38 = vpack.c.bf16 %v2821_v31, %v2779_v1 }
 0x98f   :  { %v2867_v15 = vsel %vm279_vm4, %v2858_v42, %v2860_v55 }
 0x990   :  { %3105 = vmatpush1.bf16.msra.mxu0 %v3064_v52  ;;  %3145 = vmatprep.subr.bf16.mxu1 %v3067_v38  ;;  %v2890_v47 = vmul.f32 %v2873_v50, %v2867_v15 }
 0x991   :  { %3146 = vmatpush1.bf16.msra.mxu1 %v3066_v33  ;;  %v2862_v27 = vpop.permute.xlu1 %2861 }
 0x992   :  { %v2866_v46 = vsel %vm279_vm4, %v2860_v55, %v2862_v27  ;;  %v2864_v22 = vpop.permute.xlu0 %2863  ;;  %v3068_v59 = vpack.c.bf16 %v2890_v47, %v2848_v12  ;;  %v3003_v12 = vrot.slane %v3996_v13, %v4465_v11 }
 0x993   :  { %v2891_v63 = vmul.f32 %v2877_v32, %v2866_v46  ;;  %v2865_v58 = vsel %vm279_vm4, %v2862_v27, %v2864_v22  ;;  %v2868_v29 = vsel %vm279_vm4, %v2864_v22, %v2858_v42  ;;  %v3007_v46 = vrot.slane %v3996_v13, %v4481_v18 }
 0x994   :  { %v2892_v57 = vmul.f32 %v2881_v34, %v2865_v58  ;;  %v2893_v4 = vmul.f32 %v2885_v14, %v2868_v29  ;;  %v3011_v22 = vrot.slane %v3996_v13, %v4478_v17 }
 0x995   :  { %v2900_v20 = vpop.permute.xlu1 %2899  ;;  %v3069_v48 = vpack.c.bf16 %v2891_v63, %v2849_v6 }
 0x996   :  { %v3070_v9 = vpack.c.bf16 %v2892_v57, %v2850_v36  ;;  %v2902_v23 = vpop.permute.xlu0 %2901  ;;  %v3071_v25 = vpack.c.bf16 %v2893_v4, %v2851_v5 }
 0x997   :  { %3106 = vmatprep.subr.bf16.mxu0 %v3069_v48  ;;  %v2909_v3 = vsel %vm323_vm6, %v2900_v20, %v2902_v23 }
 0x998   :  { %3107 = vmatpush1.bf16.msra.mxu0 %v3068_v59  ;;  %3147 = vmatprep.subr.bf16.mxu1 %v3071_v25  ;;  %v2932_v56 = vmul.f32 %v2915_v35, %v2909_v3 }
 0x999   :  { %3148 = vmatpush1.bf16.msra.mxu1 %v3070_v9  ;;  %v2904_v28 = vpop.permute.xlu1 %2903 }
 0x99a   :  { %v2906_v54 = vpop.permute.xlu0 %2905  ;;  %v2908_v8 = vsel %vm323_vm6, %v2902_v23, %v2904_v28 }
 0x99b   :  { %v2907_v30 = vsel %vm323_vm6, %v2904_v28, %v2906_v54  ;;  %v2910_v61 = vsel %vm323_vm6, %v2906_v54, %v2900_v20  ;;  %v2933_v42 = vmul.f32 %v2919_v7, %v2908_v8  ;;  %v3080_v28 = vld [vmem:[%s6422_s15] sm:$0x1]  ;;  %v4278_v54 = vmov 1966171168  }
 0x99c   :  { %v2934_v55 = vmul.f32 %v2923_v26, %v2907_v30  ;;  %v2935_v38 = vmul.f32 %v2927_v62, %v2910_v61  ;;  %v3196_v0 = vunpack.c.l.s4 %v4278_v54  ;;  %v6586_v26 = vld [vmem:[#allocation3_spill] sm:$0xff] }
 0x99d   :  { %v2942_v44 = vpop.permute.xlu1 %2941 }
 0x99e   :  { %v2944_v45 = vpop.permute.xlu0 %2943  ;;  %v3197_v39 = vunpack.c.0.s8 %v3196_v0 }
 0x99f   :  { %v2951_v49 = vsel %vm367_vm5, %v2942_v44, %v2944_v45 }
 0x9a0   :  { %v2974_v1 = vmul.f32 %v2957_v40, %v2951_v49  ;;  %v3200_v49 = vsub.s32 %v3197_v39, %v6586_v26 }
 0x9a1   :  { %v2946_v2 = vpop.permute.xlu1 %2945 }
 0x9a2   :  { %v2950_v60 = vsel %vm367_vm5, %v2944_v45, %v2946_v2  ;;  %v2948_v31 = vpop.permute.xlu0 %2947  ;;  %v3072_v24 = vpack.c.bf16 %v2974_v1, %v2932_v56 }
 0x9a3   :  { %v2975_v51 = vmul.f32 %v2961_v43, %v2950_v60  ;;  %v2949_v52 = vsel %vm367_vm5, %v2946_v2, %v2948_v31  ;;  %v2952_v50 = vsel %vm367_vm5, %v2948_v31, %v2942_v44 }
 0x9a4   :  { %v2976_v53 = vmul.f32 %v2965_v41, %v2949_v52  ;;  %v2977_v33 = vmul.f32 %v2969_v37, %v2952_v50 }
 0x9a5   :  { %v2984_v15 = vpop.permute.xlu1 %2983  ;;  %v3073_v32 = vpack.c.bf16 %v2975_v51, %v2933_v42  ;;  %v4001_v42 = vld [vmem:[%s6423_s2 + $0x1] ss:$4 sm:$0xf]  ;;  %v4002_v51 = vld [vmem:[%s6423_s2 + $0x2] ss:$4 sm:$0xf] }
 0x9a6   :  { %v3074_v34 = vpack.c.bf16 %v2976_v53, %v2934_v55  ;;  %v2986_v14 = vpop.permute.xlu0 %2985  ;;  %v3075_v21 = vpack.c.bf16 %v2977_v33, %v2935_v38  ;;  %v4143_v53 = vtrunc.f32 %v4002_v51 }
 0x9a7   :  { %v2993_v27 = vsel %vm411_vm7, %v2984_v15, %v2986_v14  ;;  %3108 = vmatprep.subr.bf16.mxu0 %v3073_v32 }
 0x9a8   :  { %v3016_v47 = vmul.f32 %v2999_v19, %v2993_v27  ;;  %3109 = vmatpush1.bf16.msra.mxu0 %v3072_v24  ;;  %3149 = vmatprep.subr.bf16.mxu1 %v3075_v21  ;;  %v3184_v19 = vld [vmem:[%s6423_s2] ss:$4 sm:$0xf] }
 0x9a9   :  { %3150 = vmatpush1.bf16.msra.mxu1 %v3074_v34  ;;  %v2988_v63 = vpop.permute.xlu1 %2987 }
 0x9aa   :  { %v2992_v58 = vsel %vm411_vm7, %v2986_v14, %v2988_v63  ;;  %v2990_v29 = vpop.permute.xlu0 %2989  ;;  %v3076_v6 = vpack.c.bf16 %v3016_v47, %v3016_v47  ;;  %v4144_v14 = vcvt.f32.s32 %v4143_v53 }
 0x9ab   :  { %v3017_v36 = vmul.f32 %v3003_v12, %v2992_v58  ;;  %v2991_v57 = vsel %vm411_vm7, %v2988_v63, %v2990_v29  ;;  %v2994_v4 = vsel %vm411_vm7, %v2990_v29, %v2984_v15  ;;  %v6167_v63 = vadd.s32 16, %v6586_v26 }
 0x9ac   :  { %v3018_v5 = vmul.f32 %v3007_v46, %v2991_v57  ;;  %v3019_v20 = vmul.f32 %v3011_v22, %v2994_v4  ;;  %v3091_v23 = vsel %vm512_vm8, %v3076_v6, 0  ;;  %v6164_v22 = vadd.s32 8, %v6586_v26 }
 0x9ad   :  { %v3077_v48 = vpack.c.bf16 %v3017_v36, %v3017_v36  ;;  %v6172_v6 = vadd.s32 24, %v6586_v26 }
 0x9ae   :  { %v3078_v59 = vpack.c.bf16 %v3018_v5, %v3018_v5  ;;  %v3079_v9 = vpack.c.bf16 %v3019_v20, %v3019_v20 }
 0x9af   :  { %3997 = vmatprep.subr.msk.bf16.mxu0 %vm512_vm8, %v3077_v48 }
 0x9b0   :  { %3111 = vmatpush1.bf16.msra.mxu0 %v3091_v23  ;;  %3999 = vmatprep.subr.msk.bf16.mxu1 %vm512_vm8, %v3079_v9  ;;  %v3097_v25 = vsel %vm512_vm8, %v3078_v59, 0 }
 0x9b1   :  { %3152 = vmatpush1.bf16.msra.mxu1 %v3097_v25 }
 0x9b3   :  { %3998 = vmatmul.mubr.msk.bf16.vlgmr.msra.gmra.mrb[20].mxu0 %vm508_vm9, %v3080_v28 }
 0x9b4   :  { %4000 = vmatmul.mubr.msk.bf16.vlgmr.msra.gmra.mrb[20].mxu1 %vm508_vm9, %v3080_v28  ;;  %3707 = vmatprep.mubr.f32.mxu0 %v6585_v10 }
 0x9ba   :  { %v3085_v44 = vpop.permute.xlu1 %3084 }
 0xa86   :  { %v3136_v35 = vpop.f32.mrb[20].mxu0 }
 0xa87   :  { %v6137_v7 = vadd.f32 %v3136_v35, %v3085_v44  ;;  %v3138_v40 = vpop.f32.mrb[21].mxu0  ;;  %v3177_v45 = vpop.f32.mrb[20].mxu1 }
 0xa88   :  { %v6139_v3 = vadd.f32 %v3138_v40, %v3085_v44  ;;  %v6142_v43 = vadd.f32 %v3177_v45, %v3085_v44  ;;  %v3140_v13 = vpop.f32.mrb[22].mxu0  ;;  %v3179_v8 = vpop.f32.mrb[21].mxu1 }
 0xa89   :  { %v6144_v62 = vadd.f32 %v3179_v8, %v3085_v44  ;;  %v3141_v41 = vpop.f32.mrb[23].mxu0  ;;  %v3181_v37 = vpop.f32.mrb[22].mxu1 }
 0xa8a   :  { %v3193_v30 = vcombine.low %v6137_v7, %v6139_v3  ;;  %v3182_v61 = vpop.f32.mrb[23].mxu1 }
 0xa8b   :  { %v3194_v2 = vcombine.low %v6142_v43, %v6144_v62 }
 0xa8c   :  { %v3201_v56 = vrot.slane %v3193_v30, %v3200_v49 }
 0xa8d   :  { %v3208_v1 = vrot.slane %v3194_v2, %v3200_v49 }
 0xa8f   :  { %v3209_v60 = vcombine.low %v3201_v56, %v3208_v1  ;;  %v3219_v31 = vcombine.high %v3201_v56, %v3208_v1 }
 0xa91   :  { %v3216_v52 = vrot.slane %v3209_v60, %v3200_v49  ;;  %v3226_v50 = vrot.slane %v3219_v31, %v3200_v49 }
 0xa93   :  { %v3218_v55 = vadd.f32 %v3216_v52, %v3184_v19  ;;  %v3228_v38 = vadd.f32 %v4001_v42, %v3226_v50 }
 0xa95   :  { %v3229_v33 = vfloor.f32 %v3218_v55  ;;  %v3230_v15 = vfloor.f32 %v3228_v38 }
 0xa97   :  { %v4139_v32 = vtrunc.f32 %v3229_v33  ;;  %v4141_v24 = vtrunc.f32 %v3230_v15  ;;  %v3231_v34 = vsub.f32 %v3218_v55, %v3229_v33  ;;  %v6159_v21 = vsub.f32 %v3228_v38, %v3230_v15 }
 0xa99   :  { %v4140_v27 = vcvt.f32.s32 %v4139_v32  ;;  %v6161_v12 = vcvt.f32.s32 %v4141_v24  ;;  %v3326_v46 = vsub.f32 1.0, %v3231_v34  ;;  %v3524_v29 = vsub.f32 1.0, %v6159_v21 }
 0xa9b   :  { %vm3236_vm13 = vcmp.ge.s32.totalorder %v4140_v27, 0  ;;  %vm3237_vm14 = vcmp.le.s32.totalorder %v4140_v27, 15  ;;  %vm3241_vm15 = vcmp.ge.s32.totalorder %v4140_v27, 4294967295  ;;  %vm3242_vm0 = vcmp.le.s32.totalorder %v4140_v27, 14 }
 0xa9c   :  { %vm3238_vm1 = vmand %vm3236_vm13, %vm3237_vm14  ;;  %v3256_v47 = vadd.s32 %v4144_v14, %v4140_v27  ;;  %v6175_v36 = vadd.s32 1, %v6161_v12 }
 0xa9d   :  { %v4003_v58 = vsel %vm3238_vm1, 1.0, %v6585_v10  ;;  %vm3243_vm2 = vmand %vm3241_vm15, %vm3242_vm0 }
 0xa9e   :  { %v4004_v57 = vsel %vm3243_vm2, 1.0, %v6585_v10  ;;  %v6178_v4 = vmul.f32 %v4003_v58, %v3326_v46  ;;  %v3269_v5 = vrot.slane %v3256_v47, %v4465_v11  ;;  %v6181_v20 = vadd.s32 1, %v3256_v47 }
 0xa9f   :  { %v6183_v48 = vmul.f32 %v4004_v57, %v3231_v34  ;;  %v3265_v59 = vrot.slane %v3256_v47, %v4475_v16  ;;  %v6187_v9 = vrot.slane %v3256_v47, %v4478_v17  ;;  %v6190_v23 = vrot.slane %v3256_v47, %v4481_v18 }
 0xaa0   :  { %vm3279_vm3 = vcmp.eq.s32.totalorder %v6586_v26, %v3269_v5  ;;  %vm3283_vm4 = vcmp.eq.s32.totalorder %v6164_v22, %v3269_v5  ;;  %v3336_v25 = vrot.slane %v6178_v4, %v4465_v11  ;;  %v3373_v28 = vrot.slane %v6181_v20, %v4465_v11 }
 0xaa1   :  { %v4008_v54 = vsel %vm3279_vm3, 1.0, %v6585_v10  ;;  %v4012_v0 = vsel %vm3283_vm4, 1.0, %v6585_v10  ;;  %v3439_v39 = vrot.slane %v6183_v48, %v4465_v11  ;;  %vm3278_vm5 = vcmp.eq.s32.totalorder %v6586_v26, %v3265_v59 }
 0xaa2   :  { %v3350_v44 = vmul.f32 %v4008_v54, %v3336_v25  ;;  %v3354_v35 = vmul.f32 %v4012_v0, %v3336_v25  ;;  %vm3383_vm6 = vcmp.eq.s32.totalorder %v6586_v26, %v3373_v28  ;;  %vm3387_vm7 = vcmp.eq.s32.totalorder %v6164_v22, %v3373_v28 }
 0xaa3   :  { %v4024_v40 = vsel %vm3383_vm6, 1.0, %v6585_v10  ;;  %v4028_v45 = vsel %vm3387_vm7, 1.0, %v6585_v10  ;;  %vm3282_vm8 = vcmp.eq.s32.totalorder %v6164_v22, %v3265_v59  ;;  %v4007_v49 = vsel %vm3278_vm5, 1.0, %v6585_v10 }
 0xaa4   :  { %v3453_v13 = vmul.f32 %v4024_v40, %v3439_v39  ;;  %v3457_v8 = vmul.f32 %v4028_v45, %v3439_v39  ;;  %v4011_v41 = vsel %vm3282_vm8, 1.0, %v6585_v10  ;;  %v3332_v37 = vrot.slane %v6178_v4, %v4475_v16 }
 0xaa5   :  { %v3369_v30 = vrot.slane %v6181_v20, %v4475_v16  ;;  %v3435_v61 = vrot.slane %v6183_v48, %v4475_v16  ;;  %vm3287_vm9 = vcmp.eq.s32.totalorder %v6167_v63, %v3269_v5  ;;  %vm3291_vm10 = vcmp.eq.s32.totalorder %v6172_v6, %v3269_v5 }
 0xaa6   :  { %v3469_v2 = vadd.f32 %v3453_v13, %v3350_v44  ;;  %v3473_v56 = vadd.f32 %v3457_v8, %v3354_v35  ;;  %v3349_v1 = vmul.f32 %v4007_v49, %v3332_v37  ;;  %v3353_v60 = vmul.f32 %v4011_v41, %v3332_v37 }
 0xaa7   :  { %vm3382_vm11 = vcmp.eq.s32.totalorder %v6586_v26, %v3369_v30  ;;  %vm3386_vm12 = vcmp.eq.s32.totalorder %v6164_v22, %v3369_v30  ;;  %v4016_v31 = vsel %vm3287_vm9, 1.0, %v6585_v10  ;;  %v4020_v19 = vsel %vm3291_vm10, 1.0, %v6585_v10 }
 0xaa8   :  { %v4123_v42 = vpack.c.bf16 %v3473_v56, %v3469_v2  ;;  %v4023_v51 = vsel %vm3382_vm11, 1.0, %v6585_v10  ;;  %v4027_v52 = vsel %vm3386_vm12, 1.0, %v6585_v10  ;;  %v3358_v50 = vmul.f32 %v4016_v31, %v3336_v25 }
 0xaa9   :  { %v3452_v55 = vmul.f32 %v4023_v51, %v3435_v61  ;;  %v3456_v38 = vmul.f32 %v4027_v52, %v3435_v61  ;;  %v3362_v53 = vmul.f32 %v4020_v19, %v3336_v25  ;;  %vm3391_vm13 = vcmp.eq.s32.totalorder %v6167_v63, %v3373_v28  ;;  %v6271_v52 = vld [vmem:[%s6424_s1] sm:$0xff] }
 0xaaa   :  { %4124 = vmatprep.subr.bf16.mxu0 %v4123_v42  ;;  %vm3395_vm14 = vcmp.eq.s32.totalorder %v6172_v6, %v3373_v28  ;;  %v4032_v33 = vsel %vm3391_vm13, 1.0, %v6585_v10  ;;  %vm3286_vm15 = vcmp.eq.s32.totalorder %v6167_v63, %v3265_v59  ;;  %vm3290_vm0 = vcmp.eq.s32.totalorder %v6172_v6, %v3265_v59 }
 0xaab   :  { %v3468_v15 = vadd.f32 %v3452_v55, %v3349_v1  ;;  %v3472_v32 = vadd.f32 %v3456_v38, %v3353_v60  ;;  %v4036_v24 = vsel %vm3395_vm14, 1.0, %v6585_v10  ;;  %v3461_v34 = vmul.f32 %v4032_v33, %v3439_v39 }
 0xaac   :  { %v3465_v14 = vmul.f32 %v4036_v24, %v3439_v39  ;;  %v4015_v27 = vsel %vm3286_vm15, 1.0, %v6585_v10  ;;  %v4019_v47 = vsel %vm3290_vm0, 1.0, %v6585_v10  ;;  %vm3390_vm1 = vcmp.eq.s32.totalorder %v6167_v63, %v3369_v30 }
 0xaad   :  { %v4125_v46 = vpack.c.bf16 %v3472_v32, %v3468_v15  ;;  %v3477_v58 = vadd.f32 %v3461_v34, %v3358_v50  ;;  %v3357_v57 = vmul.f32 %v4015_v27, %v3332_v37  ;;  %v3361_v5 = vmul.f32 %v4019_v47, %v3332_v37 }
 0xaae   :  { %v3481_v25 = vadd.f32 %v3465_v14, %v3362_v53  ;;  %vm3394_vm2 = vcmp.eq.s32.totalorder %v6172_v6, %v3369_v30  ;;  %v4031_v59 = vsel %vm3390_vm1, 1.0, %v6585_v10  ;;  %vm3281_vm3 = vcmp.eq.s32.totalorder %v6586_v26, %v6187_v9  ;;  %v6291_v14 = vld [vmem:[%s6424_s1 + $0x8] sm:$0xff] }
 0xaaf   :  { %vm3636_vm4 = vcmask 261120   ;;  %4126 = vmatpush1.bf16.msra.mxu0 %v4125_v46  ;;  %v4035_v28 = vsel %vm3394_vm2, 1.0, %v6585_v10  ;;  %v3460_v54 = vmul.f32 %v4031_v59, %v3435_v61  ;;  %vm3285_vm5 = vcmp.eq.s32.totalorder %v6164_v22, %v6187_v9 }
 0xab0   :  { %v4010_v0 = vsel %vm3281_vm3, 1.0, %v6585_v10  ;;  %v4127_v39 = vpack.c.bf16 %v3481_v25, %v3477_v58  ;;  %v3464_v44 = vmul.f32 %v4035_v28, %v3435_v61  ;;  %v4014_v35 = vsel %vm3285_vm5, 1.0, %v6585_v10 }
 0xab1   :  { %v3344_v40 = vrot.slane %v6178_v4, %v4478_v17  ;;  %vm3246_vm6 = vcmp.ge.s32.totalorder %v6161_v12, 0  ;;  %vm3247_vm7 = vcmp.le.s32.totalorder %v6161_v12, 15  ;;  %v3476_v45 = vadd.f32 %v3460_v54, %v3357_v57 }
 0xab2   :  { %v3381_v49 = vrot.slane %v6181_v20, %v4478_v17  ;;  %v3447_v13 = vrot.slane %v6183_v48, %v4478_v17  ;;  %vm3280_vm8 = vcmp.eq.s32.totalorder %v6586_v26, %v6190_v23  ;;  %vm3251_vm9 = vcmp.ge.s32.totalorder %v6161_v12, 4294967295  ;;  %4128 = vmatprep.subr.bf16.mxu0 %v4127_v39 }
 0xab3   :  { %vm3252_vm10 = vcmp.le.s32.totalorder %v6161_v12, 14  ;;  %v3480_v8 = vadd.f32 %v3464_v44, %v3361_v5  ;;  %v3352_v41 = vmul.f32 %v4010_v0, %v3344_v40  ;;  %v3356_v37 = vmul.f32 %v4014_v35, %v3344_v40 }
 0xab4   :  { %vm3284_vm11 = vcmp.eq.s32.totalorder %v6164_v22, %v6190_v23  ;;  %vm3385_vm12 = vcmp.eq.s32.totalorder %v6586_v26, %v3381_v49  ;;  %vm3389_vm13 = vcmp.eq.s32.totalorder %v6164_v22, %v3381_v49  ;;  %v4009_v30 = vsel %vm3280_vm8, 1.0, %v6585_v10  ;;  %vm6301_vm8 = vmand %vm3246_vm6, %vm3247_vm7 }
 0xab5   :  { %v4013_v61 = vsel %vm3284_vm11, 1.0, %v6585_v10  ;;  %v4129_v2 = vpack.c.bf16 %v3480_v8, %v3476_v45  ;;  %v4026_v56 = vsel %vm3385_vm12, 1.0, %v6585_v10  ;;  %v4030_v1 = vsel %vm3389_vm13, 1.0, %v6585_v10  ;;  %vm3253_vm12 = vmand %vm3251_vm9, %vm3252_vm10 }
 0xab6   :  { %v3340_v60 = vrot.slane %v6178_v4, %v4481_v18  ;;  %v3455_v31 = vmul.f32 %v4026_v56, %v3447_v13  ;;  %v3459_v19 = vmul.f32 %v4030_v1, %v3447_v13  ;;  %v3377_v42 = vrot.slane %v6181_v20, %v4481_v18 }
 0xab7   :  { %v3443_v51 = vrot.slane %v6183_v48, %v4481_v18  ;;  %4130 = vmatpush1.bf16.msra.mxu0 %v4129_v2  ;;  %vm3289_vm14 = vcmp.eq.s32.totalorder %v6167_v63, %v6187_v9  ;;  %vm3293_vm15 = vcmp.eq.s32.totalorder %v6172_v6, %v6187_v9  ;;  %vm3393_vm2 = vcmp.eq.s32.totalorder %v6167_v63, %v3381_v49 }
 0xab8   :  { %v3351_v50 = vmul.f32 %v4009_v30, %v3340_v60  ;;  %v3355_v55 = vmul.f32 %v4013_v61, %v3340_v60  ;;  %v3471_v4 = vadd.f32 %v3455_v31, %v3352_v41  ;;  %v3475_v38 = vadd.f32 %v3459_v19, %v3356_v37 }
 0xab9   :  { %vm3384_vm0 = vcmp.eq.s32.totalorder %v6586_v26, %v3377_v42  ;;  %vm3388_vm1 = vcmp.eq.s32.totalorder %v6164_v22, %v3377_v42  ;;  %v4018_v53 = vsel %vm3289_vm14, 1.0, %v6585_v10  ;;  %v4022_v33 = vsel %vm3293_vm15, 1.0, %v6585_v10 }
 0xaba   :  { %v4025_v20 = vsel %vm3384_vm0, 1.0, %v6585_v10  ;;  %v4029_v48 = vsel %vm3388_vm1, 1.0, %v6585_v10  ;;  %v4131_v15 = vpack.c.bf16 %v3475_v38, %v3471_v4  ;;  %4055 = vmatmul.mubr.msk.f32.vlgmr.msra.gmra.mrb[24].mxu0 %vm3636_vm4, %v6271_v52  ;;  %v3360_v24 = vmul.f32 %v4018_v53, %v3344_v40 }
 0xabb   :  { %v3454_v32 = vmul.f32 %v4025_v20, %v3443_v51  ;;  %v3458_v9 = vmul.f32 %v4029_v48, %v3443_v51  ;;  %v3364_v34 = vmul.f32 %v4022_v33, %v3344_v40  ;;  %vm3397_vm3 = vcmp.eq.s32.totalorder %v6172_v6, %v3381_v49  ;;  %3713 = vmatprep.mubr.f32.mxu0 %v6585_v10 }
 0xabc   :  { %vm3288_vm5 = vcmp.eq.s32.totalorder %v6167_v63, %v6190_v23  ;;  %4132 = vmatprep.subr.bf16.mxu0 %v4131_v15  ;;  %v4034_v46 = vsel %vm3393_vm2, 1.0, %v6585_v10  ;;  %v4038_v58 = vsel %vm3397_vm3, 1.0, %v6585_v10  ;;  %vm3292_vm11 = vcmp.eq.s32.totalorder %v6172_v6, %v6190_v23 }
 0xabd   :  { %v3470_v27 = vadd.f32 %v3454_v32, %v3351_v50  ;;  %v3474_v47 = vadd.f32 %v3458_v9, %v3355_v55  ;;  %v3463_v5 = vmul.f32 %v4034_v46, %v3447_v13  ;;  %v3467_v25 = vmul.f32 %v4038_v58, %v3447_v13 }
 0xabe   :  { %v4017_v59 = vsel %vm3288_vm5, 1.0, %v6585_v10  ;;  %4056 = vmatmul.mubr.msk.f32.gmra.mrb[26].mxu0 %vm3636_vm4, %v6291_v14  ;;  %v4021_v54 = vsel %vm3292_vm11, 1.0, %v6585_v10  ;;  %vm3392_vm6 = vcmp.eq.s32.totalorder %v6167_v63, %v3377_v42  ;;  %vm3396_vm7 = vcmp.eq.s32.totalorder %v6172_v6, %v3377_v42 }
 0xabf   :  { %v4133_v28 = vpack.c.bf16 %v3474_v47, %v3470_v27  ;;  %v3359_v0 = vmul.f32 %v4017_v59, %v3340_v60  ;;  %v3479_v39 = vadd.f32 %v3463_v5, %v3360_v24  ;;  %v3483_v44 = vadd.f32 %v3467_v25, %v3364_v34  ;;  %3784 = vmatprep.mubr.f32.mxu0 %v6585_v10 }
 0xac0   :  { %v3363_v35 = vmul.f32 %v4021_v54, %v3340_v60  ;;  %v4033_v23 = vsel %vm3392_vm6, 1.0, %v6585_v10  ;;  %v4037_v40 = vsel %vm3396_vm7, 1.0, %v6585_v10  ;;  %v4005_v45 = vsel %vm6301_vm8, 1.0, %v6585_v10 }
 0xac1   :  { %4134 = vmatpush1.bf16.msra.mxu0 %v4133_v28  ;;  %v4006_v49 = vsel %vm3253_vm12, 1.0, %v6585_v10  ;;  %v4135_v13 = vpack.c.bf16 %v3483_v44, %v3479_v39  ;;  %v3462_v63 = vmul.f32 %v4033_v23, %v3443_v51  ;;  %v3466_v8 = vmul.f32 %v4037_v40, %v3443_v51 }
 0xac2   :  { %v3525_v41 = vmul.f32 %v4005_v45, %v3524_v29  ;;  %v3596_v6 = vmul.f32 %v4006_v49, %v6159_v21  ;;  %v3487_v61 = vrot.slane %v6161_v12, %v4475_v16  ;;  %v3559_v2 = vrot.slane %v6175_v36, %v4475_v16 }
 0xac3   :  { %4136 = vmatprep.subr.bf16.mxu0 %v4135_v13  ;;  %v3478_v37 = vadd.f32 %v3462_v63, %v3359_v0  ;;  %v3482_v30 = vadd.f32 %v3466_v8, %v3363_v35  ;;  %v3491_v56 = vrot.slane %v6161_v12, %v4465_v11  ;;  %v3563_v21 = vrot.slane %v6175_v36, %v4465_v11 }
 0xac4   :  { %v3530_v60 = vrot.slane %v3525_v41, %v4475_v16  ;;  %v3601_v31 = vrot.slane %v3596_v6, %v4475_v16  ;;  %v3534_v29 = vrot.slane %v3525_v41, %v4465_v11  ;;  %vm3504_vm9 = vcmp.eq.s32.totalorder %v6164_v22, %v3487_v61 }
 0xac5   :  { %v4137_v1 = vpack.c.bf16 %v3482_v30, %v3478_v37  ;;  %vm3576_vm10 = vcmp.eq.s32.totalorder %v6164_v22, %v3559_v2  ;;  %v3605_v19 = vrot.slane %v3596_v6, %v4465_v11  ;;  %v4043_v42 = vsel %vm3504_vm9, 1.0, %v6585_v10 }
 0xac6   :  { %v4051_v51 = vsel %vm3576_vm10, 1.0, %v6585_v10  ;;  %vm3505_vm13 = vcmp.eq.s32.totalorder %v6164_v22, %v3491_v56  ;;  %v3551_v50 = vmul.f32 %v4043_v42, %v3530_v60  ;;  %vm3577_vm14 = vcmp.eq.s32.totalorder %v6164_v22, %v3563_v21 }
 0xac7   :  { %4138 = vmatpush1.bf16.msra.mxu0 %v4137_v1  ;;  %v3622_v16 = vmul.f32 %v4051_v51, %v3601_v31  ;;  %v4044_v55 = vsel %vm3505_vm13, 1.0, %v6585_v10  ;;  %v4052_v11 = vsel %vm3577_vm14, 1.0, %v6585_v10  ;;  %v3495_v48 = vrot.slane %v6161_v12, %v4481_v18 }
 0xac8   :  { %v3552_v4 = vmul.f32 %v4044_v55, %v3534_v29  ;;  %v3623_v20 = vmul.f32 %v4052_v11, %v3605_v19  ;;  %v3567_v53 = vrot.slane %v6175_v36, %v4481_v18  ;;  %v3538_v33 = vrot.slane %v3525_v41, %v4481_v18 }
 0xac9   :  { %v3630_v38 = vadd.f32 %v3622_v16, %v3551_v50  ;;  %v3609_v15 = vrot.slane %v3596_v6, %v4481_v18  ;;  %v3499_v32 = vrot.slane %v6161_v12, %v4478_v17  ;;  %v3571_v9 = vrot.slane %v6175_v36, %v4478_v17 }
 0xaca   :  { %4057 = vmatmul.mubr.msk.f32.vlgmr.msra.gmra.mrb[28].mxu0 %vm3636_vm4, %v6271_v52  ;;  %v3631_v52 = vadd.f32 %v3623_v20, %v3552_v4  ;;  %v3542_v24 = vrot.slane %v3525_v41, %v4478_v17  ;;  %v3613_v34 = vrot.slane %v3596_v6, %v4478_v17  ;;  %vm3506_vm15 = vcmp.eq.s32.totalorder %v6164_v22, %v3495_v48 }
 0xacb   :  { %3790 = vmatprep.mubr.f32.mxu0 %v6585_v10  ;;  %vm3578_vm0 = vcmp.eq.s32.totalorder %v6164_v22, %v3567_v53  ;;  %v4045_v27 = vsel %vm3506_vm15, 1.0, %v6585_v10  ;;  %vm3579_vm1 = vcmp.eq.s32.totalorder %v6164_v22, %v3571_v9  ;;  %vm3572_vm2 = vcmp.eq.s32.totalorder %v6586_v26, %v3559_v2 }
 0xacc   :  { %v3553_v47 = vmul.f32 %v4045_v27, %v3538_v33  ;;  %v4054_v36 = vsel %vm3579_vm1, 1.0, %v6585_v10  ;;  %vm3573_vm3 = vcmp.eq.s32.totalorder %v6586_v26, %v3563_v21  ;;  %vm3500_vm5 = vcmp.eq.s32.totalorder %v6586_v26, %v3487_v61 }
 0xacd   :  { %v3625_v58 = vmul.f32 %v4054_v36, %v3613_v34  ;;  %v4047_v5 = vsel %vm3572_vm2, 1.0, %v6585_v10  ;;  %vm3501_vm8 = vcmp.eq.s32.totalorder %v6586_v26, %v3491_v56  ;;  %v4039_v25 = vsel %vm3500_vm5, 1.0, %v6585_v10 }
 0xace   :  { %4058 = vmatmul.mubr.msk.f32.gmra.mrb[30].mxu0 %vm3636_vm4, %v6291_v14  ;;  %v4053_v14 = vsel %vm3578_vm0, 1.0, %v6585_v10  ;;  %vm3507_vm4 = vcmp.eq.s32.totalorder %v6164_v22, %v3499_v32  ;;  %v4048_v22 = vsel %vm3573_vm3, 1.0, %v6585_v10  ;;  %v3547_v59 = vmul.f32 %v4039_v25, %v3530_v60 }
 0xacf   :  { %v3624_v18 = vmul.f32 %v4053_v14, %v3609_v15  ;;  %v4046_v12 = vsel %vm3507_vm4, 1.0, %v6585_v10  ;;  %v3618_v28 = vmul.f32 %v4047_v5, %v3601_v31  ;;  %v4040_v54 = vsel %vm3501_vm8, 1.0, %v6585_v10 }
 0xad0   :  { %v3554_v17 = vmul.f32 %v4046_v12, %v3542_v24  ;;  %v3548_v0 = vmul.f32 %v4040_v54, %v3534_v29  ;;  %v3619_v39 = vmul.f32 %v4048_v22, %v3605_v19  ;;  %vm3574_vm11 = vcmp.eq.s32.totalorder %v6586_v26, %v3567_v53 }
 0xad1   :  { %v6372_v46 = vadd.f32 %v3624_v18, %v3553_v47  ;;  %v3626_v44 = vadd.f32 %v3618_v28, %v3547_v59  ;;  %vm3575_vm12 = vcmp.eq.s32.totalorder %v6586_v26, %v3571_v9  ;;  %vm3502_vm6 = vcmp.eq.s32.totalorder %v6586_v26, %v3495_v48 }
 0xad2   :  { %v6374_v57 = vadd.f32 %v3625_v58, %v3554_v17  ;;  %v3627_v23 = vadd.f32 %v3619_v39, %v3548_v0  ;;  %v4049_v30 = vsel %vm3574_vm11, 1.0, %v6585_v10  ;;  %vm3503_vm7 = vcmp.eq.s32.totalorder %v6586_v26, %v3499_v32 }
 0xad3   :  { %v4050_v2 = vsel %vm3575_vm12, 1.0, %v6585_v10  ;;  %v4041_v1 = vsel %vm3502_vm6, 1.0, %v6585_v10  ;;  %v3620_v29 = vmul.f32 %v4049_v30, %v3609_v15  ;;  %v4042_v21 = vsel %vm3503_vm7, 1.0, %v6585_v10 }
 0xad4   :  { %v3549_v31 = vmul.f32 %v4041_v1, %v3538_v33  ;;  %v3550_v42 = vmul.f32 %v4042_v21, %v3542_v24  ;;  %v3621_v51 = vmul.f32 %v4050_v2, %v3613_v34  ;;  %vm3841_vm9 = vcmask 1040384  }
 0xad5   :  { %v3833_v33 = vrot.slane %v6137_v7, 7  ;;  %v3834_v10 = vrot.slane %v6139_v3, 7  ;;  %v3835_v0 = vrot.slane %v6142_v43, 7  ;;  %v3836_v39 = vrot.slane %v6144_v62, 7 }
 0xad6   :  { %v3628_v4 = vadd.f32 %v3620_v29, %v3549_v31  ;;  %v3629_v11 = vadd.f32 %v3621_v51, %v3550_v42 }
 0xb8d   :  { %v3709_v35 = vpop.f32.mrb[24].mxu0 }
 0xb8e   :  { %v3797_v40 = vmul.f32 %v3709_v35, %v3626_v44  ;;  %v3711_v45 = vpop.f32.mrb[25].mxu0 }
 0xb8f   :  { %v3798_v49 = vmul.f32 %v3711_v45, %v3627_v23 }
 0xb91   :  { %v3715_v13 = vpop.f32.mrb[26].mxu0 }
 0xb92   :  { %v3801_v63 = vmul.f32 %v3715_v13, %v3630_v38  ;;  %v3717_v8 = vpop.f32.mrb[27].mxu0 }
 0xb93   :  { %v3802_v41 = vmul.f32 %v3717_v8, %v3631_v52 }
 0xb94   :  { %v3805_v6 = vadd.f32 %v3801_v63, %v3797_v40 }
 0xb95   :  { %v3812_v37 = vadd.f32 %v3802_v41, %v3798_v49 }
 0xb96   :  { %v3806_v61 = vrot.slane %v3805_v6, 4 }
 0xb97   :  { %v3813_v56 = vrot.slane %v3812_v37, 4 }
 0xb98   :  { %v3807_v60 = vadd.f32 %v3806_v61, %v3805_v6 }
 0xb99   :  { %v3814_v19 = vadd.f32 %v3813_v56, %v3812_v37 }
 0xb9a   :  { %v3808_v50 = vrot.slane %v3807_v60, 2 }
 0xb9b   :  { %v3815_v16 = vrot.slane %v3814_v19, 2 }
 0xb9c   :  { %v3809_v55 = vadd.f32 %v3808_v50, %v3807_v60 }
 0xb9d   :  { %v3816_v38 = vadd.f32 %v3815_v16, %v3814_v19  ;;  %v3786_v26 = vpop.f32.mrb[28].mxu0 }
 0xb9e   :  { %v3810_v20 = vrot.slane %v3809_v55, 1  ;;  %v3799_v48 = vmul.f32 %v3786_v26, %v3628_v4  ;;  %v3788_v53 = vpop.f32.mrb[29].mxu0 }
 0xb9f   :  { %v3817_v52 = vrot.slane %v3816_v38, 1  ;;  %v3800_v32 = vmul.f32 %v3788_v53, %v3629_v11 }
 0xba0   :  { %v3811_v15 = vadd.f32 %v3810_v20, %v3809_v55 }
 0xba1   :  { %v3818_v9 = vadd.f32 %v3817_v52, %v3816_v38  ;;  %v3792_v24 = vpop.f32.mrb[30].mxu0 }
 0xba2   :  { %v3842_v34 = vsel %vm3841_vm9, %v3811_v15, %v3833_v33  ;;  %v3803_v27 = vmul.f32 %v3792_v24, %v6372_v46  ;;  %v3794_v14 = vpop.f32.mrb[31].mxu0 }
 0xba3   :  { %v3843_v47 = vsel %vm3841_vm9, %v3818_v9, %v3834_v10  ;;  %v3804_v18 = vmul.f32 %v3794_v14, %v6374_v57 }
 0xba4   :  { %v3850_v12 = vcombine.low %v3842_v34, %v3843_v47  ;;  %v3819_v36 = vadd.f32 %v3803_v27, %v3799_v48 }
 0xba5   :  { %v3826_v17 = vadd.f32 %v3804_v18, %v3800_v32 }
 0xba6   :  { %3854 = vst [vmem:[%s6425_s17] sm:$0x77] %v3850_v12  ;;  %v3820_v7 = vrot.slane %v3819_v36, 4 }
 0xba7   :  { %v3827_v3 = vrot.slane %v3826_v17, 4 }
 0xba8   :  { %v3821_v58 = vadd.f32 %v3820_v7, %v3819_v36 }
 0xba9   :  { %v3828_v5 = vadd.f32 %v3827_v3, %v3826_v17 }
 0xbaa   :  { %v3822_v22 = vrot.slane %v3821_v58, 2 }
 0xbab   :  { %v3829_v25 = vrot.slane %v3828_v5, 2 }
 0xbac   :  { %v3823_v59 = vadd.f32 %v3822_v22, %v3821_v58 }
 0xbad   :  { %v3830_v46 = vadd.f32 %v3829_v25, %v3828_v5 }
 0xbae   :  { %v3824_v28 = vrot.slane %v3823_v59, 1 }
 0xbaf   :  { %v3831_v54 = vrot.slane %v3830_v46, 1 }
 0xbb0   :  { %v3825_v57 = vadd.f32 %v3824_v28, %v3823_v59 }
 0xbb1   :  { %v3832_v44 = vadd.f32 %v3831_v54, %v3830_v46 }
 0xbb2   :  { %v3844_v35 = vsel %vm3841_vm9, %v3825_v57, %v3835_v0 }
 0xbb3   :  { %v3845_v23 = vsel %vm3841_vm9, %v3832_v44, %v3836_v39 }
 0xbb4   :  { %v3851_v40 = vcombine.low %v3844_v35, %v3845_v23 }
 0xbb6   :  { %3855 = vst [vmem:[%s6425_s17 + $0x8] sm:$0x77] %v3851_v40 }

</bundles_post_ra>
